<compile_context>
chip_gen: v7x
topology: tpu7x:2x2x1
jax: 0.10.0
libtpu: 0.0.40
codegen_flags: <defaults>
</compile_context>

<pallas_src>
import functools
import math

import numpy as np
import jax
import jax.numpy as jnp
from jax.experimental import pallas as pl
from jax.experimental.pallas import tpu as pltpu

_INV_SQRT2 = float(1.0 / math.sqrt(2.0))


def _gn_conv_kernel(x_ref, w_ref, s_ref, gb_ref, o_ref, *,
                    n_do, kd, d_stride, eps, inv_p):
    # x_ref : (1, C_in, D, H*W)            input dtype (cast to bf16 on-chip)
    # w_ref : (kd*kh*kw, C_out, C_in)      bf16, tap-major weight slices
    # s_ref : (kh*kw, H*W, Ho*Wo)          bf16 0/1 lane-selection matrices
    # gb_ref: (C_out, 2)                   f32  [gamma | beta]
    # o_ref : (1, C_out, P)                bf16, P = Do*Ho*Wo (lane-dense)
    khkw = s_ref.shape[0]
    howo = s_ref.shape[2]
    c_out = w_ref.shape[1]

    planes = []
    for do in range(n_do):
        acc = jnp.zeros((c_out, howo), jnp.float32)
        for i in range(kd):
            # Depth tap: static sublane select, lane axis stays H*W (no gather).
            xplane = x_ref[0, :, d_stride * do + i, :].astype(jnp.bfloat16)  # (C_in, HW)
            for t in range(khkw):
                # (kh, kw) tap gather via exact 0/1 selection matmul on the MXU:
                # every column of s_ref[t] has exactly one 1 -> result == the
                # selected bf16 value, so the bf16 round-trip below is exact.
                patch = jnp.dot(xplane, s_ref[t],
                                preferred_element_type=jnp.float32)          # (C_in, HoWo)
                patch = patch.astype(jnp.bfloat16)
                # Conv contribution of this (i, j, k) tap (bf16 in, f32 acc).
                acc = acc + jnp.dot(w_ref[i * khkw + t], patch,
                                    preferred_element_type=jnp.float32)      # (C_out, HoWo)
        planes.append(acc)
    y = jnp.concatenate(planes, axis=-1) if n_do > 1 else planes[0]          # (C_out, P)

    # GroupNorm with num_groups == num_channels: per-channel stats over the P
    # lane axis.  True-f32 XLU reductions, biased variance (matches torch).
    mean = jnp.sum(y, axis=-1, keepdims=True) * inv_p
    d = y - mean
    var = jnp.sum(d * d, axis=-1, keepdims=True) * inv_p
    y = d * jax.lax.rsqrt(var + eps)

    gb = gb_ref[...]                                                         # (C_out, 2)
    y = y * gb[:, 0:1] + gb[:, 1:2]

    # Exact GELU (erf form), matching torch.nn.GELU / ACT2FN["gelu"].
    y = 0.5 * y * (1.0 + jax.lax.erf(y * _INV_SQRT2))

    o_ref[0] = y.astype(o_ref.dtype)


def sign2vec_groupnorm_conv_layer(x, weight, bias, gamma, beta, *, stride,
                                  eps=1e-5):
    """x: (N, C_in, D, H, W); weight: (C_out, C_in, kd, kh, kw) (PyTorch order).

    `bias` is accepted for API parity but not used: it cancels exactly through
    per-channel GroupNorm (group == single channel).
    Returns bf16 (N, C_out, Do, Ho, Wo).
    """
    del bias  # exact no-op through GroupNorm(num_groups == num_channels)

    N, C_in, D, H, W = x.shape
    C_out, C_in_w, kd, kh, kw = weight.shape
    assert C_in == C_in_w
    sd, sh, sw = stride
    Do = (D - kd) // sd + 1
    Ho = (H - kh) // sh + 1
    Wo = (W - kw) // sw + 1
    HW = H * W
    HoWo = Ho * Wo
    P = Do * HoWo

    # --- host-side static operands (no activation-sized HBM copies) --------
    # x: free reshape only (contiguous), kernel reads it once from HBM.
    xr = x.reshape(N, C_in, D, HW)

    # Weight, tap-major: w_r[(i*kh + j)*kw + k, co, ci] = weight[co, ci, i, j, k]
    w_r = jnp.transpose(weight, (2, 3, 4, 0, 1)).reshape(kd * kh * kw, C_out,
                                                         C_in)
    w_r = w_r.astype(jnp.bfloat16)

    # Static 0/1 lane-selection matrices for the (kh, kw) taps (exact in bf16).
    s_np = np.zeros((kh * kw, HW, HoWo), np.float32)
    for j in range(kh):
        for k in range(kw):
            t = j * kw + k
            for ho in range(Ho):
                for wo in range(Wo):
                    s_np[t, (sh * ho + j) * W + (sw * wo + k), ho * Wo + wo] = 1.0
    sel = jnp.asarray(s_np, dtype=jnp.bfloat16)

    # Merged affine params: one padded VMEM tile / DMA instead of three.
    gb = jnp.stack([gamma, beta], axis=-1).astype(jnp.float32)   # (C_out, 2)

    kernel = functools.partial(_gn_conv_kernel, n_do=Do, kd=kd, d_stride=sd,
                               eps=float(eps), inv_p=1.0 / P)

    out = pl.pallas_call(
        kernel,
        out_shape=jax.ShapeDtypeStruct((N, C_out, P), jnp.bfloat16),
        grid=(N,),
        in_specs=[
            pl.BlockSpec((1, C_in, D, HW), lambda n: (n, 0, 0, 0)),
            pl.BlockSpec((kd * kh * kw, C_out, C_in), lambda n: (0, 0, 0)),
            pl.BlockSpec((kh * kw, HW, HoWo), lambda n: (0, 0, 0)),
            pl.BlockSpec((C_out, 2), lambda n: (0, 0)),
        ],
        out_specs=pl.BlockSpec((1, C_out, P), lambda n: (n, 0, 0)),
        compiler_params=pltpu.CompilerParams(
            dimension_semantics=("parallel",)),
    )(xr, w_r, sel, gb)

    # (N, C_out, P) is already NCDHW-ordered -> free reshape, no transpose.
    return out.reshape(N, C_out, Do, Ho, Wo)


def _reference(x, weight, bias, gamma, beta, *, stride, eps=1e-5):
    # Mirrors the kernel's bf16-operand / f32-accumulate convolution so the
    # comparison is apples-to-apples; GN + GELU stay f32 as in the kernel.
    # NOTE: the bias IS applied here (as in the torch module) -- it cancels
    # through GroupNorm, which is exactly why the kernel drops it.
    y = jax.lax.conv_general_dilated(
        x.astype(jnp.bfloat16), weight.astype(jnp.bfloat16),
        window_strides=stride, padding="VALID",
        dimension_numbers=("NCDHW", "OIDHW", "NCDHW"),
        preferred_element_type=jnp.float32)
    y = y + bias.reshape(1, -1, 1, 1, 1)
    mean = y.mean(axis=(2, 3, 4), keepdims=True)
    var = ((y - mean) ** 2).mean(axis=(2, 3, 4), keepdims=True)
    y = (y - mean) / jnp.sqrt(var + eps)
    y = y * gamma.reshape(1, -1, 1, 1, 1) + beta.reshape(1, -1, 1, 1, 1)
    return 0.5 * y * (1.0 + jax.lax.erf(y * _INV_SQRT2))


if __name__ == "__main__":
    # Synthetic config for layer_id=0: in_channels=3, out_channels=16,
    # kernel=(2,2,2), stride=(2,2,2), conv_bias=True, activation="gelu".
    # Spatial sizes chosen so P = Do*Ho*Wo = 256 and Ho*Wo = 128 (lane-dense).
    N, C_in, D, H, W = 2, 3, 4, 16, 32
    C_out = 16
    kernel_size = (2, 2, 2)
    stride = (2, 2, 2)

    key = jax.random.PRNGKey(0)
    kx, kw_, kb, kg, kbt = jax.random.split(key, 5)

    x = jax.random.normal(kx, (N, C_in, D, H, W), dtype=jnp.float32)
    weight = 0.1 * jax.random.normal(kw_, (C_out, C_in) + kernel_size,
                                     dtype=jnp.float32)
    bias = 0.1 * jax.random.normal(kb, (C_out,), dtype=jnp.float32)
    gamma = 1.0 + 0.05 * jax.random.normal(kg, (C_out,), dtype=jnp.float32)
    beta = 0.05 * jax.random.normal(kbt, (C_out,), dtype=jnp.float32)

    out = sign2vec_groupnorm_conv_layer(x, weight, bias, gamma, beta,
                                        stride=stride)
    out = jax.block_until_ready(out)

    ref = jax.block_until_ready(
        _reference(x, weight, bias, gamma, beta, stride=stride))

    # Output is bf16 (per perf review) -> tolerance set to ~2 bf16 ulps.
    np.testing.assert_allclose(
        np.asarray(out.astype(jnp.float32)), np.asarray(ref),
        rtol=1e-2, atol=1e-2)

    print("KERNEL_OK")
</pallas_src>

<mosaic_0001>
module attributes {stable_mosaic.version = 11 : i64} {
  func.func @_gn_conv_kernel(%arg0: i32, %arg1: memref<1x3x4x512xf32, #tpu.memory_space<vmem>>, %arg2: memref<8x16x3xbf16, #tpu.memory_space<vmem>>, %arg3: memref<4x512x128xbf16, #tpu.memory_space<vmem>>, %arg4: memref<16x2xf32, #tpu.memory_space<vmem>>, %arg5: memref<1x16x256xbf16, #tpu.memory_space<vmem>>) attributes {dimension_semantics = [#tpu.dimension_semantics<parallel>], iteration_bounds = array<i64: 2>, scalar_prefetch = 0 : i64, scratch_operands = 0 : i64, tpu.core_type = #tpu.core_type<tc>, window_params = [{transform_indices = @transform_0, window_bounds = array<i64: 1, 3, 4, 512>}, {pipeline_mode = #tpu.pipeline_mode<synchronous>, transform_indices = @transform_1, window_bounds = array<i64: 8, 16, 3>}, {pipeline_mode = #tpu.pipeline_mode<synchronous>, transform_indices = @transform_2, window_bounds = array<i64: 4, 512, 128>}, {pipeline_mode = #tpu.pipeline_mode<synchronous>, transform_indices = @transform_3, window_bounds = array<i64: 16, 2>}, {transform_indices = @transform_4, window_bounds = array<i64: 1, 16, 256>}]} {
    %cst = arith.constant 0.000000e+00 : f32
    %0 = vector.broadcast %cst : f32 to vector<16x128xf32>
    %c0 = arith.constant 0 : index
    %c0_0 = arith.constant 0 : index
    %c0_1 = arith.constant 0 : index
    %c0_2 = arith.constant 0 : index
    %1 = vector.load %arg1[%c0, %c0_0, %c0_1, %c0_2] : memref<1x3x4x512xf32, #tpu.memory_space<vmem>>, vector<1x3x1x512xf32>
    %2 = vector.shape_cast %1 : vector<1x3x1x512xf32> to vector<3x512xf32>
    %3 = arith.truncf %2 : vector<3x512xf32> to vector<3x512xbf16>
    %c0_3 = arith.constant 0 : index
    %c0_4 = arith.constant 0 : index
    %c0_5 = arith.constant 0 : index
    %4 = vector.load %arg3[%c0_3, %c0_4, %c0_5] : memref<4x512x128xbf16, #tpu.memory_space<vmem>>, vector<1x512x128xbf16>
    %5 = vector.shape_cast %4 : vector<1x512x128xbf16> to vector<512x128xbf16>
    %cst_6 = arith.constant dense<0.000000e+00> : vector<3x128xf32>
    %6 = tpu.matmul %3, %5, %cst_6 {dimension_numbers = #tpu.dot_dimension_numbers<[1], [0], [0], [1], [0, 0, 1, 1], [], []>} : vector<3x512xbf16>, vector<512x128xbf16>, vector<3x128xf32> -> vector<3x128xf32>
    %7 = arith.truncf %6 : vector<3x128xf32> to vector<3x128xbf16>
    %c0_7 = arith.constant 0 : index
    %c0_8 = arith.constant 0 : index
    %c0_9 = arith.constant 0 : index
    %8 = vector.load %arg2[%c0_7, %c0_8, %c0_9] : memref<8x16x3xbf16, #tpu.memory_space<vmem>>, vector<1x16x3xbf16>
    %9 = vector.shape_cast %8 : vector<1x16x3xbf16> to vector<16x3xbf16>
    %cst_10 = arith.constant dense<0.000000e+00> : vector<16x128xf32>
    %10 = tpu.matmul %9, %7, %cst_10 {dimension_numbers = #tpu.dot_dimension_numbers<[1], [0], [0], [1], [0, 0, 1, 1], [], []>} : vector<16x3xbf16>, vector<3x128xbf16>, vector<16x128xf32> -> vector<16x128xf32>
    %11 = arith.addf %0, %10 : vector<16x128xf32>
    %c1 = arith.constant 1 : index
    %c0_11 = arith.constant 0 : index
    %c0_12 = arith.constant 0 : index
    %12 = vector.load %arg3[%c1, %c0_11, %c0_12] : memref<4x512x128xbf16, #tpu.memory_space<vmem>>, vector<1x512x128xbf16>
    %13 = vector.shape_cast %12 : vector<1x512x128xbf16> to vector<512x128xbf16>
    %cst_13 = arith.constant dense<0.000000e+00> : vector<3x128xf32>
    %14 = tpu.matmul %3, %13, %cst_13 {dimension_numbers = #tpu.dot_dimension_numbers<[1], [0], [0], [1], [0, 0, 1, 1], [], []>} : vector<3x512xbf16>, vector<512x128xbf16>, vector<3x128xf32> -> vector<3x128xf32>
    %15 = arith.truncf %14 : vector<3x128xf32> to vector<3x128xbf16>
    %c1_14 = arith.constant 1 : index
    %c0_15 = arith.constant 0 : index
    %c0_16 = arith.constant 0 : index
    %16 = vector.load %arg2[%c1_14, %c0_15, %c0_16] : memref<8x16x3xbf16, #tpu.memory_space<vmem>>, vector<1x16x3xbf16>
    %17 = vector.shape_cast %16 : vector<1x16x3xbf16> to vector<16x3xbf16>
    %cst_17 = arith.constant dense<0.000000e+00> : vector<16x128xf32>
    %18 = tpu.matmul %17, %15, %cst_17 {dimension_numbers = #tpu.dot_dimension_numbers<[1], [0], [0], [1], [0, 0, 1, 1], [], []>} : vector<16x3xbf16>, vector<3x128xbf16>, vector<16x128xf32> -> vector<16x128xf32>
    %19 = arith.addf %11, %18 : vector<16x128xf32>
    %c2 = arith.constant 2 : index
    %c0_18 = arith.constant 0 : index
    %c0_19 = arith.constant 0 : index
    %20 = vector.load %arg3[%c2, %c0_18, %c0_19] : memref<4x512x128xbf16, #tpu.memory_space<vmem>>, vector<1x512x128xbf16>
    %21 = vector.shape_cast %20 : vector<1x512x128xbf16> to vector<512x128xbf16>
    %cst_20 = arith.constant dense<0.000000e+00> : vector<3x128xf32>
    %22 = tpu.matmul %3, %21, %cst_20 {dimension_numbers = #tpu.dot_dimension_numbers<[1], [0], [0], [1], [0, 0, 1, 1], [], []>} : vector<3x512xbf16>, vector<512x128xbf16>, vector<3x128xf32> -> vector<3x128xf32>
    %23 = arith.truncf %22 : vector<3x128xf32> to vector<3x128xbf16>
    %c2_21 = arith.constant 2 : index
    %c0_22 = arith.constant 0 : index
    %c0_23 = arith.constant 0 : index
    %24 = vector.load %arg2[%c2_21, %c0_22, %c0_23] : memref<8x16x3xbf16, #tpu.memory_space<vmem>>, vector<1x16x3xbf16>
    %25 = vector.shape_cast %24 : vector<1x16x3xbf16> to vector<16x3xbf16>
    %cst_24 = arith.constant dense<0.000000e+00> : vector<16x128xf32>
    %26 = tpu.matmul %25, %23, %cst_24 {dimension_numbers = #tpu.dot_dimension_numbers<[1], [0], [0], [1], [0, 0, 1, 1], [], []>} : vector<16x3xbf16>, vector<3x128xbf16>, vector<16x128xf32> -> vector<16x128xf32>
    %27 = arith.addf %19, %26 : vector<16x128xf32>
    %c3 = arith.constant 3 : index
    %c0_25 = arith.constant 0 : index
    %c0_26 = arith.constant 0 : index
    %28 = vector.load %arg3[%c3, %c0_25, %c0_26] : memref<4x512x128xbf16, #tpu.memory_space<vmem>>, vector<1x512x128xbf16>
    %29 = vector.shape_cast %28 : vector<1x512x128xbf16> to vector<512x128xbf16>
    %cst_27 = arith.constant dense<0.000000e+00> : vector<3x128xf32>
    %30 = tpu.matmul %3, %29, %cst_27 {dimension_numbers = #tpu.dot_dimension_numbers<[1], [0], [0], [1], [0, 0, 1, 1], [], []>} : vector<3x512xbf16>, vector<512x128xbf16>, vector<3x128xf32> -> vector<3x128xf32>
    %31 = arith.truncf %30 : vector<3x128xf32> to vector<3x128xbf16>
    %c3_28 = arith.constant 3 : index
    %c0_29 = arith.constant 0 : index
    %c0_30 = arith.constant 0 : index
    %32 = vector.load %arg2[%c3_28, %c0_29, %c0_30] : memref<8x16x3xbf16, #tpu.memory_space<vmem>>, vector<1x16x3xbf16>
    %33 = vector.shape_cast %32 : vector<1x16x3xbf16> to vector<16x3xbf16>
    %cst_31 = arith.constant dense<0.000000e+00> : vector<16x128xf32>
    %34 = tpu.matmul %33, %31, %cst_31 {dimension_numbers = #tpu.dot_dimension_numbers<[1], [0], [0], [1], [0, 0, 1, 1], [], []>} : vector<16x3xbf16>, vector<3x128xbf16>, vector<16x128xf32> -> vector<16x128xf32>
    %35 = arith.addf %27, %34 : vector<16x128xf32>
    %c0_32 = arith.constant 0 : index
    %c0_33 = arith.constant 0 : index
    %c1_34 = arith.constant 1 : index
    %c0_35 = arith.constant 0 : index
    %36 = vector.load %arg1[%c0_32, %c0_33, %c1_34, %c0_35] : memref<1x3x4x512xf32, #tpu.memory_space<vmem>>, vector<1x3x1x512xf32>
    %37 = vector.shape_cast %36 : vector<1x3x1x512xf32> to vector<3x512xf32>
    %38 = arith.truncf %37 : vector<3x512xf32> to vector<3x512xbf16>
    %c0_36 = arith.constant 0 : index
    %c0_37 = arith.constant 0 : index
    %c0_38 = arith.constant 0 : index
    %39 = vector.load %arg3[%c0_36, %c0_37, %c0_38] : memref<4x512x128xbf16, #tpu.memory_space<vmem>>, vector<1x512x128xbf16>
    %40 = vector.shape_cast %39 : vector<1x512x128xbf16> to vector<512x128xbf16>
    %cst_39 = arith.constant dense<0.000000e+00> : vector<3x128xf32>
    %41 = tpu.matmul %38, %40, %cst_39 {dimension_numbers = #tpu.dot_dimension_numbers<[1], [0], [0], [1], [0, 0, 1, 1], [], []>} : vector<3x512xbf16>, vector<512x128xbf16>, vector<3x128xf32> -> vector<3x128xf32>
    %42 = arith.truncf %41 : vector<3x128xf32> to vector<3x128xbf16>
    %c4 = arith.constant 4 : index
    %c0_40 = arith.constant 0 : index
    %c0_41 = arith.constant 0 : index
    %43 = vector.load %arg2[%c4, %c0_40, %c0_41] : memref<8x16x3xbf16, #tpu.memory_space<vmem>>, vector<1x16x3xbf16>
    %44 = vector.shape_cast %43 : vector<1x16x3xbf16> to vector<16x3xbf16>
    %cst_42 = arith.constant dense<0.000000e+00> : vector<16x128xf32>
    %45 = tpu.matmul %44, %42, %cst_42 {dimension_numbers = #tpu.dot_dimension_numbers<[1], [0], [0], [1], [0, 0, 1, 1], [], []>} : vector<16x3xbf16>, vector<3x128xbf16>, vector<16x128xf32> -> vector<16x128xf32>
    %46 = arith.addf %35, %45 : vector<16x128xf32>
    %c1_43 = arith.constant 1 : index
    %c0_44 = arith.constant 0 : index
    %c0_45 = arith.constant 0 : index
    %47 = vector.load %arg3[%c1_43, %c0_44, %c0_45] : memref<4x512x128xbf16, #tpu.memory_space<vmem>>, vector<1x512x128xbf16>
    %48 = vector.shape_cast %47 : vector<1x512x128xbf16> to vector<512x128xbf16>
    %cst_46 = arith.constant dense<0.000000e+00> : vector<3x128xf32>
    %49 = tpu.matmul %38, %48, %cst_46 {dimension_numbers = #tpu.dot_dimension_numbers<[1], [0], [0], [1], [0, 0, 1, 1], [], []>} : vector<3x512xbf16>, vector<512x128xbf16>, vector<3x128xf32> -> vector<3x128xf32>
    %50 = arith.truncf %49 : vector<3x128xf32> to vector<3x128xbf16>
    %c5 = arith.constant 5 : index
    %c0_47 = arith.constant 0 : index
    %c0_48 = arith.constant 0 : index
    %51 = vector.load %arg2[%c5, %c0_47, %c0_48] : memref<8x16x3xbf16, #tpu.memory_space<vmem>>, vector<1x16x3xbf16>
    %52 = vector.shape_cast %51 : vector<1x16x3xbf16> to vector<16x3xbf16>
    %cst_49 = arith.constant dense<0.000000e+00> : vector<16x128xf32>
    %53 = tpu.matmul %52, %50, %cst_49 {dimension_numbers = #tpu.dot_dimension_numbers<[1], [0], [0], [1], [0, 0, 1, 1], [], []>} : vector<16x3xbf16>, vector<3x128xbf16>, vector<16x128xf32> -> vector<16x128xf32>
    %54 = arith.addf %46, %53 : vector<16x128xf32>
    %c2_50 = arith.constant 2 : index
    %c0_51 = arith.constant 0 : index
    %c0_52 = arith.constant 0 : index
    %55 = vector.load %arg3[%c2_50, %c0_51, %c0_52] : memref<4x512x128xbf16, #tpu.memory_space<vmem>>, vector<1x512x128xbf16>
    %56 = vector.shape_cast %55 : vector<1x512x128xbf16> to vector<512x128xbf16>
    %cst_53 = arith.constant dense<0.000000e+00> : vector<3x128xf32>
    %57 = tpu.matmul %38, %56, %cst_53 {dimension_numbers = #tpu.dot_dimension_numbers<[1], [0], [0], [1], [0, 0, 1, 1], [], []>} : vector<3x512xbf16>, vector<512x128xbf16>, vector<3x128xf32> -> vector<3x128xf32>
    %58 = arith.truncf %57 : vector<3x128xf32> to vector<3x128xbf16>
    %c6 = arith.constant 6 : index
    %c0_54 = arith.constant 0 : index
    %c0_55 = arith.constant 0 : index
    %59 = vector.load %arg2[%c6, %c0_54, %c0_55] : memref<8x16x3xbf16, #tpu.memory_space<vmem>>, vector<1x16x3xbf16>
    %60 = vector.shape_cast %59 : vector<1x16x3xbf16> to vector<16x3xbf16>
    %cst_56 = arith.constant dense<0.000000e+00> : vector<16x128xf32>
    %61 = tpu.matmul %60, %58, %cst_56 {dimension_numbers = #tpu.dot_dimension_numbers<[1], [0], [0], [1], [0, 0, 1, 1], [], []>} : vector<16x3xbf16>, vector<3x128xbf16>, vector<16x128xf32> -> vector<16x128xf32>
    %62 = arith.addf %54, %61 : vector<16x128xf32>
    %c3_57 = arith.constant 3 : index
    %c0_58 = arith.constant 0 : index
    %c0_59 = arith.constant 0 : index
    %63 = vector.load %arg3[%c3_57, %c0_58, %c0_59] : memref<4x512x128xbf16, #tpu.memory_space<vmem>>, vector<1x512x128xbf16>
    %64 = vector.shape_cast %63 : vector<1x512x128xbf16> to vector<512x128xbf16>
    %cst_60 = arith.constant dense<0.000000e+00> : vector<3x128xf32>
    %65 = tpu.matmul %38, %64, %cst_60 {dimension_numbers = #tpu.dot_dimension_numbers<[1], [0], [0], [1], [0, 0, 1, 1], [], []>} : vector<3x512xbf16>, vector<512x128xbf16>, vector<3x128xf32> -> vector<3x128xf32>
    %66 = arith.truncf %65 : vector<3x128xf32> to vector<3x128xbf16>
    %c7 = arith.constant 7 : index
    %c0_61 = arith.constant 0 : index
    %c0_62 = arith.constant 0 : index
    %67 = vector.load %arg2[%c7, %c0_61, %c0_62] : memref<8x16x3xbf16, #tpu.memory_space<vmem>>, vector<1x16x3xbf16>
    %68 = vector.shape_cast %67 : vector<1x16x3xbf16> to vector<16x3xbf16>
    %cst_63 = arith.constant dense<0.000000e+00> : vector<16x128xf32>
    %69 = tpu.matmul %68, %66, %cst_63 {dimension_numbers = #tpu.dot_dimension_numbers<[1], [0], [0], [1], [0, 0, 1, 1], [], []>} : vector<16x3xbf16>, vector<3x128xbf16>, vector<16x128xf32> -> vector<16x128xf32>
    %70 = arith.addf %62, %69 : vector<16x128xf32>
    %cst_64 = arith.constant 0.000000e+00 : f32
    %71 = vector.broadcast %cst_64 : f32 to vector<16x128xf32>
    %c0_65 = arith.constant 0 : index
    %c0_66 = arith.constant 0 : index
    %c2_67 = arith.constant 2 : index
    %c0_68 = arith.constant 0 : index
    %72 = vector.load %arg1[%c0_65, %c0_66, %c2_67, %c0_68] : memref<1x3x4x512xf32, #tpu.memory_space<vmem>>, vector<1x3x1x512xf32>
    %73 = vector.shape_cast %72 : vector<1x3x1x512xf32> to vector<3x512xf32>
    %74 = arith.truncf %73 : vector<3x512xf32> to vector<3x512xbf16>
    %c0_69 = arith.constant 0 : index
    %c0_70 = arith.constant 0 : index
    %c0_71 = arith.constant 0 : index
    %75 = vector.load %arg3[%c0_69, %c0_70, %c0_71] : memref<4x512x128xbf16, #tpu.memory_space<vmem>>, vector<1x512x128xbf16>
    %76 = vector.shape_cast %75 : vector<1x512x128xbf16> to vector<512x128xbf16>
    %cst_72 = arith.constant dense<0.000000e+00> : vector<3x128xf32>
    %77 = tpu.matmul %74, %76, %cst_72 {dimension_numbers = #tpu.dot_dimension_numbers<[1], [0], [0], [1], [0, 0, 1, 1], [], []>} : vector<3x512xbf16>, vector<512x128xbf16>, vector<3x128xf32> -> vector<3x128xf32>
    %78 = arith.truncf %77 : vector<3x128xf32> to vector<3x128xbf16>
    %c0_73 = arith.constant 0 : index
    %c0_74 = arith.constant 0 : index
    %c0_75 = arith.constant 0 : index
    %79 = vector.load %arg2[%c0_73, %c0_74, %c0_75] : memref<8x16x3xbf16, #tpu.memory_space<vmem>>, vector<1x16x3xbf16>
    %80 = vector.shape_cast %79 : vector<1x16x3xbf16> to vector<16x3xbf16>
    %cst_76 = arith.constant dense<0.000000e+00> : vector<16x128xf32>
    %81 = tpu.matmul %80, %78, %cst_76 {dimension_numbers = #tpu.dot_dimension_numbers<[1], [0], [0], [1], [0, 0, 1, 1], [], []>} : vector<16x3xbf16>, vector<3x128xbf16>, vector<16x128xf32> -> vector<16x128xf32>
    %82 = arith.addf %71, %81 : vector<16x128xf32>
    %c1_77 = arith.constant 1 : index
    %c0_78 = arith.constant 0 : index
    %c0_79 = arith.constant 0 : index
    %83 = vector.load %arg3[%c1_77, %c0_78, %c0_79] : memref<4x512x128xbf16, #tpu.memory_space<vmem>>, vector<1x512x128xbf16>
    %84 = vector.shape_cast %83 : vector<1x512x128xbf16> to vector<512x128xbf16>
    %cst_80 = arith.constant dense<0.000000e+00> : vector<3x128xf32>
    %85 = tpu.matmul %74, %84, %cst_80 {dimension_numbers = #tpu.dot_dimension_numbers<[1], [0], [0], [1], [0, 0, 1, 1], [], []>} : vector<3x512xbf16>, vector<512x128xbf16>, vector<3x128xf32> -> vector<3x128xf32>
    %86 = arith.truncf %85 : vector<3x128xf32> to vector<3x128xbf16>
    %c1_81 = arith.constant 1 : index
    %c0_82 = arith.constant 0 : index
    %c0_83 = arith.constant 0 : index
    %87 = vector.load %arg2[%c1_81, %c0_82, %c0_83] : memref<8x16x3xbf16, #tpu.memory_space<vmem>>, vector<1x16x3xbf16>
    %88 = vector.shape_cast %87 : vector<1x16x3xbf16> to vector<16x3xbf16>
    %cst_84 = arith.constant dense<0.000000e+00> : vector<16x128xf32>
    %89 = tpu.matmul %88, %86, %cst_84 {dimension_numbers = #tpu.dot_dimension_numbers<[1], [0], [0], [1], [0, 0, 1, 1], [], []>} : vector<16x3xbf16>, vector<3x128xbf16>, vector<16x128xf32> -> vector<16x128xf32>
    %90 = arith.addf %82, %89 : vector<16x128xf32>
    %c2_85 = arith.constant 2 : index
    %c0_86 = arith.constant 0 : index
    %c0_87 = arith.constant 0 : index
    %91 = vector.load %arg3[%c2_85, %c0_86, %c0_87] : memref<4x512x128xbf16, #tpu.memory_space<vmem>>, vector<1x512x128xbf16>
    %92 = vector.shape_cast %91 : vector<1x512x128xbf16> to vector<512x128xbf16>
    %cst_88 = arith.constant dense<0.000000e+00> : vector<3x128xf32>
    %93 = tpu.matmul %74, %92, %cst_88 {dimension_numbers = #tpu.dot_dimension_numbers<[1], [0], [0], [1], [0, 0, 1, 1], [], []>} : vector<3x512xbf16>, vector<512x128xbf16>, vector<3x128xf32> -> vector<3x128xf32>
    %94 = arith.truncf %93 : vector<3x128xf32> to vector<3x128xbf16>
    %c2_89 = arith.constant 2 : index
    %c0_90 = arith.constant 0 : index
    %c0_91 = arith.constant 0 : index
    %95 = vector.load %arg2[%c2_89, %c0_90, %c0_91] : memref<8x16x3xbf16, #tpu.memory_space<vmem>>, vector<1x16x3xbf16>
    %96 = vector.shape_cast %95 : vector<1x16x3xbf16> to vector<16x3xbf16>
    %cst_92 = arith.constant dense<0.000000e+00> : vector<16x128xf32>
    %97 = tpu.matmul %96, %94, %cst_92 {dimension_numbers = #tpu.dot_dimension_numbers<[1], [0], [0], [1], [0, 0, 1, 1], [], []>} : vector<16x3xbf16>, vector<3x128xbf16>, vector<16x128xf32> -> vector<16x128xf32>
    %98 = arith.addf %90, %97 : vector<16x128xf32>
    %c3_93 = arith.constant 3 : index
    %c0_94 = arith.constant 0 : index
    %c0_95 = arith.constant 0 : index
    %99 = vector.load %arg3[%c3_93, %c0_94, %c0_95] : memref<4x512x128xbf16, #tpu.memory_space<vmem>>, vector<1x512x128xbf16>
    %100 = vector.shape_cast %99 : vector<1x512x128xbf16> to vector<512x128xbf16>
    %cst_96 = arith.constant dense<0.000000e+00> : vector<3x128xf32>
    %101 = tpu.matmul %74, %100, %cst_96 {dimension_numbers = #tpu.dot_dimension_numbers<[1], [0], [0], [1], [0, 0, 1, 1], [], []>} : vector<3x512xbf16>, vector<512x128xbf16>, vector<3x128xf32> -> vector<3x128xf32>
    %102 = arith.truncf %101 : vector<3x128xf32> to vector<3x128xbf16>
    %c3_97 = arith.constant 3 : index
    %c0_98 = arith.constant 0 : index
    %c0_99 = arith.constant 0 : index
    %103 = vector.load %arg2[%c3_97, %c0_98, %c0_99] : memref<8x16x3xbf16, #tpu.memory_space<vmem>>, vector<1x16x3xbf16>
    %104 = vector.shape_cast %103 : vector<1x16x3xbf16> to vector<16x3xbf16>
    %cst_100 = arith.constant dense<0.000000e+00> : vector<16x128xf32>
    %105 = tpu.matmul %104, %102, %cst_100 {dimension_numbers = #tpu.dot_dimension_numbers<[1], [0], [0], [1], [0, 0, 1, 1], [], []>} : vector<16x3xbf16>, vector<3x128xbf16>, vector<16x128xf32> -> vector<16x128xf32>
    %106 = arith.addf %98, %105 : vector<16x128xf32>
    %c0_101 = arith.constant 0 : index
    %c0_102 = arith.constant 0 : index
    %c3_103 = arith.constant 3 : index
    %c0_104 = arith.constant 0 : index
    %107 = vector.load %arg1[%c0_101, %c0_102, %c3_103, %c0_104] : memref<1x3x4x512xf32, #tpu.memory_space<vmem>>, vector<1x3x1x512xf32>
    %108 = vector.shape_cast %107 : vector<1x3x1x512xf32> to vector<3x512xf32>
    %109 = arith.truncf %108 : vector<3x512xf32> to vector<3x512xbf16>
    %c0_105 = arith.constant 0 : index
    %c0_106 = arith.constant 0 : index
    %c0_107 = arith.constant 0 : index
    %110 = vector.load %arg3[%c0_105, %c0_106, %c0_107] : memref<4x512x128xbf16, #tpu.memory_space<vmem>>, vector<1x512x128xbf16>
    %111 = vector.shape_cast %110 : vector<1x512x128xbf16> to vector<512x128xbf16>
    %cst_108 = arith.constant dense<0.000000e+00> : vector<3x128xf32>
    %112 = tpu.matmul %109, %111, %cst_108 {dimension_numbers = #tpu.dot_dimension_numbers<[1], [0], [0], [1], [0, 0, 1, 1], [], []>} : vector<3x512xbf16>, vector<512x128xbf16>, vector<3x128xf32> -> vector<3x128xf32>
    %113 = arith.truncf %112 : vector<3x128xf32> to vector<3x128xbf16>
    %c4_109 = arith.constant 4 : index
    %c0_110 = arith.constant 0 : index
    %c0_111 = arith.constant 0 : index
    %114 = vector.load %arg2[%c4_109, %c0_110, %c0_111] : memref<8x16x3xbf16, #tpu.memory_space<vmem>>, vector<1x16x3xbf16>
    %115 = vector.shape_cast %114 : vector<1x16x3xbf16> to vector<16x3xbf16>
    %cst_112 = arith.constant dense<0.000000e+00> : vector<16x128xf32>
    %116 = tpu.matmul %115, %113, %cst_112 {dimension_numbers = #tpu.dot_dimension_numbers<[1], [0], [0], [1], [0, 0, 1, 1], [], []>} : vector<16x3xbf16>, vector<3x128xbf16>, vector<16x128xf32> -> vector<16x128xf32>
    %117 = arith.addf %106, %116 : vector<16x128xf32>
    %c1_113 = arith.constant 1 : index
    %c0_114 = arith.constant 0 : index
    %c0_115 = arith.constant 0 : index
    %118 = vector.load %arg3[%c1_113, %c0_114, %c0_115] : memref<4x512x128xbf16, #tpu.memory_space<vmem>>, vector<1x512x128xbf16>
    %119 = vector.shape_cast %118 : vector<1x512x128xbf16> to vector<512x128xbf16>
    %cst_116 = arith.constant dense<0.000000e+00> : vector<3x128xf32>
    %120 = tpu.matmul %109, %119, %cst_116 {dimension_numbers = #tpu.dot_dimension_numbers<[1], [0], [0], [1], [0, 0, 1, 1], [], []>} : vector<3x512xbf16>, vector<512x128xbf16>, vector<3x128xf32> -> vector<3x128xf32>
    %121 = arith.truncf %120 : vector<3x128xf32> to vector<3x128xbf16>
    %c5_117 = arith.constant 5 : index
    %c0_118 = arith.constant 0 : index
    %c0_119 = arith.constant 0 : index
    %122 = vector.load %arg2[%c5_117, %c0_118, %c0_119] : memref<8x16x3xbf16, #tpu.memory_space<vmem>>, vector<1x16x3xbf16>
    %123 = vector.shape_cast %122 : vector<1x16x3xbf16> to vector<16x3xbf16>
    %cst_120 = arith.constant dense<0.000000e+00> : vector<16x128xf32>
    %124 = tpu.matmul %123, %121, %cst_120 {dimension_numbers = #tpu.dot_dimension_numbers<[1], [0], [0], [1], [0, 0, 1, 1], [], []>} : vector<16x3xbf16>, vector<3x128xbf16>, vector<16x128xf32> -> vector<16x128xf32>
    %125 = arith.addf %117, %124 : vector<16x128xf32>
    %c2_121 = arith.constant 2 : index
    %c0_122 = arith.constant 0 : index
    %c0_123 = arith.constant 0 : index
    %126 = vector.load %arg3[%c2_121, %c0_122, %c0_123] : memref<4x512x128xbf16, #tpu.memory_space<vmem>>, vector<1x512x128xbf16>
    %127 = vector.shape_cast %126 : vector<1x512x128xbf16> to vector<512x128xbf16>
    %cst_124 = arith.constant dense<0.000000e+00> : vector<3x128xf32>
    %128 = tpu.matmul %109, %127, %cst_124 {dimension_numbers = #tpu.dot_dimension_numbers<[1], [0], [0], [1], [0, 0, 1, 1], [], []>} : vector<3x512xbf16>, vector<512x128xbf16>, vector<3x128xf32> -> vector<3x128xf32>
    %129 = arith.truncf %128 : vector<3x128xf32> to vector<3x128xbf16>
    %c6_125 = arith.constant 6 : index
    %c0_126 = arith.constant 0 : index
    %c0_127 = arith.constant 0 : index
    %130 = vector.load %arg2[%c6_125, %c0_126, %c0_127] : memref<8x16x3xbf16, #tpu.memory_space<vmem>>, vector<1x16x3xbf16>
    %131 = vector.shape_cast %130 : vector<1x16x3xbf16> to vector<16x3xbf16>
    %cst_128 = arith.constant dense<0.000000e+00> : vector<16x128xf32>
    %132 = tpu.matmul %131, %129, %cst_128 {dimension_numbers = #tpu.dot_dimension_numbers<[1], [0], [0], [1], [0, 0, 1, 1], [], []>} : vector<16x3xbf16>, vector<3x128xbf16>, vector<16x128xf32> -> vector<16x128xf32>
    %133 = arith.addf %125, %132 : vector<16x128xf32>
    %c3_129 = arith.constant 3 : index
    %c0_130 = arith.constant 0 : index
    %c0_131 = arith.constant 0 : index
    %134 = vector.load %arg3[%c3_129, %c0_130, %c0_131] : memref<4x512x128xbf16, #tpu.memory_space<vmem>>, vector<1x512x128xbf16>
    %135 = vector.shape_cast %134 : vector<1x512x128xbf16> to vector<512x128xbf16>
    %cst_132 = arith.constant dense<0.000000e+00> : vector<3x128xf32>
    %136 = tpu.matmul %109, %135, %cst_132 {dimension_numbers = #tpu.dot_dimension_numbers<[1], [0], [0], [1], [0, 0, 1, 1], [], []>} : vector<3x512xbf16>, vector<512x128xbf16>, vector<3x128xf32> -> vector<3x128xf32>
    %137 = arith.truncf %136 : vector<3x128xf32> to vector<3x128xbf16>
    %c7_133 = arith.constant 7 : index
    %c0_134 = arith.constant 0 : index
    %c0_135 = arith.constant 0 : index
    %138 = vector.load %arg2[%c7_133, %c0_134, %c0_135] : memref<8x16x3xbf16, #tpu.memory_space<vmem>>, vector<1x16x3xbf16>
    %139 = vector.shape_cast %138 : vector<1x16x3xbf16> to vector<16x3xbf16>
    %cst_136 = arith.constant dense<0.000000e+00> : vector<16x128xf32>
    %140 = tpu.matmul %139, %137, %cst_136 {dimension_numbers = #tpu.dot_dimension_numbers<[1], [0], [0], [1], [0, 0, 1, 1], [], []>} : vector<16x3xbf16>, vector<3x128xbf16>, vector<16x128xf32> -> vector<16x128xf32>
    %141 = arith.addf %133, %140 : vector<16x128xf32>
    %142 = tpu.concatenate %70, %141 in 1 : vector<16x128xf32>, vector<16x128xf32> -> vector<16x256xf32>
    %cst_137 = arith.constant dense<0.000000e+00> : vector<16xf32>
    %143 = vector.multi_reduction <add>, %142, %cst_137 [1] : vector<16x256xf32> to vector<16xf32>
    %144 = vector.shape_cast %143 : vector<16xf32> to vector<16x1xf32>
    %cst_138 = arith.constant 3.906250e-03 : f32
    %145 = vector.broadcast %cst_138 : f32 to vector<16x1xf32>
    %146 = arith.mulf %144, %145 : vector<16x1xf32>
    %147 = vector.broadcast %146 : vector<16x1xf32> to vector<16x256xf32>
    %148 = arith.subf %142, %147 : vector<16x256xf32>
    %149 = arith.mulf %148, %148 : vector<16x256xf32>
    %cst_139 = arith.constant dense<0.000000e+00> : vector<16xf32>
    %150 = vector.multi_reduction <add>, %149, %cst_139 [1] : vector<16x256xf32> to vector<16xf32>
    %151 = vector.shape_cast %150 : vector<16xf32> to vector<16x1xf32>
    %cst_140 = arith.constant 3.906250e-03 : f32
    %152 = vector.broadcast %cst_140 : f32 to vector<16x1xf32>
    %153 = arith.mulf %151, %152 : vector<16x1xf32>
    %cst_141 = arith.constant 9.99999974E-6 : f32
    %154 = vector.broadcast %cst_141 : f32 to vector<16x1xf32>
    %155 = arith.addf %153, %154 : vector<16x1xf32>
    %156 = math.rsqrt %155 : vector<16x1xf32>
    %157 = vector.broadcast %156 : vector<16x1xf32> to vector<16x256xf32>
    %158 = arith.mulf %148, %157 : vector<16x256xf32>
    %c0_142 = arith.constant 0 : index
    %c0_143 = arith.constant 0 : index
    %159 = vector.load %arg4[%c0_142, %c0_143] : memref<16x2xf32, #tpu.memory_space<vmem>>, vector<16x2xf32>
    %160 = vector.extract_strided_slice %159 {offsets = [0, 0], sizes = [16, 1], strides = [1, 1]} : vector<16x2xf32> to vector<16x1xf32>
    %161 = vector.broadcast %160 : vector<16x1xf32> to vector<16x256xf32>
    %162 = arith.mulf %158, %161 : vector<16x256xf32>
    %163 = vector.extract_strided_slice %159 {offsets = [0, 1], sizes = [16, 1], strides = [1, 1]} : vector<16x2xf32> to vector<16x1xf32>
    %164 = vector.broadcast %163 : vector<16x1xf32> to vector<16x256xf32>
    %165 = arith.addf %162, %164 : vector<16x256xf32>
    %cst_144 = arith.constant 5.000000e-01 : f32
    %166 = vector.broadcast %cst_144 : f32 to vector<16x256xf32>
    %167 = arith.mulf %166, %165 : vector<16x256xf32>
    %cst_145 = arith.constant 0.707106769 : f32
    %168 = vector.broadcast %cst_145 : f32 to vector<16x256xf32>
    %169 = arith.mulf %165, %168 : vector<16x256xf32>
    %170 = math.erf %169 : vector<16x256xf32>
    %cst_146 = arith.constant 1.000000e+00 : f32
    %171 = vector.broadcast %cst_146 : f32 to vector<16x256xf32>
    %172 = arith.addf %171, %170 : vector<16x256xf32>
    %173 = arith.mulf %167, %172 : vector<16x256xf32>
    %174 = arith.truncf %173 : vector<16x256xf32> to vector<16x256xbf16>
    %c0_147 = arith.constant 0 : index
    %c0_148 = arith.constant 0 : index
    %c0_149 = arith.constant 0 : index
    %175 = vector.load %arg5[%c0_147, %c0_148, %c0_149] : memref<1x16x256xbf16, #tpu.memory_space<vmem>>, vector<1x16x256xbf16>
    %176 = vector.shape_cast %175 : vector<1x16x256xbf16> to vector<16x256xbf16>
    %177 = vector.shape_cast %174 : vector<16x256xbf16> to vector<1x16x256xbf16>
    tpu.vector_store %arg5[%c0_147, %c0_148, %c0_149], %177 {strides = array<i32>} : memref<1x16x256xbf16, #tpu.memory_space<vmem>>, vector<1x16x256xbf16>,
    return
  }
  func.func @transform_0(%arg0: i32) -> (i32, i32, i32, i32) {
    %c0_i32 = arith.constant 0 : i32
    %c0_i32_0 = arith.constant 0 : i32
    %c0_i32_1 = arith.constant 0 : i32
    %c0_i32_2 = arith.constant 0 : i32
    return %arg0, %c0_i32, %c0_i32_0, %c0_i32_1 : i32, i32, i32, i32
  }
  func.func @transform_1(%arg0: i32) -> (i32, i32, i32) {
    %c0_i32 = arith.constant 0 : i32
    %c0_i32_0 = arith.constant 0 : i32
    %c0_i32_1 = arith.constant 0 : i32
    %c0_i32_2 = arith.constant 0 : i32
    return %c0_i32, %c0_i32_0, %c0_i32_1 : i32, i32, i32
  }
  func.func @transform_2(%arg0: i32) -> (i32, i32, i32) {
    %c0_i32 = arith.constant 0 : i32
    %c0_i32_0 = arith.constant 0 : i32
    %c0_i32_1 = arith.constant 0 : i32
    %c0_i32_2 = arith.constant 0 : i32
    return %c0_i32, %c0_i32_0, %c0_i32_1 : i32, i32, i32
  }
  func.func @transform_3(%arg0: i32) -> (i32, i32) {
    %c0_i32 = arith.constant 0 : i32
    %c0_i32_0 = arith.constant 0 : i32
    %c0_i32_1 = arith.constant 0 : i32
    return %c0_i32, %c0_i32_0 : i32, i32
  }
  func.func @transform_4(%arg0: i32) -> (i32, i32, i32) {
    %c0_i32 = arith.constant 0 : i32
    %c0_i32_0 = arith.constant 0 : i32
    %c0_i32_1 = arith.constant 0 : i32
    return %arg0, %c0_i32, %c0_i32_0 : i32, i32, i32
  }
}

</mosaic_0001>

<bundles_post_ra>
// kernel: tpu_custom_call.1
= control target key start
LH: loop header
LB: loop body
LE: loop exit
PB: predicated region body
PF: predicated region fallthrough
CT: control target
= control target key end

     0   :  { %9 = vsyncpa [#allocation3], 0  ;;  %s7115_s0 = inlined_call_operand.hbm [shape: f32[2,3,4,512], index: 0, kind: input, shape index: {}]   ;;  %s7116_s1 = inlined_call_operand.vmem [shape: bf16[8,16,3], index: 1, kind: input, shape index: {}]   ;;  %s7117_s2 = inlined_call_operand.hbm [shape: bf16[4,512,128], index: 2, kind: input, shape index: {}]   ;;  %s7118_s3 = inlined_call_operand.vmem [shape: f32[16,2], index: 3, kind: input, shape index: {}]   ;;  %s7119_s4 = inlined_call_operand.hbm [shape: bf16[2,16,256], index: 4, kind: output, shape index: {}]  }
   0x1   :  { %11 = vsyncpa [#allocation3 + $0x1], 0 }
   0x2   :  { %12 = vsyncpa [#allocation6], 0 }
   0x3   :  { %13 = vsyncpa [#allocation4], 0 }
   0x4   :  { %15 = vsyncpa [#allocation4 + $0x1], 0  ;;  %s5710_s15 = smov 0   ;;  %s5712_s16 = smov 0  }
   0x5   :  { %s5714_s17 = smov 0   ;;  %s5716_s18 = smov 0  }
   0x6 LB: > { %s5731_s19 = sadd.s32 4294967295, %s5669_s18   ;;  %s4083_s20 = sadd.s32 4294967294, %s5669_s18   ;;  %s5669_s18 = sphi %s5716_s18, %s7435_s18   ;;  %s5665_s17 = sphi %s5714_s17, %s7434_s17   ;;  %s5661_s16 = sphi %s5712_s16, %s7433_s16   ;;  %s5657_s15 = sphi %s5710_s15, %s7432_s15  }
   0x7   : > { %p41_p0 = scmp.ne.s32.totalorder %s5661_s16, %s5657_s15  ;;  %p7120_p1 = scmp.eq.s32.totalorder %s5731_s19, 0 }
   0x8   : > { %p134_p3 = scmp.eq.s32.totalorder %s4083_s20, 1  ;;  %p4084_p5 = scmp.ge.s32.totalorder %s5669_s18, 1 }
   0x9   : > { %p5740_p4 = por %p7120_p1, %p41_p0  ;;  %p141_p7 = scmp.lt.s32.totalorder %s5669_s18, 3 }
   0xa   : > { %p5745_p6 = por %p134_p3, %p41_p0  ;;  %s5671_s24 = smov [#allocation5]  }
   0xb   : > { %s7242_s21 = scalar_select %p5740_p4, 1, 0 }
   0xc   : > { %s7243_s22 = scalar_select %p5745_p6, 1, 0 }
   0xd   : > { %p5750_p8 = pnand %p4084_p5, %p141_p7  ;;  %s156_s25 = sshll.u32 %s5671_s24, 4  ;;  %s5754_s25 = int_to_ptr.vmem [resolvable:$true] %s156_s25 }
   0xe   : > { %s5766_s27 = sadd.s32 1, %s5669_s18   ;;  %s28_s28 = sadd.s32 1, %s5665_s17 }
   0xf   : > { %s7244_s23 = scalar_select %p5750_p8, 1, 0 }
  0x10   : > { %p5177_p9 = pneg %p5750_p8  ;;  %s25_s29 = ssub.s32 %s5669_s18, %s5766_s27 }
  0x11   : > { %s5541_s6 = scalar_lea.hbm %s7117_s2, 16384 }
  0x12   : > { %p5761_p11 = pnand %p5177_p9, %p7120_p1  ;;  %p5542_p12 = scmp.ne.s32.totalorder %s7117_s2, %s5541_s6 }
  0x13   : > { %p5548_p5 = scmp.lt.u32.totalorder %s5541_s6, %s7117_s2 }
  0x14   : > { %p5543_p13 = pneg %p5761_p11 }
  0x16   : > { %p5544_p0 = pnand %p5543_p13, %p5542_p12 }
  0x18   : > { %p5545_p3 = pneg %p5544_p0 }
  0x1a   : > { %p5550_p7 = pnand %p5548_p5, %p5545_p3 }
  0x1c   : > { %5553 = shalt.err (!%p5550_p7)
}
  0x1d   : > { %s5554_s11 = scalar_lea.vmem %s5754_s25, 16384  ;;  %p5562_p2 = scmp.lt.s32.totalorder %s5754_s25, %s5754_s25 }
  0x1e   : > { %p5555_p9 = scmp.ne.s32.totalorder %s5754_s25, %s5554_s11  ;;  %p5563_p6 = scmp.lt.s32.totalorder %s5554_s11, %s5554_s11 }
  0x20   : > { %p5557_p10 = pnand %p5555_p9, %p5543_p13  ;;  %p5564_p4 = por %p5563_p6, %p5562_p2 }
  0x22   : > { %p5558_p1 = pneg %p5557_p10 }
  0x24   : > { %p5565_p8 = pnand %p5564_p4, %p5558_p1 }
  0x26   : > { %5568 = shalt.err (!%p5565_p8)
}
  0x27   : > { %s5672_s12 = smov 64   ;;  %s5673_s13 = smov 4  }
  0x28   : > { %5180 = dma.hbm_to_vmem [thread:$0]  (!%p5761_p11), %s7117_s2, 16384, %s5754_s25, [#allocation6], %s5672_s12, %s5672_s12, %s5673_s13  }
  0x29   : > { %p26_p2 = scmp.eq.s32.totalorder %s25_s29, 0  ;;  %p35_p1 = scmp.ne.s32.totalorder %s5665_s17, %s5661_s16 }
  0x2a   : > { %p36_p4 = scmp.eq.s32.totalorder %s5669_s18, 0  ;;  %p5190_p6 = scmp.lt.s32.totalorder %s5669_s18, 2 }
  0x2b   : > { %s5797_s24 = scalar_select %p26_p2, %s5665_s17, %s28_s28  }
  0x2c   : > { %p37_p8 = por %p36_p4, %p35_p1  ;;  %p7246_p10 = scmp.eq.s32.totalorder %s5731_s19, 1 }
  0x2d   : > { %s173_s5 = sand.u32 1, %s5665_s17   ;;  %s5167_s6 = smul.u32 768, %s5669_s18 }
  0x2e   : > { %p5801_p12 = por %p7246_p10, %p35_p1  ;;  %s5166_s7 = smul.u32 48, %s173_s5 }
  0x2f   : > { %s5810_s9 = scalar_lea.hbm %s7115_s0, %s5167_s6  ;;  %p5812_p11 = pnand %p5190_p6, %p37_p8 }
  0x30   : > { %s177_s28 = scalar_lea.vmem [#allocation2], %s5166_s7  ;;  %s5818_s10 = scalar_lea.sflag [#allocation3], %s173_s5 }
  0x31   : > { %s184_s29 = sshll.u32 %s177_s28, 4  ;;  %s5569_s11 = scalar_lea.hbm %s5810_s9, 768  ;;  %s5816_s29 = int_to_ptr.vmem [resolvable:$true] %s184_s29 }
  0x32   : > { %p5570_p13 = scmp.ne.s32.totalorder %s5810_s9, %s5569_s11  ;;  %p5571_p0 = pneg %p5812_p11 }
  0x33   : > { %s5574_s14 = scalar_lea.hbm %s7115_s0, 1536  ;;  %p5575_p7 = scmp.lt.u32.totalorder %s5810_s9, %s7115_s0 }
  0x34   : > { %p5572_p3 = pnand %p5571_p0, %p5570_p13  ;;  %p5576_p9 = scmp.lt.u32.totalorder %s5574_s14, %s5569_s11 }
  0x35   : > { %p5578_p1 = scmp.lt.u32.totalorder %s5569_s11, %s5810_s9 }
  0x36   : > { %p5573_p5 = pneg %p5572_p3  ;;  %p5577_p2 = por %p5576_p9, %p5575_p7 }
  0x38   : > { %p5579_p4 = por %p5578_p1, %p5577_p2 }
  0x3a   : > { %p5580_p6 = pnand %p5579_p4, %p5573_p5 }
  0x3c   : > { %5583 = shalt.err (!%p5580_p6)
}
  0x3d   : > { %s5584_s5 = scalar_lea.vmem %s5816_s29, 768  ;;  %s5674_s7 = smov [#allocation2]  }
  0x3e   : > { %p5585_p8 = scmp.ne.s32.totalorder %s5816_s29, %s5584_s5  ;;  %s5589_s26 = sshll.u32 %s5674_s7, 4  ;;  %s5590_s26 = int_to_ptr.vmem [resolvable:$false] %s5589_s26 }
  0x3f   : > { %s5591_s8 = scalar_lea.vmem %s5590_s26, 1536  ;;  %p5592_p3 = scmp.lt.s32.totalorder %s5816_s29, %s5590_s26 }
  0x40   : > { %p5587_p10 = pnand %p5585_p8, %p5571_p0  ;;  %p5593_p7 = scmp.lt.s32.totalorder %s5591_s8, %s5584_s5 }
  0x42   : > { %p5588_p13 = pneg %p5587_p10  ;;  %p5594_p9 = por %p5593_p7, %p5592_p3 }
  0x44   : > { %p5595_p2 = pnand %p5594_p9, %p5588_p13 }
  0x46   : > { %5598 = shalt.err (!%p5595_p2)
}
  0x47   : > { %s5675_s28 = smov 256   ;;  %s5676_s11 = smov 16  }
  0x48   : > { %5184 = dma.hbm_to_vmem [thread:$0]  (!%p5812_p11), %s5810_s9, 768, %s5816_s29, %s5818_s10, %s5675_s28, %s5675_s28, %s5676_s11  }
  0x49   : > { %p7249_p0 = scmp.ne.s32.totalorder %s7244_s23, 0 }
  0x4b   : > { %196 = sbr.rel (%p7249_p0) target bundleno = 3845 (0xf05), region = 36 }
  0x52   : > { %s5849_s12 = sand.u32 1, %s5661_s16   ;;  %p7250_p5 = scmp.ne.s32.totalorder %s7242_s21, 0 }
  0x53   : > { %s5168_s13 = smul.u32 48, %s5849_s12  ;;  %s199_s14 = scalar_lea.sflag [#allocation3], %s5849_s12 }
  0x55   : > { %s5853_s20 = scalar_lea.vmem [#allocation2], %s5168_s13 }
  0x56   : > { %5644 = dma.done.wait (%p7250_p5), %s199_s14, 768  }
  0x57   : > { %5646 = vsyncadd (%p7250_p5), %s199_s14, 4294966528  ;;  %p7251_p11 = scmp.eq.s32.totalorder %s5731_s19, 0 }
  0x59   : > { %5648 = dma.done.wait (%p7251_p11), [#allocation6], 16384   ;;  %p7252_p1 = pmov %p7251_p11 }
  0x5a   : > { %v5241_v0 = vld [vmem:[#allocation5 + $0x40] sm:$0xff]   ;;  %v5245_v4 = vld [vmem:[#allocation5 + $0x48] sm:$0xff]   ;;  %v5249_v8 = vld [vmem:[#allocation5 + $0x50] sm:$0xff]   ;;  %v240_v21 = vlaneseq  ;;  %vm401_vm0 = vcmask 1041409   ;;  %vm404_vm1 = vcmask 1042434   ;;  %vm5678_vm2 = vmmov 0  }
  0x5b   : > { %5650 = vsyncadd (%p7252_p1), [#allocation6], 4294950912  ;;  %v5242_v1 = vld [vmem:[#allocation5 + $0xc0] sm:$0xff]   ;;  %4278 = vmatprep.subr.bf16.mxu0 %v5241_v0  ;;  %v5246_v5 = vld [vmem:[#allocation5 + $0xc8] sm:$0xff]   ;;  %vm1051_vm3 = vcmask 1040384   ;;  %vm1052_vm4 = vcmask 1041408  }
  0x5c   : > { %v5243_v2 = vld [vmem:[#allocation5] sm:$0xff]   ;;  %4300 = vmatprep.subr.bf16.mxu1 %v5242_v1  ;;  %v5247_v6 = vld [vmem:[#allocation5 + $0x8] sm:$0xff]   ;;  %v5250_v9 = vld [vmem:[#allocation5 + $0xd0] sm:$0xff]   ;;  %v241_v26 = vshrl.u32 %v240_v21, 7  ;;  %vm1047_vm5 = vcmask 23552   ;;  %s4090_s25 = sshll.u32 %s5849_s12, 4 }
  0x5d   : > { %v5244_v3 = vld [vmem:[#allocation5 + $0x80] sm:$0xff]   ;;  %4279 = vmatpush3.bf16.msra.mxu0 %v5243_v2  ;;  %v5248_v7 = vld [vmem:[#allocation5 + $0x88] sm:$0xff]   ;;  %v5251_v10 = vld [vmem:[#allocation5 + $0x10] sm:$0xff]   ;;  %s230_s29 = scalar_lea.vmem [#allocation7], %s4090_s25  ;;  %s4277_s10 = sshll.u32 %s5731_s19, 8 }
  0x5e   : > { %4301 = vmatpush3.bf16.msra.mxu1 %v5244_v3  ;;  %4280 = vmatprep.subr.bf16.mxu0 %v5245_v4  ;;  %v5252_v11 = vld [vmem:[#allocation5 + $0x90] sm:$0xff]   ;;  %v5253_v12 = vld [vmem:[#allocation5 + $0x58] sm:$0xff]   ;;  %v5257_v16 = vld [vmem:[#allocation5 + $0x60] sm:$0xff]   ;;  %v5863_v31 = vsub.s32 1, %v241_v26  ;;  %v5865_v33 = vsub.s32 3, %v241_v26  ;;  %v5867_v35 = vsub.s32 0, %v241_v26  ;;  %s7069_s7 = scalar_lea.hbm %s7119_s4, %s4277_s10 }
  0x5f   : > { %4302 = vmatprep.subr.bf16.mxu1 %v5246_v5  ;;  %v5254_v13 = vld [vmem:[#allocation5 + $0xd8] sm:$0xff]   ;;  %v5258_v17 = vld [vmem:[#allocation5 + $0xe0] sm:$0xff]   ;;  %v5261_v20 = vld [vmem:[#allocation5 + $0x68] sm:$0xff]   ;;  %v5869_v37 = vsub.s32 2, %v241_v26  ;;  %s3987_s26 = scalar_lea.sflag [#allocation4], %s5849_s12  ;;  %s5682_s19 = smov [#allocation7]  }
  0x60   : > { %v5255_v14 = vld [vmem:[#allocation5 + $0x18] sm:$0xff]   ;;  %v5259_v18 = vld [vmem:[#allocation5 + $0x20] sm:$0xff]   ;;  %v5262_v22 = vld [vmem:[#allocation5 + $0xe8] sm:$0xff]   ;;  %7253 = vst [vmem:[#allocation11_spill] sm:$0xff] %v5863_v31  ;;  %s5603_s28 = sshll.u32 %s5682_s19, 4  ;;  %s5604_s28 = int_to_ptr.vmem [resolvable:$false] %s5603_s28 }
  0x61   : > { %4281 = vmatpush3.bf16.msra.mxu0 %v5247_v6  ;;  %v5256_v15 = vld [vmem:[#allocation5 + $0x98] sm:$0xff]   ;;  %v5260_v19 = vld [vmem:[#allocation5 + $0xa0] sm:$0xff]   ;;  %v5263_v23 = vld [vmem:[#allocation5 + $0x28] sm:$0xff]   ;;  %7254 = vst [vmem:[#allocation12_spill] sm:$0xff] %v5869_v37  ;;  %s5605_s11 = scalar_lea.vmem %s5604_s28, 512 }
  0x62   : > { %4303 = vmatpush3.bf16.msra.mxu1 %v5248_v7  ;;  %4282 = vmatprep.subr.bf16.mxu0 %v5249_v8  ;;  %v5264_v24 = vld [vmem:[#allocation5 + $0xa8] sm:$0xff]   ;;  %v5265_v25 = vld [vmem:[#allocation5 + $0x70] sm:$0xff]   ;;  %v5269_v30 = vld [vmem:[#allocation5 + $0x78] sm:$0xff]  }
  0x63   : > { %4304 = vmatprep.subr.bf16.mxu1 %v5250_v9  ;;  %v5266_v27 = vld [vmem:[#allocation5 + $0xf0] sm:$0xff]   ;;  %v5270_v32 = vld [vmem:[#allocation5 + $0xf8] sm:$0xff]   ;;  %v5273_v45 = vld [vmem:[#allocation5 + $0x140] sm:$0xff]  }
  0x64   : > { %v5267_v28 = vld [vmem:[#allocation5 + $0x30] sm:$0xff]   ;;  %v5271_v34 = vld [vmem:[#allocation5 + $0x38] sm:$0xff]   ;;  %v5274_v54 = vld [vmem:[#allocation5 + $0x1c0] sm:$0xff]  }
  0x65   : > { %4283 = vmatpush3.bf16.msra.mxu0 %v5251_v10  ;;  %v5268_v29 = vld [vmem:[#allocation5 + $0xb0] sm:$0xff]   ;;  %v5272_v36 = vld [vmem:[#allocation5 + $0xb8] sm:$0xff]  }
  0x66   : > { %4305 = vmatpush3.bf16.msra.mxu1 %v5252_v11  ;;  %4284 = vmatprep.subr.bf16.mxu0 %v5253_v12  ;;  %v232_v38 = vld [vmem:[%s5853_s20] ss:$4 sm:$0xf]  ;;  %v4091_v39 = vld [vmem:[%s5853_s20 + $0x10] ss:$4 sm:$0xf] }
  0x67   : > { %4306 = vmatprep.subr.bf16.mxu1 %v5254_v13  ;;  %v4092_v40 = vld [vmem:[%s5853_s20 + $0x20] ss:$4 sm:$0xf]  ;;  %v247_v41 = vrot.slane %v232_v38, %v5863_v31  ;;  %v263_v42 = vrot.slane %v4091_v39, %v5863_v31  ;;  %v255_v43 = vrot.slane %v232_v38, %v5865_v33  ;;  %v271_v44 = vrot.slane %v4091_v39, %v5865_v33 }
  0x68   : > { %v279_v46 = vrot.slane %v4092_v40, %v5863_v31  ;;  %v287_v47 = vrot.slane %v4092_v40, %v5865_v33  ;;  %v243_v48 = vrot.slane %v232_v38, %v5867_v35  ;;  %v259_v49 = vrot.slane %v4091_v39, %v5867_v35 }
  0x69   : > { %4285 = vmatpush3.bf16.msra.mxu0 %v5255_v14  ;;  %v301_v50 = vpack.c.bf16 %v247_v41, %v247_v41  ;;  %v305_v51 = vpack.c.bf16 %v263_v42, %v263_v42  ;;  %v303_v52 = vpack.c.bf16 %v255_v43, %v255_v43  ;;  %v307_v53 = vpack.c.bf16 %v271_v44, %v271_v44  ;;  %v5914_v42 = vld [vmem:[#allocation5 + $0x150] sm:$0xff]   ;;  %v5918_v44 = vld [vmem:[#allocation5 + $0x1c8] sm:$0xff]  }
  0x6a   : > { %4307 = vmatpush3.bf16.msra.mxu1 %v5256_v15  ;;  %4286 = vmatprep.subr.bf16.mxu0 %v5257_v16  ;;  %v309_v55 = vpack.c.bf16 %v279_v46, %v279_v46  ;;  %v311_v56 = vpack.c.bf16 %v287_v47, %v287_v47  ;;  %v275_v57 = vrot.slane %v4092_v40, %v5867_v35  ;;  %v5924_v46 = vld [vmem:[#allocation5 + $0x110] sm:$0xff]   ;;  %v5928_v47 = vld [vmem:[#allocation5 + $0x158] sm:$0xff]  }
  0x6b   : > { %4308 = vmatprep.subr.bf16.mxu1 %v5258_v17  ;;  %v300_v58 = vpack.c.bf16 %v243_v48, %v243_v48  ;;  %v389_v59 = vunpack.c.l.b16 %v301_v50  ;;  %v393_v60 = vunpack.c.l.b16 %v305_v51  ;;  %v391_v61 = vunpack.c.l.b16 %v303_v52  ;;  %v5931_v48 = vld [vmem:[#allocation5 + $0x1d0] sm:$0xff]   ;;  %v5937_v50 = vld [vmem:[#allocation5 + $0x118] sm:$0xff]   ;;  %v5941_v51 = vld [vmem:[#allocation5 + $0x160] sm:$0xff]  }
  0x6c   : > { %v395_v62 = vunpack.c.l.b16 %v307_v53  ;;  %v397_v63 = vunpack.c.l.b16 %v309_v55  ;;  %v399_v0 = vunpack.c.l.b16 %v311_v56  ;;  %v304_v1 = vpack.c.bf16 %v259_v49, %v259_v49  ;;  %v5934_v49 = vld [vmem:[#allocation5 + $0x190] sm:$0xff]   ;;  %v5944_v52 = vld [vmem:[#allocation5 + $0x1d8] sm:$0xff]   ;;  %v5953_v55 = vld [vmem:[#allocation5 + $0x168] sm:$0xff]  }
  0x6d   : > { %4287 = vmatpush3.bf16.msra.mxu0 %v5259_v18  ;;  %v308_v2 = vpack.c.bf16 %v275_v57, %v275_v57  ;;  %v406_v3 = vrot.slane %v393_v60, 7  ;;  %v388_v5 = vunpack.c.l.b16 %v300_v58  ;;  %v251_v6 = vrot.slane %v232_v38, %v5869_v37  ;;  %v5905_v38 = vld [vmem:[#allocation5 + $0x180] sm:$0xff]   ;;  %v5946_v53 = vld [vmem:[#allocation5 + $0x198] sm:$0xff]   ;;  %v5960_v58 = vld [vmem:[#allocation5 + $0x128] sm:$0xff]  }
  0x6e   : > { %4309 = vmatpush3.bf16.msra.mxu1 %v5260_v19  ;;  %4288 = vmatprep.subr.bf16.mxu0 %v5261_v20  ;;  %v414_v4 = vrot.slane %v395_v62, 7  ;;  %v408_v7 = vrot.slane %v397_v63, 6  ;;  %v416_v8 = vrot.slane %v399_v0, 6  ;;  %v392_v9 = vunpack.c.l.b16 %v304_v1  ;;  %v5956_v56 = vld [vmem:[#allocation5 + $0x1e0] sm:$0xff]   ;;  %v5965_v60 = vld [vmem:[#allocation5 + $0x170] sm:$0xff]   ;;  %v5972_v62 = vld [vmem:[#allocation5 + $0x1a8] sm:$0xff]  }
  0x6f   : > { %4310 = vmatprep.subr.bf16.mxu1 %v5262_v22  ;;  %v396_v10 = vunpack.c.l.b16 %v308_v2  ;;  %v407_v11 = vsel %vm401_vm0, %v406_v3, %v389_v59  ;;  %v267_v13 = vrot.slane %v4091_v39, %v5869_v37  ;;  %v283_v14 = vrot.slane %v4092_v40, %v5869_v37  ;;  %v5909_v40 = vld [vmem:[#allocation5 + $0x108] sm:$0xff]   ;;  %v5958_v57 = vld [vmem:[#allocation5 + $0x1a0] sm:$0xff]   ;;  %v5974_v63 = vld [vmem:[#allocation5 + $0x178] sm:$0xff]  }
  0x70   : > { %v415_v12 = vsel %vm401_vm0, %v414_v4, %v391_v61  ;;  %v409_v15 = vsel %vm404_vm1, %v408_v7, %v407_v11  ;;  %v400_v17 = vrot.slane %v392_v9, 7  ;;  %v302_v21 = vpack.c.bf16 %v251_v6, %v251_v6  ;;  %v5963_v59 = vld [vmem:[#allocation5 + $0x1e8] sm:$0xff]   ;;  %v5970_v61 = vld [vmem:[#allocation5 + $0x130] sm:$0xff]   ;;  %v5982_v1 = vld [vmem:[#allocation5 + $0x138] sm:$0xff]  }
  0x71   : > { %4289 = vmatpush3.bf16.msra.mxu0 %v5263_v23  ;;  %v417_v16 = vsel %vm404_vm1, %v416_v8, %v415_v12  ;;  %v403_v18 = vrot.slane %v396_v10, 6  ;;  %v5890_v19 = vpack.c.b16 %v409_v15, %v409_v15  ;;  %v306_v22 = vpack.c.bf16 %v267_v13, %v267_v13  ;;  %v5977_v0 = vld [vmem:[#allocation5 + $0x1f0] sm:$0xff]   ;;  %v5987_v3 = vld [vmem:[#allocation5 + $0x1f8] sm:$0xff]   ;;  %v6004_v6 = vld [vmem:[#allocation5 + $0x240] sm:$0xff]  }
  0x72   : > { %4311 = vmatpush3.bf16.msra.mxu1 %v5264_v24  ;;  %4290 = vmatprep.subr.bf16.mxu0 %v5265_v25  ;;  %v5892_v20 = vpack.c.b16 %v417_v16, %v417_v16  ;;  %v402_v23 = vsel %vm401_vm0, %v400_v17, %v388_v5  ;;  %v310_v24 = vpack.c.bf16 %v283_v14, %v283_v14  ;;  %v390_v26 = vunpack.c.l.b16 %v302_v21  ;;  %v5984_v2 = vld [vmem:[#allocation5 + $0x1b0] sm:$0xff]   ;;  %v5992_v4 = vld [vmem:[#allocation5 + $0x1b8] sm:$0xff]   ;;  %v6006_v7 = vld [vmem:[#allocation5 + $0x200] sm:$0xff]  }
  0x73   : > { %4312 = vmatprep.subr.bf16.mxu1 %v5266_v27  ;;  %650 = vmatprep.mubr.bf16.mxu0 %v5890_v19  ;;  %v405_v25 = vsel %vm404_vm1, %v403_v18, %v402_v23  ;;  %v394_v27 = vunpack.c.l.b16 %v306_v22  ;;  %v7123_v5 = vmov 0.0   ;;  %7255 = vst [vmem:[#allocation13_spill] sm:$0xff] %v6004_v6  ;;  %7256 = vst [vmem:[#allocation14_spill] sm:$0xff] %v6006_v7  ;;  %v6010_v8 = vld [vmem:[#allocation5 + $0x248] sm:$0xff]   ;;  %v6016_v10 = vld [vmem:[#allocation5 + $0x250] sm:$0xff]  }
  0x74   : > { %690 = vmatprep.mubr.bf16.mxu1 %v5892_v20  ;;  %7257 = vst [vmem:[#allocation15_spill] sm:$0xff] %v6010_v8  ;;  %v6013_v9 = vld [vmem:[#allocation5 + $0x208] sm:$0xff]   ;;  %7259 = vst [vmem:[#allocation17_spill] sm:$0xff] %v6016_v10  ;;  %v6019_v11 = vld [vmem:[#allocation5 + $0x210] sm:$0xff]  }
  0x75   : > { %4291 = vmatpush3.bf16.msra.mxu0 %v5267_v28  ;;  %v5898_v28 = vld [vmem:[#allocation5 + $0x100] sm:$0xff]   ;;  %7258 = vst [vmem:[#allocation16_spill] sm:$0xff] %v6013_v9  ;;  %7260 = vst [vmem:[#allocation18_spill] sm:$0xff] %v6019_v11  ;;  %v6022_v12 = vld [vmem:[#allocation5 + $0x258] sm:$0xff]  }
  0x76   : > { %4313 = vmatpush3.bf16.msra.mxu1 %v5268_v29  ;;  %4292 = vmatprep.subr.bf16.mxu0 %v5269_v30  ;;  %v5900_v29 = vpack.c.b16 %v405_v25, %v405_v25  ;;  %v398_v30 = vunpack.c.l.b16 %v310_v24  ;;  %7261 = vst [vmem:[#allocation19_spill] sm:$0xff] %v6022_v12  ;;  %v6025_v13 = vld [vmem:[#allocation5 + $0x218] sm:$0xff]   ;;  %v6028_v14 = vld [vmem:[#allocation5 + $0x260] sm:$0xff]   ;;  %v6034_v16 = vld [vmem:[#allocation5 + $0x268] sm:$0xff]  }
  0x77   : > { %4314 = vmatprep.subr.bf16.mxu1 %v5270_v32  ;;  %v5902_v32 = vld [vmem:[#allocation5 + $0x148] sm:$0xff]   ;;  %7262 = vst [vmem:[#allocation20_spill] sm:$0xff] %v6025_v13  ;;  %7263 = vst [vmem:[#allocation21_spill] sm:$0xff] %v6028_v14  ;;  %v6031_v15 = vld [vmem:[#allocation5 + $0x220] sm:$0xff]  }
  0x78   : > { %7264 = vst [vmem:[#allocation22_spill] sm:$0xff] %v6031_v15  ;;  %7265 = vst [vmem:[#allocation23_spill] sm:$0xff] %v6034_v16  ;;  %v6037_v17 = vld [vmem:[#allocation5 + $0x228] sm:$0xff]   ;;  %v6040_v18 = vld [vmem:[#allocation5 + $0x270] sm:$0xff]  }
  0x79   : > { %4293 = vmatpush3.bf16.msra.mxu0 %v5271_v34  ;;  %v410_v34 = vrot.slane %v394_v27, 7  ;;  %7266 = vst [vmem:[#allocation24_spill] sm:$0xff] %v6037_v17  ;;  %7267 = vst [vmem:[#allocation25_spill] sm:$0xff] %v6040_v18  ;;  %v6043_v21 = vld [vmem:[#allocation5 + $0x230] sm:$0xff]   ;;  %v6046_v22 = vld [vmem:[#allocation5 + $0x278] sm:$0xff]  }
  0x7a   : > { %4315 = vmatpush3.bf16.msra.mxu1 %v5272_v36  ;;  %4322 = vmatprep.subr.bf16.mxu0 %v5273_v45  ;;  %v412_v36 = vrot.slane %v398_v30, 6  ;;  %v5920_v45 = vld [vmem:[#allocation5 + $0x188] sm:$0xff]   ;;  %7268 = vst [vmem:[#allocation26_spill] sm:$0xff] %v6043_v21  ;;  %7269 = vst [vmem:[#allocation27_spill] sm:$0xff] %v6046_v22  ;;  %v6049_v23 = vld [vmem:[#allocation5 + $0x238] sm:$0xff]  }
  0x7b   : > { %4344 = vmatprep.subr.bf16.mxu1 %v5274_v54  ;;  %v411_v39 = vsel %vm401_vm0, %v410_v34, %v390_v26  ;;  %v5949_v54 = vld [vmem:[#allocation5 + $0x120] sm:$0xff]   ;;  %7270 = vst [vmem:[#allocation28_spill] sm:$0xff] %v6049_v23 }
  0x7c   : > { %651 = vmatmul.mubr.bf16.vlgmr.msra.gmra.mrb[0].mxu0 %v5900_v29  ;;  %v413_v41 = vsel %vm404_vm1, %v412_v36, %v411_v39 }
  0x7d   : > { %4323 = vmatpush3.bf16.msra.mxu0 %v5898_v28  ;;  %990 = vmatprep.mubr.bf16.mxu0 %v5890_v19  ;;  %v5916_v43 = vpack.c.b16 %v413_v41, %v413_v41 }
  0x7e   : > { %4324 = vmatprep.subr.bf16.mxu0 %v5902_v32 }
  0x7f   : > { %691 = vmatmul.mubr.bf16.vlgmr.msra.gmra.mrb[0].mxu1 %v5916_v43 }
  0x80   : > { %4345 = vmatpush3.bf16.msra.mxu1 %v5905_v38  ;;  %1030 = vmatprep.mubr.bf16.mxu1 %v5892_v20 }
  0x81   : > { %4325 = vmatpush3.bf16.msra.mxu0 %v5909_v40  ;;  %4346 = vmatprep.subr.bf16.mxu1 %v5918_v44 }
  0x82   : > { %4326 = vmatprep.subr.bf16.mxu0 %v5914_v42 }
  0x84   : > { %4347 = vmatpush3.bf16.msra.mxu1 %v5920_v45 }
  0x85   : > { %4327 = vmatpush3.bf16.msra.mxu0 %v5924_v46  ;;  %4348 = vmatprep.subr.bf16.mxu1 %v5931_v48 }
  0x86   : > { %4328 = vmatprep.subr.bf16.mxu0 %v5928_v47 }
  0x88   : > { %4349 = vmatpush3.bf16.msra.mxu1 %v5934_v49 }
  0x89   : > { %4329 = vmatpush3.bf16.msra.mxu0 %v5937_v50  ;;  %4350 = vmatprep.subr.bf16.mxu1 %v5944_v52 }
  0x8a   : > { %4330 = vmatprep.subr.bf16.mxu0 %v5941_v51 }
  0x8c   : > { %4351 = vmatpush3.bf16.msra.mxu1 %v5946_v53 }
  0x8d   : > { %4331 = vmatpush3.bf16.msra.mxu0 %v5949_v54  ;;  %4352 = vmatprep.subr.bf16.mxu1 %v5956_v56 }
  0x8e   : > { %4332 = vmatprep.subr.bf16.mxu0 %v5953_v55 }
  0x90   : > { %4353 = vmatpush3.bf16.msra.mxu1 %v5958_v57 }
  0x91   : > { %4333 = vmatpush3.bf16.msra.mxu0 %v5960_v58  ;;  %4354 = vmatprep.subr.bf16.mxu1 %v5963_v59 }
  0x92   : > { %4334 = vmatprep.subr.bf16.mxu0 %v5965_v60 }
  0x94   : > { %4355 = vmatpush3.bf16.msra.mxu1 %v5972_v62 }
  0x95   : > { %4335 = vmatpush3.bf16.msra.mxu0 %v5970_v61  ;;  %4356 = vmatprep.subr.bf16.mxu1 %v5977_v0 }
  0x96   : > { %4336 = vmatprep.subr.bf16.mxu0 %v5974_v63 }
  0x98   : > { %4357 = vmatpush3.bf16.msra.mxu1 %v5984_v2 }
  0x99   : > { %4337 = vmatpush3.bf16.msra.mxu0 %v5982_v1  ;;  %4358 = vmatprep.subr.bf16.mxu1 %v5987_v3 }
  0x9a   : > { %5014 = vmatprep.subr.bf16.mxu0 %v7123_v5 }
  0x9c   : > { %991 = vmatmul.mubr.bf16.vlgmr.msra.gmra.mrb[4].mxu0 %v5900_v29  ;;  %4359 = vmatpush3.bf16.msra.mxu1 %v5992_v4 }
  0x9d   : > { %5016 = vmatprep.mubr.msk.bf16.mxu0 %vm5678_vm2, %v7123_v5  ;;  %4370 = vmatprep.subr.bf16.mxu1 %v6004_v6  ;;  %v6132_v6 = vld [vmem:[#allocation5 + $0x308] sm:$0xff]  }
  0x9e   : > { %7284 = vst [vmem:[#allocation41_spill] sm:$0xff] %v6132_v6 }
  0x9f   : > { %1031 = vmatmul.mubr.bf16.vlgmr.msra.gmra.mrb[4].mxu1 %v5916_v43 }
  0xa0   : > { %1440 = vmatprep.mubr.bf16.mxu1 %v5890_v19  ;;  %4371 = vmatpush3.bf16.msra.mxu1 %v6006_v7  ;;  %v6130_v7 = vld [vmem:[#allocation5 + $0x348] sm:$0xff]  }
  0xa1   : > { %4372 = vmatprep.subr.bf16.mxu1 %v6010_v8  ;;  %v6126_v8 = vld [vmem:[#allocation5 + $0x300] sm:$0xff]   ;;  %7283 = vst [vmem:[#allocation40_spill] sm:$0xff] %v6130_v7 }
  0xa2   : > { %7282 = vst [vmem:[#allocation39_spill] sm:$0xff] %v6126_v8 }
  0xa4   : > { %4373 = vmatpush3.bf16.msra.mxu1 %v6013_v9  ;;  %v6124_v9 = vld [vmem:[#allocation5 + $0x340] sm:$0xff]  }
  0xa5   : > { %4374 = vmatprep.subr.bf16.mxu1 %v6016_v10  ;;  %7281 = vst [vmem:[#allocation38_spill] sm:$0xff] %v6124_v9 }
  0xa8   : > { %4375 = vmatpush3.bf16.msra.mxu1 %v6019_v11 }
  0xa9   : > { %4376 = vmatprep.subr.bf16.mxu1 %v6022_v12 }
  0xac   : > { %4377 = vmatpush3.bf16.msra.mxu1 %v6025_v13 }
  0xad   : > { %4378 = vmatprep.subr.bf16.mxu1 %v6028_v14 }
  0xb0   : > { %4379 = vmatpush3.bf16.msra.mxu1 %v6031_v15 }
  0xb1   : > { %4380 = vmatprep.subr.bf16.mxu1 %v6034_v16 }
  0xb4   : > { %4381 = vmatpush3.bf16.msra.mxu1 %v6037_v17 }
  0xb5   : > { %4382 = vmatprep.subr.bf16.mxu1 %v6040_v18 }
  0xb8   : > { %4383 = vmatpush3.bf16.msra.mxu1 %v6043_v21 }
  0xb9   : > { %4384 = vmatprep.subr.bf16.mxu1 %v6046_v22 }
  0xbc   : > { %4385 = vmatpush3.bf16.msra.mxu1 %v6049_v23 }
  0xbd   : > { %4416 = vmatprep.subr.bf16.mxu1 %v6124_v9 }
  0xbf   : > { %1441 = vmatmul.mubr.bf16.vlgmr.msra.gmra.mrb[8].mxu1 %v5900_v29 }
  0xc0   : > { %1835 = vmatprep.mubr.bf16.mxu1 %v5890_v19  ;;  %4417 = vmatpush3.bf16.msra.mxu1 %v6126_v8  ;;  %v6148_v8 = vld [vmem:[#allocation5 + $0x360] sm:$0xff]  }
  0xc1   : > { %4418 = vmatprep.subr.bf16.mxu1 %v6130_v7  ;;  %7289 = vst [vmem:[#allocation46_spill] sm:$0xff] %v6148_v8  ;;  %v6189_v7 = vld [vmem:[%s5853_s20 + $0x21] ss:$4 sm:$0xf] }
  0xc4   : > { %4419 = vmatpush3.bf16.msra.mxu1 %v6132_v6  ;;  %v6151_v6 = vld [vmem:[#allocation5 + $0x320] sm:$0xff]  }
  0xc5   : > { %7290 = vst [vmem:[#allocation47_spill] sm:$0xff] %v6151_v6 }
 0x14f   : > { %v4294_v24 = vpop.f32.mrb[0].mxu0 }
 0x150   : > { %v4295_v25 = vpop.f32.mrb[1].mxu0 }
 0x151   : > { %v4296_v26 = vadd.f32 %v4295_v25, %v4294_v24  ;;  %v4297_v27 = vpop.f32.mrb[2].mxu0  ;;  %v5679_v24 = vmov 65535  }
 0x152   : > { %v4298_v30 = vpop.f32.mrb[3].mxu0  ;;  %v4316_v34 = vpop.f32.mrb[0].mxu1  ;;  %v1053_v25 = vsel %vm1051_vm3, 4294967295, %v5679_v24  ;;  %v6099_v24 = vld [vmem:[#allocation5 + $0x2e8] sm:$0xff]  }
 0x153   : > { %v4317_v36 = vpop.f32.mrb[1].mxu1  ;;  %7275 = vst [vmem:[#allocation32_spill] sm:$0xff] %v6099_v24 }
 0x154   : > { %v4318_v39 = vadd.f32 %v4317_v36, %v4316_v34  ;;  %v4319_v41 = vpop.f32.mrb[2].mxu1  ;;  %v6054_v34 = vsel %vm1052_vm4, %v1053_v25, 0  ;;  %v6087_v36 = vld [vmem:[#allocation5 + $0x2d8] sm:$0xff]   ;;  %v6102_v25 = vld [vmem:[#allocation5 + $0x2a8] sm:$0xff]  }
 0x155   : > { %v4320_v5 = vpop.f32.mrb[3].mxu1  ;;  %v6093_v41 = vld [vmem:[#allocation5 + $0x2e0] sm:$0xff]   ;;  %7276 = vst [vmem:[#allocation33_spill] sm:$0xff] %v6102_v25 }
 0x156   : > { %v693_v21 = vadd.f32 %v4318_v39, %v4296_v26  ;;  %v6090_v39 = vld [vmem:[#allocation5 + $0x298] sm:$0xff]   ;;  %7273 = vst [vmem:[#allocation30_spill] sm:$0xff] %v6093_v41 }
 0x157   : > { %7272 = vst [vmem:[#allocation29_spill] sm:$0xff] %v6090_v39 }
 0x158   : > { %v698_v5 = vpack.c.bf16 %v693_v21, %v693_v21  ;;  %v6077_v21 = vld [vmem:[#allocation5 + $0x288] sm:$0xff]  }
 0x16f   : > { %v4338_v22 = vpop.f32.mrb[4].mxu0 }
 0x170   : > { %v4339_v18 = vpop.f32.mrb[5].mxu0 }
 0x171   : > { %v4340_v17 = vadd.f32 %v4339_v18, %v4338_v22  ;;  %v4341_v16 = vpop.f32.mrb[6].mxu0  ;;  %v7271_v18 = vmov 0.0   ;;  %v6081_v22 = vld [vmem:[#allocation5 + $0x2d0] sm:$0xff]  }
 0x172   : > { %v4342_v23 = vpop.f32.mrb[7].mxu0  ;;  %v4360_v15 = vpop.f32.mrb[4].mxu1  ;;  %v5305_v16 = vld [vmem:[%s7116_s1 + $0x8] sm:$0xff]  }
 0x173   : > { %v4361_v14 = vpop.f32.mrb[5].mxu1  ;;  %v6084_v23 = vld [vmem:[#allocation5 + $0x290] sm:$0xff]  }
 0x174   : > { %v4362_v19 = vadd.f32 %v4361_v14, %v4360_v15  ;;  %v4363_v13 = vpop.f32.mrb[6].mxu1  ;;  %v5309_v14 = vld [vmem:[%s7116_s1] sm:$0xff]  }
 0x175   : > { %v4364_v12 = vpop.f32.mrb[7].mxu1  ;;  %v6061_v13 = vld [vmem:[#allocation5 + $0x2c0] sm:$0xff]  }
 0x176   : > { %v1033_v27 = vadd.f32 %v4362_v19, %v4340_v17  ;;  %v1108_v12 = vand.u32 %v6054_v34, %v698_v5  ;;  %v6071_v15 = vld [vmem:[#allocation5 + $0x280] sm:$0xff]   ;;  %v6073_v17 = vld [vmem:[#allocation5 + $0x2c8] sm:$0xff]   ;;  %v6111_v5 = vld [vmem:[#allocation5 + $0x2f8] sm:$0xff]  }
 0x177   : > { %v6096_v19 = vld [vmem:[#allocation5 + $0x2a0] sm:$0xff]   ;;  %7279 = vst [vmem:[#allocation36_spill] sm:$0xff] %v6111_v5 }
 0x178   : > { %v1038_v30 = vpack.c.bf16 %v1033_v27, %v1033_v27  ;;  %7274 = vst [vmem:[#allocation31_spill] sm:$0xff] %v6096_v19  ;;  %v6105_v27 = vld [vmem:[#allocation5 + $0x2f0] sm:$0xff]  }
 0x179   : > { %7277 = vst [vmem:[#allocation34_spill] sm:$0xff] %v6105_v27 }
 0x17a   : > { %v1056_v26 = vand.u32 %v6054_v34, %v1038_v30  ;;  %v6108_v30 = vld [vmem:[#allocation5 + $0x2b0] sm:$0xff]  }
 0x17b   : > { %7278 = vst [vmem:[#allocation35_spill] sm:$0xff] %v6108_v30 }
 0x17c   : > { %5015 = vmatpush3.bf16.msra.mxu0 %v1056_v26  ;;  %v6114_v26 = vld [vmem:[#allocation5 + $0x2b8] sm:$0xff]  }
 0x17d   : > { %5020 = vmatprep.subr.bf16.mxu0 %v7271_v18  ;;  %7280 = vst [vmem:[#allocation37_spill] sm:$0xff] %v6114_v26 }
 0x17f   : > { %5017 = vmatmul.mubr.msk.bf16.vlgmr.msra.gmra.mrb[8].mxu0 %vm1047_vm5, %v5305_v16 }
 0x180   : > { %5021 = vmatpush3.bf16.msra.mxu0 %v1108_v12  ;;  %5022 = vmatprep.mubr.msk.bf16.mxu0 %vm5678_vm2, %v7271_v18 }
 0x181   : > { %4392 = vmatprep.subr.bf16.mxu0 %v6061_v13 }
 0x18b   : > { %5023 = vmatmul.mubr.msk.bf16.vlgmr.msra.gmra.mrb[8].mxu0 %vm1047_vm5, %v5309_v14 }
 0x18c   : > { %4393 = vmatpush3.bf16.msra.mxu0 %v6071_v15  ;;  %1480 = vmatprep.mubr.bf16.mxu0 %v5892_v20 }
 0x18d   : > { %4394 = vmatprep.subr.bf16.mxu0 %v6073_v17 }
 0x190   : > { %4395 = vmatpush3.bf16.msra.mxu0 %v6077_v21 }
 0x191   : > { %4396 = vmatprep.subr.bf16.mxu0 %v6081_v22 }
 0x192   : > { %v4386_v16 = vpop.f32.mrb[8].mxu1 }
 0x193   : > { %v4387_v12 = vpop.f32.mrb[9].mxu1 }
 0x194   : > { %4397 = vmatpush3.bf16.msra.mxu0 %v6084_v23  ;;  %v6122_v14 = vadd.f32 %v4387_v12, %v4386_v16  ;;  %v4389_v11 = vpop.f32.mrb[10].mxu1  ;;  %v6136_v16 = vld [vmem:[#allocation5 + $0x350] sm:$0xff]   ;;  %v6145_v12 = vld [vmem:[#allocation5 + $0x318] sm:$0xff]  }
 0x195   : > { %4398 = vmatprep.subr.bf16.mxu0 %v6087_v36  ;;  %v4390_v10 = vpop.f32.mrb[11].mxu1  ;;  %7285 = vst [vmem:[#allocation42_spill] sm:$0xff] %v6136_v16  ;;  %4420 = vmatprep.subr.bf16.mxu1 %v6136_v16  ;;  %v6142_v11 = vld [vmem:[#allocation5 + $0x358] sm:$0xff]   ;;  %7288 = vst [vmem:[#allocation45_spill] sm:$0xff] %v6145_v12  ;;  %v6154_v16 = vld [vmem:[#allocation5 + $0x368] sm:$0xff]  }
 0x196   : > { %v6139_v10 = vld [vmem:[#allocation5 + $0x310] sm:$0xff]   ;;  %7287 = vst [vmem:[#allocation44_spill] sm:$0xff] %v6142_v11  ;;  %7291 = vst [vmem:[#allocation48_spill] sm:$0xff] %v6154_v16 }
 0x197   : > { %7286 = vst [vmem:[#allocation43_spill] sm:$0xff] %v6139_v10  ;;  %4421 = vmatpush3.bf16.msra.mxu1 %v6139_v10  ;;  %v6157_v10 = vld [vmem:[#allocation5 + $0x328] sm:$0xff]  }
 0x198   : > { %4399 = vmatpush3.bf16.msra.mxu0 %v6090_v39  ;;  %4422 = vmatprep.subr.bf16.mxu1 %v6142_v11  ;;  %7292 = vst [vmem:[#allocation49_spill] sm:$0xff] %v6157_v10  ;;  %v6160_v11 = vld [vmem:[#allocation5 + $0x370] sm:$0xff]  }
 0x199   : > { %4400 = vmatprep.subr.bf16.mxu0 %v6093_v41  ;;  %7293 = vst [vmem:[#allocation50_spill] sm:$0xff] %v6160_v11  ;;  %v6220_v41 = vld [vmem:[#allocation5 + $0x60] sm:$0xff]  }
 0x19b   : > { %4423 = vmatpush3.bf16.msra.mxu1 %v6145_v12  ;;  %v6179_v12 = vld [vmem:[#allocation5 + $0x48] sm:$0xff]  }
 0x19c   : > { %4401 = vmatpush3.bf16.msra.mxu0 %v6096_v19  ;;  %4424 = vmatprep.subr.bf16.mxu1 %v6148_v8  ;;  %v6163_v8 = vld [vmem:[#allocation5 + $0x330] sm:$0xff]   ;;  %7299 = vst [vmem:[#allocation56_spill] sm:$0xff] %v6179_v12  ;;  %v6210_v19 = vld [vmem:[#allocation5 + $0x58] sm:$0xff]  }
 0x19d   : > { %4402 = vmatprep.subr.bf16.mxu0 %v6099_v24  ;;  %7294 = vst [vmem:[#allocation51_spill] sm:$0xff] %v6163_v8  ;;  %v6205_v24 = vld [vmem:[#allocation5 + $0x10] sm:$0xff]   ;;  %7303 = vst [vmem:[#allocation60_spill] sm:$0xff] %v6210_v19 }
 0x19e   : > { %7302 = vst [vmem:[#allocation59_spill] sm:$0xff] %v6205_v24 }
 0x19f   : > { %4425 = vmatpush3.bf16.msra.mxu1 %v6151_v6  ;;  %v6166_v6 = vld [vmem:[#allocation5 + $0x378] sm:$0xff]  }
 0x1a0   : > { %4403 = vmatpush3.bf16.msra.mxu0 %v6102_v25  ;;  %4426 = vmatprep.subr.bf16.mxu1 %v6154_v16  ;;  %7295 = vst [vmem:[#allocation52_spill] sm:$0xff] %v6166_v6  ;;  %v6169_v16 = vld [vmem:[#allocation5 + $0x338] sm:$0xff]  }
 0x1a1   : > { %4404 = vmatprep.subr.bf16.mxu0 %v6105_v27  ;;  %7296 = vst [vmem:[#allocation53_spill] sm:$0xff] %v6169_v16 }
 0x1a3   : > { %4427 = vmatpush3.bf16.msra.mxu1 %v6157_v10  ;;  %v6172_v10 = vld [vmem:[#allocation5 + $0x40] sm:$0xff]  }
 0x1a4   : > { %4405 = vmatpush3.bf16.msra.mxu0 %v6108_v30  ;;  %4428 = vmatprep.subr.bf16.mxu1 %v6160_v11  ;;  %7297 = vst [vmem:[#allocation54_spill] sm:$0xff] %v6172_v10  ;;  %v6176_v11 = vld [vmem:[#allocation5] sm:$0xff]  }
 0x1a5   : > { %4406 = vmatprep.subr.bf16.mxu0 %v6111_v5  ;;  %7298 = vst [vmem:[#allocation55_spill] sm:$0xff] %v6176_v11 }
 0x1a7   : > { %4429 = vmatpush3.bf16.msra.mxu1 %v6163_v8  ;;  %v6183_v8 = vld [vmem:[%s5853_s20 + $0x1] ss:$4 sm:$0xf] }
 0x1a8   : > { %4407 = vmatpush3.bf16.msra.mxu0 %v6114_v26  ;;  %4430 = vmatprep.subr.bf16.mxu1 %v6166_v6  ;;  %v6186_v6 = vld [vmem:[%s5853_s20 + $0x11] ss:$4 sm:$0xf] }
 0x1a9   : > { %5026 = vmatprep.subr.bf16.mxu0 %v7271_v18  ;;  %v1969_v5 = vrot.slane %v6186_v6, %v5867_v35 }
 0x1ab   : > { %1481 = vmatmul.mubr.bf16.vlgmr.msra.gmra.mrb[12].mxu0 %v5916_v43  ;;  %4431 = vmatpush3.bf16.msra.mxu1 %v6169_v16  ;;  %v1957_v16 = vrot.slane %v6183_v8, %v5863_v31 }
 0x1ac   : > { %5028 = vmatprep.mubr.msk.bf16.mxu0 %vm5678_vm2, %v7271_v18  ;;  %4462 = vmatprep.subr.bf16.mxu1 %v6172_v10  ;;  %v6195_v10 = vld [vmem:[#allocation5 + $0x8] sm:$0xff]  }
 0x1ad   : > { %7300 = vst [vmem:[#allocation57_spill] sm:$0xff] %v6195_v10  ;;  %v2011_v9 = vpack.c.bf16 %v1957_v16, %v1957_v16 }
 0x1ae   : > { %1836 = vmatmul.mubr.bf16.vlgmr.msra.gmra.mrb[12].mxu1 %v5900_v29  ;;  %v1973_v29 = vrot.slane %v6186_v6, %v5863_v31 }
 0x1af   : > { %4463 = vmatpush3.bf16.msra.mxu1 %v6176_v11  ;;  %v1989_v11 = vrot.slane %v6189_v7, %v5863_v31  ;;  %v2035_v27 = vunpack.c.l.b16 %v2011_v9  ;;  %v1985_v31 = vrot.slane %v6189_v7, %v5867_v35 }
 0x1b0   : > { %4464 = vmatprep.subr.bf16.mxu1 %v6179_v12  ;;  %v6200_v12 = vld [vmem:[#allocation5 + $0x50] sm:$0xff]   ;;  %v2015_v26 = vpack.c.bf16 %v1973_v29, %v1973_v29  ;;  %v1953_v29 = vrot.slane %v6183_v8, %v5867_v35 }
 0x1b1   : > { %7301 = vst [vmem:[#allocation58_spill] sm:$0xff] %v6200_v12  ;;  %v2019_v30 = vpack.c.bf16 %v1989_v11, %v1989_v11 }
 0x1b2   : > { %v2039_v25 = vunpack.c.l.b16 %v2015_v26  ;;  %v6216_v26 = vld [vmem:[#allocation5 + $0x18] sm:$0xff]  }
 0x1b3   : > { %4465 = vmatpush3.bf16.msra.mxu1 %v6195_v10  ;;  %v2043_v10 = vunpack.c.l.b16 %v2019_v30 }
 0x1b4   : > { %4466 = vmatprep.subr.bf16.mxu1 %v6200_v12  ;;  %v2050_v16 = vrot.slane %v2039_v25, 7  ;;  %v2014_v12 = vpack.c.bf16 %v1969_v5, %v1969_v5  ;;  %v2010_v25 = vpack.c.bf16 %v1953_v29, %v1953_v29  ;;  %v6226_v5 = vld [vmem:[#allocation5 + $0x20] sm:$0xff]   ;;  %v6235_v29 = vld [vmem:[#allocation5 + $0x70] sm:$0xff]  }
 0x1b5   : > { %v2052_v11 = vrot.slane %v2043_v10, 6  ;;  %v6229_v10 = vld [vmem:[#allocation5 + $0x68] sm:$0xff]  }
 0x1b6   : > { %v2051_v9 = vsel %vm401_vm0, %v2050_v16, %v2035_v27  ;;  %v2038_v39 = vunpack.c.l.b16 %v2014_v12  ;;  %7304 = vst [vmem:[#allocation61_spill] sm:$0xff] %v6229_v10 }
 0x1b7   : > { %4467 = vmatpush3.bf16.msra.mxu1 %v6205_v24  ;;  %v2053_v30 = vsel %vm404_vm1, %v2052_v11, %v2051_v9  ;;  %v2018_v24 = vpack.c.bf16 %v1985_v31, %v1985_v31  ;;  %v2034_v31 = vunpack.c.l.b16 %v2010_v25  ;;  %v6232_v11 = vld [vmem:[#allocation5 + $0x28] sm:$0xff]   ;;  %v6248_v25 = vld [vmem:[#allocation5 + $0x38] sm:$0xff]  }
 0x1b8   : > { %4468 = vmatprep.subr.bf16.mxu1 %v6210_v19  ;;  %v6223_v19 = vpack.c.b16 %v2053_v30, %v2053_v30  ;;  %v2046_v16 = vrot.slane %v2038_v39, 7  ;;  %v6239_v30 = vld [vmem:[#allocation5 + $0x30] sm:$0xff]  }
 0x1b9   : > { %v2042_v27 = vunpack.c.l.b16 %v2018_v24 }
 0x1ba   : > { %2102 = vmatprep.mubr.bf16.mxu1 %v6223_v19  ;;  %v2047_v12 = vsel %vm401_vm0, %v2046_v16, %v2034_v31  ;;  %v1977_v31 = vrot.slane %v6186_v6, %v5869_v37 }
 0x1bb   : > { %4469 = vmatpush3.bf16.msra.mxu1 %v6216_v26  ;;  %v2048_v9 = vrot.slane %v2042_v27, 6  ;;  %v6251_v27 = vld [vmem:[#allocation5 + $0x140] sm:$0xff]  }
 0x1bc   : > { %4470 = vmatprep.subr.bf16.mxu1 %v6220_v41 }
 0x1bd   : > { %v2049_v24 = vsel %vm404_vm1, %v2048_v9, %v2047_v12  ;;  %v1993_v9 = vrot.slane %v6189_v7, %v5869_v37 }
 0x1be   : > { %v6246_v39 = vpack.c.b16 %v2049_v24, %v2049_v24  ;;  %v1961_v24 = vrot.slane %v6183_v8, %v5869_v37 }
 0x1bf   : > { %4471 = vmatpush3.bf16.msra.mxu1 %v6226_v5 }
 0x1c0   : > { %4472 = vmatprep.subr.bf16.mxu1 %v6229_v10  ;;  %v6243_v10 = vld [vmem:[#allocation5 + $0x78] sm:$0xff]  }
 0x1c3   : > { %4473 = vmatpush3.bf16.msra.mxu1 %v6232_v11 }
 0x1c4   : > { %4474 = vmatprep.subr.bf16.mxu1 %v6235_v29 }
 0x1c7   : > { %4475 = vmatpush3.bf16.msra.mxu1 %v6239_v30 }
 0x1c8   : > { %4476 = vmatprep.subr.bf16.mxu1 %v6243_v10 }
 0x1cb   : > { %4477 = vmatpush3.bf16.msra.mxu1 %v6248_v25 }
 0x1cc   : > { %4508 = vmatprep.subr.bf16.mxu1 %v6251_v27 }
 0x1ce   : > { %2103 = vmatmul.mubr.bf16.vlgmr.msra.gmra.mrb[16].mxu1 %v6246_v39 }
 0x1cf   : > { %4509 = vmatpush3.bf16.msra.mxu1 %v5898_v28  ;;  %2240 = vmatprep.mubr.bf16.mxu1 %v6223_v19  ;;  %v6271_v28 = vld [vmem:[#allocation5 + $0x1c0] sm:$0xff]  }
 0x1d0   : > { %4510 = vmatprep.subr.bf16.mxu1 %v5902_v32 }
 0x1d3   : > { %4511 = vmatpush3.bf16.msra.mxu1 %v5909_v40 }
 0x1d4   : > { %4512 = vmatprep.subr.bf16.mxu1 %v5914_v42 }
 0x1d7   : > { %4513 = vmatpush3.bf16.msra.mxu1 %v5924_v46 }
 0x1d8   : > { %4514 = vmatprep.subr.bf16.mxu1 %v5928_v47  ;;  %v6290_v47 = vld [vmem:[#allocation5 + $0x3c0] sm:$0xff]  }
 0x1db   : > { %4515 = vmatpush3.bf16.msra.mxu1 %v5937_v50  ;;  %v6298_v50 = vld [vmem:[#allocation5 + $0x380] sm:$0xff]  }
 0x1dc   : > { %4516 = vmatprep.subr.bf16.mxu1 %v5941_v51  ;;  %v6301_v51 = vld [vmem:[#allocation5 + $0x3c8] sm:$0xff]  }
 0x1df   : > { %4517 = vmatpush3.bf16.msra.mxu1 %v5949_v54  ;;  %v6312_v54 = vld [vmem:[#allocation5 + $0x390] sm:$0xff]  }
 0x1e0   : > { %4518 = vmatprep.subr.bf16.mxu1 %v5953_v55  ;;  %v6315_v55 = vld [vmem:[#allocation5 + $0x3d8] sm:$0xff]  }
 0x1e3   : > { %4519 = vmatpush3.bf16.msra.mxu1 %v5960_v58  ;;  %v6327_v58 = vld [vmem:[#allocation5 + $0x3e8] sm:$0xff]  }
 0x1e4   : > { %4520 = vmatprep.subr.bf16.mxu1 %v5965_v60  ;;  %v6333_v60 = vld [vmem:[#allocation5 + $0x3f0] sm:$0xff]  }
 0x1e7   : > { %4521 = vmatpush3.bf16.msra.mxu1 %v5970_v61  ;;  %v6336_v61 = vld [vmem:[#allocation5 + $0x3b0] sm:$0xff]  }
 0x1e8   : > { %4522 = vmatprep.subr.bf16.mxu1 %v5974_v63  ;;  %v6342_v63 = vld [vmem:[#allocation5 + $0x3b8] sm:$0xff]  }
 0x1eb   : > { %4523 = vmatpush3.bf16.msra.mxu1 %v5982_v1 }
 0x1ec   : > { %4530 = vmatprep.subr.bf16.mxu1 %v6271_v28 }
 0x1ee   : > { %2241 = vmatmul.mubr.bf16.vlgmr.msra.gmra.mrb[20].mxu1 %v6246_v39 }
 0x1ef   : > { %4531 = vmatpush3.bf16.msra.mxu1 %v5905_v38 }
 0x1f0   : > { %4532 = vmatprep.subr.bf16.mxu1 %v5918_v44 }
 0x1f3   : > { %4533 = vmatpush3.bf16.msra.mxu1 %v5920_v45 }
 0x1f4   : > { %4534 = vmatprep.subr.bf16.mxu1 %v5931_v48 }
 0x1f7   : > { %4535 = vmatpush3.bf16.msra.mxu1 %v5934_v49  ;;  %v5342_v49 = vld [vmem:[%s7116_s1 + $0x10] sm:$0xff]  }
 0x1f8   : > { %4536 = vmatprep.subr.bf16.mxu1 %v5944_v52  ;;  %v6305_v52 = vld [vmem:[#allocation5 + $0x388] sm:$0xff]  }
 0x1fb   : > { %4537 = vmatpush3.bf16.msra.mxu1 %v5946_v53  ;;  %v6309_v53 = vld [vmem:[#allocation5 + $0x3d0] sm:$0xff]  }
 0x1fc   : > { %4538 = vmatprep.subr.bf16.mxu1 %v5956_v56  ;;  %v6318_v56 = vld [vmem:[#allocation5 + $0x398] sm:$0xff]  }
 0x1ff   : > { %4539 = vmatpush3.bf16.msra.mxu1 %v5958_v57  ;;  %v6321_v57 = vld [vmem:[#allocation5 + $0x3e0] sm:$0xff]  }
 0x200   : > { %4540 = vmatprep.subr.bf16.mxu1 %v5963_v59  ;;  %v6330_v59 = vld [vmem:[#allocation5 + $0x3a8] sm:$0xff]  }
 0x203   : > { %4541 = vmatpush3.bf16.msra.mxu1 %v5972_v62  ;;  %v6339_v62 = vld [vmem:[#allocation5 + $0x3f8] sm:$0xff]  }
 0x204   : > { %4542 = vmatprep.subr.bf16.mxu1 %v5977_v0 }
 0x207   : > { %4543 = vmatpush3.bf16.msra.mxu1 %v5984_v2 }
 0x208   : > { %4544 = vmatprep.subr.bf16.mxu1 %v5987_v3 }
 0x20b   : > { %4545 = vmatpush3.bf16.msra.mxu1 %v5992_v4 }
 0x20c   : > { %4576 = vmatprep.subr.bf16.mxu1 %v6061_v13  ;;  %v1981_v13 = vrot.slane %v6186_v6, %v5865_v33 }
 0x20e   : > { %v2017_v16 = vpack.c.bf16 %v1981_v13, %v1981_v13 }
 0x27e   : > { %v4408_v32 = vpop.f32.mrb[12].mxu0 }
 0x27f   : > { %v4409_v38 = vpop.f32.mrb[13].mxu0 }
 0x280   : > { %v4410_v40 = vadd.f32 %v4409_v38, %v4408_v32  ;;  %v4411_v42 = vpop.f32.mrb[14].mxu0  ;;  %v2016_v32 = vpack.c.bf16 %v1977_v31, %v1977_v31 }
 0x281   : > { %v4412_v44 = vpop.f32.mrb[15].mxu0  ;;  %v4432_v0 = vpop.f32.mrb[12].mxu1  ;;  %v2020_v42 = vpack.c.bf16 %v1993_v9, %v1993_v9  ;;  %v7306_v9 = vld [vmem:[#allocation30_spill] sm:$0xff] }
 0x282   : > { %v1483_v45 = vadd.f32 %v4410_v40, %v6122_v14  ;;  %v4433_v1 = vpop.f32.mrb[13].mxu1  ;;  %v1997_v14 = vrot.slane %v6189_v7, %v5865_v33  ;;  %v2041_v40 = vunpack.c.l.b16 %v2017_v16  ;;  %v7305_v16 = vld [vmem:[#allocation29_spill] sm:$0xff] }
 0x283   : > { %v6350_v2 = vadd.f32 %v4433_v1, %v4432_v0  ;;  %v4435_v3 = vpop.f32.mrb[14].mxu1 }
 0x284   : > { %v1488_v46 = vpack.c.bf16 %v1483_v45, %v1483_v45  ;;  %v4436_v4 = vpop.f32.mrb[15].mxu1  ;;  %v2021_v12 = vpack.c.bf16 %v1997_v14, %v1997_v14  ;;  %v2012_v45 = vpack.c.bf16 %v1961_v24, %v1961_v24  ;;  %v2058_v6 = vrot.slane %v2041_v40, 7  ;;  %v7308_v24 = vld [vmem:[#allocation32_spill] sm:$0xff]  ;;  %v7311_v40 = vld [vmem:[#allocation35_spill] sm:$0xff] }
 0x286   : > { %v1501_v48 = vand.u32 %v1488_v46, %v6054_v34  ;;  %v2045_v44 = vunpack.c.l.b16 %v2021_v12  ;;  %v2040_v46 = vunpack.c.l.b16 %v2016_v32  ;;  %v2036_v1 = vunpack.c.l.b16 %v2012_v45  ;;  %v7307_v12 = vld [vmem:[#allocation31_spill] sm:$0xff]  ;;  %v7309_v32 = vld [vmem:[#allocation33_spill] sm:$0xff] }
 0x288   : > { %5027 = vmatpush3.bf16.msra.mxu0 %v1501_v48  ;;  %v2060_v0 = vrot.slane %v2045_v44, 6  ;;  %v2054_v3 = vrot.slane %v2040_v46, 7 }
 0x289   : > { %4438 = vmatprep.subr.bf16.mxu0 %v6290_v47 }
 0x28b   : > { %5029 = vmatmul.mubr.msk.bf16.vlgmr.msra.gmra.mrb[8].mxu0 %vm1047_vm5, %v5342_v49  ;;  %v2044_v49 = vunpack.c.l.b16 %v2020_v42  ;;  %v7313_v42 = vld [vmem:[#allocation37_spill] sm:$0xff] }
 0x28c   : > { %4439 = vmatpush3.bf16.msra.mxu0 %v6298_v50  ;;  %1875 = vmatprep.mubr.bf16.mxu0 %v5892_v20  ;;  %v6324_v20 = vld [vmem:[#allocation5 + $0x3a0] sm:$0xff]  }
 0x28d   : > { %4440 = vmatprep.subr.bf16.mxu0 %v6301_v51  ;;  %v2056_v7 = vrot.slane %v2044_v49, 6 }
 0x290   : > { %4441 = vmatpush3.bf16.msra.mxu0 %v6305_v52 }
 0x291   : > { %4442 = vmatprep.subr.bf16.mxu0 %v6309_v53 }
 0x294   : > { %4443 = vmatpush3.bf16.msra.mxu0 %v6312_v54 }
 0x295   : > { %4444 = vmatprep.subr.bf16.mxu0 %v6315_v55 }
 0x298   : > { %4445 = vmatpush3.bf16.msra.mxu0 %v6318_v56 }
 0x299   : > { %4446 = vmatprep.subr.bf16.mxu0 %v6321_v57 }
 0x29c   : > { %4447 = vmatpush3.bf16.msra.mxu0 %v6324_v20 }
 0x29d   : > { %4448 = vmatprep.subr.bf16.mxu0 %v6327_v58 }
 0x2a0   : > { %4449 = vmatpush3.bf16.msra.mxu0 %v6330_v59 }
 0x2a1   : > { %4450 = vmatprep.subr.bf16.mxu0 %v6333_v60 }
 0x2a4   : > { %4451 = vmatpush3.bf16.msra.mxu0 %v6336_v61 }
 0x2a5   : > { %4452 = vmatprep.subr.bf16.mxu0 %v6339_v62 }
 0x2a8   : > { %4453 = vmatpush3.bf16.msra.mxu0 %v6342_v63 }
 0x2a9   : > { %5032 = vmatprep.subr.bf16.mxu0 %v7271_v18 }
 0x2ab   : > { %1876 = vmatmul.mubr.bf16.vlgmr.msra.gmra.mrb[16].mxu0 %v5916_v43  ;;  %v1965_v43 = vrot.slane %v6183_v8, %v5865_v33  ;;  %v2055_v8 = vsel %vm401_vm0, %v2054_v3, %v2036_v1 }
 0x2ac   : > { %5034 = vmatprep.mubr.msk.bf16.mxu0 %vm5678_vm2, %v7271_v18  ;;  %v2057_v31 = vsel %vm404_vm1, %v2056_v7, %v2055_v8 }
 0x2ad   : > { %v2013_v38 = vpack.c.bf16 %v1965_v43, %v1965_v43  ;;  %v6370_v43 = vpack.c.b16 %v2057_v31, %v2057_v31  ;;  %v5372_v31 = vld [vmem:[%s7116_s1 + $0x18] sm:$0xff]  }
 0x2af   : > { %v2037_v48 = vunpack.c.l.b16 %v2013_v38  ;;  %v7310_v38 = vld [vmem:[#allocation34_spill] sm:$0xff] }
 0x2b1   : > { %v2059_v4 = vsel %vm401_vm0, %v2058_v6, %v2037_v48 }
 0x2b2   : > { %v2061_v13 = vsel %vm404_vm1, %v2060_v0, %v2059_v4 }
 0x2b3   : > { %v6367_v14 = vpack.c.b16 %v2061_v13, %v2061_v13 }
 0x2b5   : > { %2280 = vmatprep.mubr.bf16.mxu1 %v6367_v14 }
 0x2b6   : > { %2281 = vmatmul.mubr.bf16.vlgmr.msra.gmra.mrb[24].mxu1 %v6370_v43 }
 0x2b7   : > { %4577 = vmatpush3.bf16.msra.mxu1 %v6071_v15  ;;  %2418 = vmatprep.mubr.bf16.mxu1 %v6367_v14  ;;  %v4478_v15 = vpop.f32.mrb[16].mxu1 }
 0x2b8   : > { %4578 = vmatprep.subr.bf16.mxu1 %v6073_v17  ;;  %v4479_v17 = vpop.f32.mrb[17].mxu1 }
 0x2bb   : > { %4579 = vmatpush3.bf16.msra.mxu1 %v6077_v21  ;;  %v6387_v21 = vadd.f32 %v4479_v17, %v4478_v15 }
 0x2bc   : > { %4580 = vmatprep.subr.bf16.mxu1 %v6081_v22  ;;  %v4481_v22 = vpop.f32.mrb[18].mxu1 }
 0x2bf   : > { %4581 = vmatpush3.bf16.msra.mxu1 %v6084_v23  ;;  %v4482_v23 = vpop.f32.mrb[19].mxu1 }
 0x2c0   : > { %4582 = vmatprep.subr.bf16.mxu1 %v6087_v36  ;;  %v7312_v36 = vld [vmem:[#allocation36_spill] sm:$0xff] }
 0x2c1   : > { %v4524_v44 = vpop.f32.mrb[20].mxu1 }
 0x2c2   : > { %v4525_v45 = vpop.f32.mrb[21].mxu1 }
 0x2c3   : > { %4583 = vmatpush3.bf16.msra.mxu1 %v7305_v16  ;;  %v6399_v46 = vadd.f32 %v4525_v45, %v4524_v44  ;;  %v4527_v48 = vpop.f32.mrb[22].mxu1 }
 0x2c4   : > { %4584 = vmatprep.subr.bf16.mxu1 %v7306_v9  ;;  %v4528_v6 = vpop.f32.mrb[23].mxu1 }
 0x2c7   : > { %4585 = vmatpush3.bf16.msra.mxu1 %v7307_v12 }
 0x2c8   : > { %4586 = vmatprep.subr.bf16.mxu1 %v7308_v24 }
 0x2cb   : > { %4587 = vmatpush3.bf16.msra.mxu1 %v7309_v32 }
 0x2cc   : > { %4588 = vmatprep.subr.bf16.mxu1 %v7310_v38 }
 0x2cf   : > { %4589 = vmatpush3.bf16.msra.mxu1 %v7311_v40 }
 0x2d0   : > { %4590 = vmatprep.subr.bf16.mxu1 %v7312_v36 }
 0x2d3   : > { %4591 = vmatpush3.bf16.msra.mxu1 %v7313_v42 }
 0x2d4   : > { %4622 = vmatprep.subr.bf16.mxu1 %v6290_v47  ;;  %v5407_v47 = vld [vmem:[#allocation5 + $0xc0] sm:$0xff]  }
 0x2d6   : > { %2419 = vmatmul.mubr.bf16.vlgmr.msra.gmra.mrb[28].mxu1 %v6370_v43 }
 0x2d7   : > { %4623 = vmatpush3.bf16.msra.mxu1 %v6298_v50  ;;  %2556 = vmatprep.mubr.bf16.mxu1 %v6367_v14  ;;  %v5408_v50 = vld [vmem:[#allocation5 + $0x80] sm:$0xff]  }
 0x2d8   : > { %4624 = vmatprep.subr.bf16.mxu1 %v6301_v51  ;;  %v5409_v51 = vld [vmem:[#allocation5 + $0xc8] sm:$0xff]  }
 0x2db   : > { %4625 = vmatpush3.bf16.msra.mxu1 %v6305_v52  ;;  %v5410_v52 = vld [vmem:[#allocation5 + $0x88] sm:$0xff]  }
 0x2dc   : > { %4626 = vmatprep.subr.bf16.mxu1 %v6309_v53  ;;  %v5411_v53 = vld [vmem:[#allocation5 + $0xd0] sm:$0xff]  }
 0x2df   : > { %4627 = vmatpush3.bf16.msra.mxu1 %v6312_v54  ;;  %v5412_v54 = vld [vmem:[#allocation5 + $0x90] sm:$0xff]  }
 0x2e0   : > { %4628 = vmatprep.subr.bf16.mxu1 %v6315_v55  ;;  %v5413_v55 = vld [vmem:[#allocation5 + $0xd8] sm:$0xff]  }
 0x2e3   : > { %4629 = vmatpush3.bf16.msra.mxu1 %v6318_v56  ;;  %v5414_v56 = vld [vmem:[#allocation5 + $0x98] sm:$0xff]  }
 0x2e4   : > { %4630 = vmatprep.subr.bf16.mxu1 %v6321_v57  ;;  %v5415_v57 = vld [vmem:[#allocation5 + $0xe0] sm:$0xff]  }
 0x2e7   : > { %4631 = vmatpush3.bf16.msra.mxu1 %v6324_v20  ;;  %v5416_v20 = vld [vmem:[#allocation5 + $0xa0] sm:$0xff]  }
 0x2e8   : > { %4632 = vmatprep.subr.bf16.mxu1 %v6327_v58  ;;  %v5417_v58 = vld [vmem:[#allocation5 + $0xe8] sm:$0xff]  }
 0x2eb   : > { %4633 = vmatpush3.bf16.msra.mxu1 %v6330_v59  ;;  %v5418_v59 = vld [vmem:[#allocation5 + $0xa8] sm:$0xff]  }
 0x2ec   : > { %4634 = vmatprep.subr.bf16.mxu1 %v6333_v60  ;;  %v5419_v60 = vld [vmem:[#allocation5 + $0xf0] sm:$0xff]  }
 0x2ef   : > { %4635 = vmatpush3.bf16.msra.mxu1 %v6336_v61  ;;  %v5420_v61 = vld [vmem:[#allocation5 + $0xb0] sm:$0xff]  }
 0x2f0   : > { %4636 = vmatprep.subr.bf16.mxu1 %v6339_v62  ;;  %v5421_v62 = vld [vmem:[#allocation5 + $0xf8] sm:$0xff]  }
 0x2f3   : > { %4637 = vmatpush3.bf16.msra.mxu1 %v6342_v63  ;;  %v5422_v63 = vld [vmem:[#allocation5 + $0xb8] sm:$0xff]  }
 0x2f4   : > { %4668 = vmatprep.subr.bf16.mxu1 %v5407_v47 }
 0x2f6   : > { %2557 = vmatmul.mubr.bf16.vlgmr.msra.gmra.mrb[32].mxu1 %v6370_v43 }
 0x2f7   : > { %4669 = vmatpush3.bf16.msra.mxu1 %v5408_v50 }
 0x2f8   : > { %4670 = vmatprep.subr.bf16.mxu1 %v5409_v51 }
 0x2fb   : > { %4671 = vmatpush3.bf16.msra.mxu1 %v5410_v52 }
 0x2fc   : > { %4672 = vmatprep.subr.bf16.mxu1 %v5411_v53 }
 0x2ff   : > { %4673 = vmatpush3.bf16.msra.mxu1 %v5412_v54 }
 0x300   : > { %4674 = vmatprep.subr.bf16.mxu1 %v5413_v55 }
 0x303   : > { %4675 = vmatpush3.bf16.msra.mxu1 %v5414_v56 }
 0x304   : > { %4676 = vmatprep.subr.bf16.mxu1 %v5415_v57 }
 0x307   : > { %4677 = vmatpush3.bf16.msra.mxu1 %v5416_v20 }
 0x308   : > { %4678 = vmatprep.subr.bf16.mxu1 %v5417_v58 }
 0x30b   : > { %4679 = vmatpush3.bf16.msra.mxu1 %v5418_v59 }
 0x30c   : > { %4680 = vmatprep.subr.bf16.mxu1 %v5419_v60 }
 0x30f   : > { %4681 = vmatpush3.bf16.msra.mxu1 %v5420_v61 }
 0x310   : > { %4682 = vmatprep.subr.bf16.mxu1 %v5421_v62 }
 0x313   : > { %4683 = vmatpush3.bf16.msra.mxu1 %v5422_v63 }
 0x314   : > { %4712 = vmatprep.subr.bf16.mxu1 %v6271_v28 }
 0x37e   : > { %v4454_v49 = vpop.f32.mrb[16].mxu0 }
 0x37f   : > { %v4455_v0 = vpop.f32.mrb[17].mxu0 }
 0x380   : > { %v4456_v1 = vadd.f32 %v4455_v0, %v4454_v49  ;;  %v4457_v3 = vpop.f32.mrb[18].mxu0 }
 0x381   : > { %v4458_v4 = vpop.f32.mrb[19].mxu0 }
 0x382   : > { %v1878_v7 = vadd.f32 %v4456_v1, %v6350_v2 }
 0x384   : > { %v1883_v13 = vpack.c.bf16 %v1878_v7, %v1878_v7 }
 0x386   : > { %v1896_v8 = vand.u32 %v1883_v13, %v6054_v34 }
 0x388   : > { %5033 = vmatpush3.bf16.msra.mxu0 %v1896_v8 }
 0x389   : > { %4484 = vmatprep.subr.bf16.mxu0 %v5407_v47  ;;  %v4546_v28 = vpop.f32.mrb[24].mxu1  ;;  %v5374_v47 = vld [vmem:[%s7116_s1 + $0x28] sm:$0xff]  }
 0x38a   : > { %v4547_v2 = vpop.f32.mrb[25].mxu1 }
 0x38b   : > { %5035 = vmatmul.mubr.msk.bf16.vlgmr.msra.gmra.mrb[8].mxu0 %vm1047_vm5, %v5372_v31  ;;  %v4549_v16 = vpop.f32.mrb[26].mxu1 }
 0x38c   : > { %4485 = vmatpush3.bf16.msra.mxu0 %v5408_v50  ;;  %2142 = vmatprep.mubr.bf16.mxu0 %v6367_v14  ;;  %v4548_v14 = vadd.f32 %v4547_v2, %v4546_v28  ;;  %v4550_v9 = vpop.f32.mrb[27].mxu1  ;;  %v7315_v50 = vld [vmem:[#allocation14_spill] sm:$0xff] }
 0x38d   : > { %4486 = vmatprep.subr.bf16.mxu0 %v5409_v51  ;;  %v7316_v51 = vld [vmem:[#allocation15_spill] sm:$0xff]  ;;  %v5375_v9 = vld [vmem:[%s7116_s1 + $0x30] sm:$0xff]  }
 0x38e   : > { %v2283_v12 = vadd.f32 %v4548_v14, %v6399_v46  ;;  %v5373_v46 = vld [vmem:[%s7116_s1 + $0x20] sm:$0xff]  }
 0x390   : > { %4487 = vmatpush3.bf16.msra.mxu0 %v5410_v52  ;;  %v2288_v45 = vpack.c.bf16 %v2283_v12, %v2283_v12  ;;  %v7317_v52 = vld [vmem:[#allocation16_spill] sm:$0xff]  ;;  %v7330_v12 = vld [vmem:[#allocation38_spill] sm:$0xff] }
 0x391   : > { %4488 = vmatprep.subr.bf16.mxu0 %v5411_v53  ;;  %v7318_v53 = vld [vmem:[#allocation17_spill] sm:$0xff] }
 0x392   : > { %v2301_v6 = vand.u32 %v2288_v45, %v6054_v34  ;;  %v7344_v45 = vld [vmem:[#allocation52_spill] sm:$0xff] }
 0x394   : > { %4489 = vmatpush3.bf16.msra.mxu0 %v5412_v54  ;;  %v7319_v54 = vld [vmem:[#allocation18_spill] sm:$0xff] }
 0x395   : > { %4490 = vmatprep.subr.bf16.mxu0 %v5413_v55  ;;  %v7320_v55 = vld [vmem:[#allocation19_spill] sm:$0xff] }
 0x398   : > { %4491 = vmatpush3.bf16.msra.mxu0 %v5414_v56  ;;  %v7321_v56 = vld [vmem:[#allocation20_spill] sm:$0xff] }
 0x399   : > { %4492 = vmatprep.subr.bf16.mxu0 %v5415_v57  ;;  %v7322_v57 = vld [vmem:[#allocation21_spill] sm:$0xff] }
 0x39c   : > { %4493 = vmatpush3.bf16.msra.mxu0 %v5416_v20  ;;  %v7323_v20 = vld [vmem:[#allocation22_spill] sm:$0xff] }
 0x39d   : > { %4494 = vmatprep.subr.bf16.mxu0 %v5417_v58  ;;  %v7324_v58 = vld [vmem:[#allocation23_spill] sm:$0xff] }
 0x3a0   : > { %4495 = vmatpush3.bf16.msra.mxu0 %v5418_v59  ;;  %v7325_v59 = vld [vmem:[#allocation24_spill] sm:$0xff] }
 0x3a1   : > { %4496 = vmatprep.subr.bf16.mxu0 %v5419_v60  ;;  %v7326_v60 = vld [vmem:[#allocation25_spill] sm:$0xff] }
 0x3a4   : > { %4497 = vmatpush3.bf16.msra.mxu0 %v5420_v61  ;;  %v7327_v61 = vld [vmem:[#allocation26_spill] sm:$0xff] }
 0x3a5   : > { %4498 = vmatprep.subr.bf16.mxu0 %v5421_v62  ;;  %v7328_v62 = vld [vmem:[#allocation27_spill] sm:$0xff] }
 0x3a8   : > { %4499 = vmatpush3.bf16.msra.mxu0 %v5422_v63  ;;  %v7329_v63 = vld [vmem:[#allocation28_spill] sm:$0xff] }
 0x3a9   : > { %5038 = vmatprep.subr.bf16.mxu0 %v7271_v18  ;;  %v4592_v24 = vpop.f32.mrb[28].mxu1 }
 0x3aa   : > { %v4593_v15 = vpop.f32.mrb[29].mxu1 }
 0x3ab   : > { %2143 = vmatmul.mubr.bf16.vlgmr.msra.gmra.mrb[20].mxu0 %v6370_v43  ;;  %v4594_v32 = vadd.f32 %v4593_v15, %v4592_v24  ;;  %v4595_v17 = vpop.f32.mrb[30].mxu1  ;;  %v7331_v24 = vld [vmem:[#allocation39_spill] sm:$0xff]  ;;  %v7332_v15 = vld [vmem:[#allocation40_spill] sm:$0xff] }
 0x3ac   : > { %5040 = vmatprep.mubr.msk.bf16.mxu0 %vm5678_vm2, %v7271_v18  ;;  %v4596_v38 = vpop.f32.mrb[31].mxu1  ;;  %v7333_v17 = vld [vmem:[#allocation41_spill] sm:$0xff] }
 0x3ad   : > { %v7335_v38 = vld [vmem:[#allocation43_spill] sm:$0xff] }
 0x3c9   : > { %v4638_v49 = vpop.f32.mrb[32].mxu1 }
 0x3ca   : > { %v4639_v0 = vpop.f32.mrb[33].mxu1 }
 0x3cb   : > { %v6461_v1 = vadd.f32 %v4639_v0, %v4638_v49  ;;  %v4641_v3 = vpop.f32.mrb[34].mxu1 }
 0x3cc   : > { %v4642_v4 = vpop.f32.mrb[35].mxu1 }
 0x47e   : > { %v4500_v22 = vpop.f32.mrb[20].mxu0 }
 0x47f   : > { %v4501_v23 = vpop.f32.mrb[21].mxu0 }
 0x480   : > { %v4502_v40 = vadd.f32 %v4501_v23, %v4500_v22  ;;  %v4503_v36 = vpop.f32.mrb[22].mxu0  ;;  %v7336_v22 = vld [vmem:[#allocation44_spill] sm:$0xff]  ;;  %v7337_v23 = vld [vmem:[#allocation45_spill] sm:$0xff] }
 0x481   : > { %v4504_v43 = vpop.f32.mrb[23].mxu0  ;;  %v7339_v36 = vld [vmem:[#allocation47_spill] sm:$0xff] }
 0x482   : > { %v2145_v42 = vadd.f32 %v4502_v40, %v6387_v21  ;;  %v7314_v21 = vld [vmem:[#allocation13_spill] sm:$0xff]  ;;  %v7338_v40 = vld [vmem:[#allocation46_spill] sm:$0xff] }
 0x483   : > { %v7341_v43 = vld [vmem:[#allocation49_spill] sm:$0xff] }
 0x484   : > { %v2150_v44 = vpack.c.bf16 %v2145_v42, %v2145_v42  ;;  %v7342_v42 = vld [vmem:[#allocation50_spill] sm:$0xff] }
 0x486   : > { %v2163_v48 = vand.u32 %v2150_v44, %v6054_v34  ;;  %v7343_v44 = vld [vmem:[#allocation51_spill] sm:$0xff] }
 0x488   : > { %5039 = vmatpush3.bf16.msra.mxu0 %v2163_v48  ;;  %v7345_v48 = vld [vmem:[#allocation53_spill] sm:$0xff] }
 0x489   : > { %5044 = vmatprep.subr.bf16.mxu0 %v7271_v18 }
 0x48b   : > { %5041 = vmatmul.mubr.msk.bf16.vlgmr.msra.gmra.mrb[8].mxu0 %vm1047_vm5, %v5373_v46  ;;  %v4255_v46 = vld [vmem:[%s5853_s20 + $0x12] ss:$4 sm:$0xf] }
 0x48c   : > { %5045 = vmatpush3.bf16.msra.mxu0 %v2301_v6  ;;  %5046 = vmatprep.mubr.msk.bf16.mxu0 %vm5678_vm2, %v7271_v18  ;;  %v4256_v6 = vld [vmem:[%s5853_s20 + $0x22] ss:$4 sm:$0xf] }
 0x48d   : > { %4554 = vmatprep.subr.bf16.mxu0 %v7314_v21  ;;  %v2662_v21 = vrot.slane %v4255_v46, %v5865_v33 }
 0x497   : > { %5047 = vmatmul.mubr.msk.bf16.vlgmr.msra.gmra.mrb[8].mxu0 %vm1047_vm5, %v5374_v47  ;;  %v4254_v47 = vld [vmem:[%s5853_s20 + $0x2] ss:$4 sm:$0xf] }
 0x498   : > { %4555 = vmatpush3.bf16.msra.mxu0 %v7315_v50  ;;  %2378 = vmatprep.mubr.bf16.mxu0 %v6223_v19  ;;  %v2678_v50 = vrot.slane %v4256_v6, %v5865_v33 }
 0x499   : > { %4556 = vmatprep.subr.bf16.mxu0 %v7316_v51  ;;  %v2658_v51 = vrot.slane %v4255_v46, %v5869_v37 }
 0x49c   : > { %4557 = vmatpush3.bf16.msra.mxu0 %v7317_v52  ;;  %v2646_v52 = vrot.slane %v4254_v47, %v5865_v33 }
 0x49d   : > { %4558 = vmatprep.subr.bf16.mxu0 %v7318_v53  ;;  %v2698_v53 = vpack.c.bf16 %v2662_v21, %v2662_v21  ;;  %v2666_v21 = vrot.slane %v4256_v6, %v5867_v35 }
 0x4a0   : > { %4559 = vmatpush3.bf16.msra.mxu0 %v7319_v54  ;;  %v2674_v54 = vrot.slane %v4256_v6, %v5869_v37 }
 0x4a1   : > { %4560 = vmatprep.subr.bf16.mxu0 %v7320_v55  ;;  %v2702_v55 = vpack.c.bf16 %v2678_v50, %v2678_v50 }
 0x4a4   : > { %4561 = vmatpush3.bf16.msra.mxu0 %v7321_v56  ;;  %v2697_v56 = vpack.c.bf16 %v2658_v51, %v2658_v51 }
 0x4a5   : > { %4562 = vmatprep.subr.bf16.mxu0 %v7322_v57  ;;  %v2694_v57 = vpack.c.bf16 %v2646_v52, %v2646_v52  ;;  %v2699_v52 = vpack.c.bf16 %v2666_v21, %v2666_v21 }
 0x4a8   : > { %4563 = vmatpush3.bf16.msra.mxu0 %v7323_v20  ;;  %v2722_v20 = vunpack.c.l.b16 %v2698_v53  ;;  %v6511_v53 = vld [vmem:[#allocation5 + $0x180] sm:$0xff]  }
 0x4a9   : > { %4564 = vmatprep.subr.bf16.mxu0 %v7324_v58  ;;  %v2701_v58 = vpack.c.bf16 %v2674_v54, %v2674_v54 }
 0x4ab   : > { %v2725_v49 = vunpack.c.l.b16 %v2701_v58 }
 0x4ac   : > { %4565 = vmatpush3.bf16.msra.mxu0 %v7325_v59  ;;  %v2726_v59 = vunpack.c.l.b16 %v2702_v55 }
 0x4ad   : > { %4566 = vmatprep.subr.bf16.mxu0 %v7326_v60 }
 0x4ae   : > { %v2741_v0 = vrot.slane %v2726_v59, 6  ;;  %v6519_v59 = vld [vmem:[#allocation5 + $0x188] sm:$0xff]  }
 0x4b0   : > { %4567 = vmatpush3.bf16.msra.mxu0 %v7327_v61  ;;  %v2721_v61 = vunpack.c.l.b16 %v2697_v56  ;;  %v6515_v56 = vld [vmem:[#allocation5 + $0x1c8] sm:$0xff]  }
 0x4b1   : > { %4568 = vmatprep.subr.bf16.mxu0 %v7328_v62  ;;  %v2718_v62 = vunpack.c.l.b16 %v2694_v57 }
 0x4b2   : > { %v2735_v4 = vrot.slane %v2721_v61, 7  ;;  %v6525_v61 = vld [vmem:[#allocation5 + $0x1d0] sm:$0xff]  }
 0x4b4   : > { %4569 = vmatpush3.bf16.msra.mxu0 %v7329_v63  ;;  %v2739_v63 = vrot.slane %v2722_v20, 7 }
 0x4b5   : > { %5050 = vmatprep.subr.bf16.mxu0 %v7271_v18 }
 0x4b7   : > { %2379 = vmatmul.mubr.bf16.vlgmr.msra.gmra.mrb[24].mxu0 %v6246_v39 }
 0x4b8   : > { %5052 = vmatprep.mubr.msk.bf16.mxu0 %vm5678_vm2, %v7271_v18 }
 0x58a   : > { %v4570_v7 = vpop.f32.mrb[24].mxu0 }
 0x58b   : > { %v4571_v13 = vpop.f32.mrb[25].mxu0 }
 0x58c   : > { %v4572_v8 = vadd.f32 %v4571_v13, %v4570_v7  ;;  %v4573_v31 = vpop.f32.mrb[26].mxu0  ;;  %v2740_v7 = vsel %vm401_vm0, %v2739_v63, %v2718_v62  ;;  %v2737_v13 = vrot.slane %v2725_v49, 6  ;;  %v7346_v62 = vld [vmem:[#allocation11_spill] sm:$0xff]  ;;  %v6529_v49 = vld [vmem:[#allocation5 + $0x190] sm:$0xff]  }
 0x58d   : > { %v4574_v28 = vpop.f32.mrb[27].mxu0  ;;  %v2654_v63 = vrot.slane %v4255_v46, %v7346_v62 }
 0x58e   : > { %v2421_v2 = vadd.f32 %v4594_v32, %v4572_v8  ;;  %v7334_v32 = vld [vmem:[#allocation42_spill] sm:$0xff]  ;;  %v2742_v8 = vsel %vm404_vm1, %v2741_v0, %v2740_v7  ;;  %v2634_v28 = vrot.slane %v4254_v47, %v5867_v35 }
 0x58f   : > { %v6532_v0 = vld [vmem:[#allocation5 + $0x1d8] sm:$0xff]   ;;  %v2696_v7 = vpack.c.bf16 %v2654_v63, %v2654_v63 }
 0x590   : > { %v2426_v14 = vpack.c.bf16 %v2421_v2, %v2421_v2  ;;  %v6502_v2 = vpack.c.b16 %v2742_v8, %v2742_v8  ;;  %v2691_v50 = vpack.c.bf16 %v2634_v28, %v2634_v28  ;;  %v6540_v8 = vld [vmem:[#allocation5 + $0x1e0] sm:$0xff]  }
 0x591   : > { %v2720_v28 = vunpack.c.l.b16 %v2696_v7  ;;  %v6579_v7 = vld [vmem:[#allocation5 + $0x208] sm:$0xff]  }
 0x592   : > { %v2439_v16 = vand.u32 %v2426_v14, %v6054_v34  ;;  %2823 = vmatprep.mubr.bf16.mxu1 %v6502_v2  ;;  %v2715_v54 = vunpack.c.l.b16 %v2691_v50  ;;  %v6549_v50 = vld [vmem:[#allocation5 + $0x1a8] sm:$0xff]   ;;  %7350 = vst [vmem:[#allocation32_spill] sm:$0xff] %v6579_v7 }
 0x593   : > { %v2731_v21 = vrot.slane %v2720_v28, 7  ;;  %v6588_v28 = vld [vmem:[#allocation5 + $0x258] sm:$0xff]  }
 0x594   : > { %5051 = vmatpush3.bf16.msra.mxu0 %v2439_v16  ;;  %v2650_v16 = vrot.slane %v4255_v46, %v5867_v35  ;;  %7353 = vst [vmem:[#allocation35_spill] sm:$0xff] %v6588_v28 }
 0x595   : > { %4600 = vmatprep.subr.bf16.mxu0 %v7330_v12 }
 0x596   : > { %v2695_v51 = vpack.c.bf16 %v2650_v16, %v2650_v16  ;;  %v6546_v16 = vld [vmem:[#allocation5 + $0x1e8] sm:$0xff]  }
 0x597   : > { %5053 = vmatmul.mubr.msk.bf16.vlgmr.msra.gmra.mrb[8].mxu0 %vm1047_vm5, %v5375_v9 }
 0x598   : > { %4601 = vmatpush3.bf16.msra.mxu0 %v7331_v24  ;;  %2516 = vmatprep.mubr.bf16.mxu0 %v6223_v19  ;;  %v7340_v19 = vld [vmem:[#allocation48_spill] sm:$0xff]  ;;  %v2719_v55 = vunpack.c.l.b16 %v2695_v51  ;;  %v6552_v51 = vld [vmem:[#allocation5 + $0x1f0] sm:$0xff]  }
 0x599   : > { %4602 = vmatprep.subr.bf16.mxu0 %v7332_v15 }
 0x59a   : > { %v2727_v57 = vrot.slane %v2719_v55, 7  ;;  %v6556_v55 = vld [vmem:[#allocation5 + $0x1b0] sm:$0xff]  }
 0x59c   : > { %4603 = vmatpush3.bf16.msra.mxu0 %v7333_v17  ;;  %v2728_v58 = vsel %vm401_vm0, %v2727_v57, %v2715_v54 }
 0x59d   : > { %4604 = vmatprep.subr.bf16.mxu0 %v7334_v32 }
 0x5a0   : > { %4605 = vmatpush3.bf16.msra.mxu0 %v7335_v38 }
 0x5a1   : > { %4606 = vmatprep.subr.bf16.mxu0 %v7336_v22 }
 0x5a4   : > { %4607 = vmatpush3.bf16.msra.mxu0 %v7337_v23 }
 0x5a5   : > { %4608 = vmatprep.subr.bf16.mxu0 %v7338_v40 }
 0x5a8   : > { %4609 = vmatpush3.bf16.msra.mxu0 %v7339_v36 }
 0x5a9   : > { %4610 = vmatprep.subr.bf16.mxu0 %v7340_v19 }
 0x5ac   : > { %4611 = vmatpush3.bf16.msra.mxu0 %v7341_v43 }
 0x5ad   : > { %4612 = vmatprep.subr.bf16.mxu0 %v7342_v42 }
 0x5b0   : > { %4613 = vmatpush3.bf16.msra.mxu0 %v7343_v44 }
 0x5b1   : > { %4614 = vmatprep.subr.bf16.mxu0 %v7344_v45 }
 0x5b4   : > { %4615 = vmatpush3.bf16.msra.mxu0 %v7345_v48 }
 0x5b5   : > { %5056 = vmatprep.subr.bf16.mxu0 %v7271_v18 }
 0x5b7   : > { %2517 = vmatmul.mubr.bf16.vlgmr.msra.gmra.mrb[28].mxu0 %v6246_v39  ;;  %v2642_v39 = vrot.slane %v4254_v47, %v5869_v37 }
 0x5b8   : > { %5058 = vmatprep.mubr.msk.bf16.mxu0 %vm5678_vm2, %v7271_v18 }
 0x5b9   : > { %v2693_v60 = vpack.c.bf16 %v2642_v39, %v2642_v39  ;;  %v2723_v39 = vunpack.c.l.b16 %v2699_v52 }
 0x5bb   : > { %v2717_v3 = vunpack.c.l.b16 %v2693_v60  ;;  %v2729_v20 = vrot.slane %v2723_v39, 6  ;;  %v6559_v39 = vld [vmem:[#allocation5 + $0x1f8] sm:$0xff]  }
 0x5bd   : > { %v2736_v31 = vsel %vm401_vm0, %v2735_v4, %v2717_v3  ;;  %v6523_v60 = vsel %vm404_vm1, %v2729_v20, %v2728_v58  ;;  %v2670_v3 = vrot.slane %v4256_v6, %v7346_v62  ;;  %v2638_v4 = vrot.slane %v4254_v47, %v7346_v62  ;;  %v6563_v20 = vld [vmem:[#allocation5 + $0x1b8] sm:$0xff]   ;;  %v6566_v58 = vld [vmem:[#allocation5 + $0x240] sm:$0xff]  }
 0x5be   : > { %v2738_v14 = vsel %vm404_vm1, %v2737_v13, %v2736_v31  ;;  %v6537_v13 = vld [vmem:[#allocation5 + $0x198] sm:$0xff]   ;;  %7347 = vst [vmem:[#allocation29_spill] sm:$0xff] %v6566_v58 }
 0x5bf   : > { %v6506_v9 = vpack.c.b16 %v2738_v14, %v2738_v14  ;;  %v2700_v46 = vpack.c.bf16 %v2670_v3, %v2670_v3  ;;  %v2692_v31 = vpack.c.bf16 %v2638_v4, %v2638_v4  ;;  %v6543_v14 = vld [vmem:[#allocation5 + $0x1a0] sm:$0xff]   ;;  %v6576_v4 = vld [vmem:[#allocation5 + $0x248] sm:$0xff]  }
 0x5c0   : > { %v6572_v3 = vld [vmem:[#allocation5 + $0x200] sm:$0xff]   ;;  %7349 = vst [vmem:[#allocation31_spill] sm:$0xff] %v6576_v4 }
 0x5c1   : > { %2824 = vmatmul.mubr.bf16.vlgmr.msra.gmra.mrb[36].mxu1 %v6506_v9  ;;  %v2724_v6 = vunpack.c.l.b16 %v2700_v46  ;;  %v2716_v47 = vunpack.c.l.b16 %v2692_v31  ;;  %7348 = vst [vmem:[#allocation30_spill] sm:$0xff] %v6572_v3  ;;  %v6582_v46 = vld [vmem:[#allocation5 + $0x250] sm:$0xff]  }
 0x5c2   : > { %4713 = vmatpush3.bf16.msra.mxu1 %v6511_v53  ;;  %2904 = vmatprep.mubr.bf16.mxu1 %v6502_v2  ;;  %7351 = vst [vmem:[#allocation33_spill] sm:$0xff] %v6582_v46  ;;  %v6585_v31 = vld [vmem:[#allocation5 + $0x210] sm:$0xff]  }
 0x5c3   : > { %4714 = vmatprep.subr.bf16.mxu1 %v6515_v56  ;;  %v2733_v52 = vrot.slane %v2724_v6, 6  ;;  %v2732_v54 = vsel %vm401_vm0, %v2731_v21, %v2716_v47  ;;  %7352 = vst [vmem:[#allocation34_spill] sm:$0xff] %v6585_v31  ;;  %v6591_v6 = vld [vmem:[#allocation5 + $0x218] sm:$0xff]   ;;  %v6594_v47 = vld [vmem:[#allocation5 + $0x260] sm:$0xff]  }
 0x5c4   : > { %7354 = vst [vmem:[#allocation36_spill] sm:$0xff] %v6591_v6  ;;  %7355 = vst [vmem:[#allocation37_spill] sm:$0xff] %v6594_v47  ;;  %v6597_v21 = vld [vmem:[#allocation5 + $0x220] sm:$0xff]  }
 0x5c5   : > { %v2734_v57 = vsel %vm404_vm1, %v2733_v52, %v2732_v54  ;;  %7356 = vst [vmem:[#allocation13_spill] sm:$0xff] %v6597_v21  ;;  %v6600_v52 = vld [vmem:[#allocation5 + $0x268] sm:$0xff]  }
 0x5c6   : > { %4715 = vmatpush3.bf16.msra.mxu1 %v6519_v59  ;;  %v6569_v63 = vpack.c.b16 %v2734_v57, %v2734_v57  ;;  %7357 = vst [vmem:[#allocation14_spill] sm:$0xff] %v6600_v52  ;;  %v6603_v54 = vld [vmem:[#allocation5 + $0x228] sm:$0xff]   ;;  %v6606_v57 = vld [vmem:[#allocation5 + $0x270] sm:$0xff]  }
 0x5c7   : > { %4716 = vmatprep.subr.bf16.mxu1 %v6525_v61  ;;  %7358 = vst [vmem:[#allocation15_spill] sm:$0xff] %v6603_v54  ;;  %7359 = vst [vmem:[#allocation16_spill] sm:$0xff] %v6606_v57 }
 0x5ca   : > { %4717 = vmatpush3.bf16.msra.mxu1 %v6529_v49 }
 0x5cb   : > { %4718 = vmatprep.subr.bf16.mxu1 %v6532_v0 }
 0x5ce   : > { %4719 = vmatpush3.bf16.msra.mxu1 %v6537_v13 }
 0x5cf   : > { %4720 = vmatprep.subr.bf16.mxu1 %v6540_v8 }
 0x5d2   : > { %4721 = vmatpush3.bf16.msra.mxu1 %v6543_v14 }
 0x5d3   : > { %4722 = vmatprep.subr.bf16.mxu1 %v6546_v16 }
 0x5d6   : > { %4723 = vmatpush3.bf16.msra.mxu1 %v6549_v50 }
 0x5d7   : > { %4724 = vmatprep.subr.bf16.mxu1 %v6552_v51 }
 0x5da   : > { %4725 = vmatpush3.bf16.msra.mxu1 %v6556_v55 }
 0x5db   : > { %4726 = vmatprep.subr.bf16.mxu1 %v6559_v39 }
 0x5de   : > { %4727 = vmatpush3.bf16.msra.mxu1 %v6563_v20 }
 0x5df   : > { %4738 = vmatprep.subr.bf16.mxu1 %v6566_v58 }
 0x5e1   : > { %2905 = vmatmul.mubr.bf16.vlgmr.msra.gmra.mrb[40].mxu1 %v6506_v9 }
 0x5e2   : > { %4739 = vmatpush3.bf16.msra.mxu1 %v6572_v3  ;;  %3033 = vmatprep.mubr.bf16.mxu1 %v6569_v63 }
 0x5e3   : > { %4740 = vmatprep.subr.bf16.mxu1 %v6576_v4 }
 0x5e6   : > { %4741 = vmatpush3.bf16.msra.mxu1 %v6579_v7 }
 0x5e7   : > { %4742 = vmatprep.subr.bf16.mxu1 %v6582_v46 }
 0x5ea   : > { %4743 = vmatpush3.bf16.msra.mxu1 %v6585_v31 }
 0x5eb   : > { %4744 = vmatprep.subr.bf16.mxu1 %v6588_v28 }
 0x5ee   : > { %4745 = vmatpush3.bf16.msra.mxu1 %v6591_v6  ;;  %v6609_v6 = vld [vmem:[#allocation5 + $0x230] sm:$0xff]  }
 0x5ef   : > { %4746 = vmatprep.subr.bf16.mxu1 %v6594_v47  ;;  %7360 = vst [vmem:[#allocation17_spill] sm:$0xff] %v6609_v6  ;;  %v6612_v47 = vld [vmem:[#allocation5 + $0x278] sm:$0xff]  }
 0x5f0   : > { %7361 = vst [vmem:[#allocation18_spill] sm:$0xff] %v6612_v47 }
 0x5f2   : > { %4747 = vmatpush3.bf16.msra.mxu1 %v6597_v21  ;;  %v6615_v21 = vld [vmem:[#allocation5 + $0x238] sm:$0xff]  }
 0x5f3   : > { %4748 = vmatprep.subr.bf16.mxu1 %v6600_v52  ;;  %7362 = vst [vmem:[#allocation19_spill] sm:$0xff] %v6615_v21  ;;  %v6620_v52 = vpack.c.b16 %v6523_v60, %v6523_v60  ;;  %v6714_v60 = vld [vmem:[#allocation5 + $0x168] sm:$0xff]  }
 0x5f6   : > { %4749 = vmatpush3.bf16.msra.mxu1 %v6603_v54 }
 0x5f7   : > { %4750 = vmatprep.subr.bf16.mxu1 %v6606_v57 }
 0x5fa   : > { %4751 = vmatpush3.bf16.msra.mxu1 %v6609_v6 }
 0x5fb   : > { %4752 = vmatprep.subr.bf16.mxu1 %v6612_v47 }
 0x5fe   : > { %4753 = vmatpush3.bf16.msra.mxu1 %v6615_v21 }
 0x5ff   : > { %4784 = vmatprep.subr.bf16.mxu1 %v7330_v12 }
 0x601   : > { %3034 = vmatmul.mubr.bf16.vlgmr.msra.gmra.mrb[44].mxu1 %v6620_v52 }
 0x602   : > { %4785 = vmatpush3.bf16.msra.mxu1 %v7331_v24  ;;  %3160 = vmatprep.mubr.bf16.mxu1 %v6569_v63 }
 0x603   : > { %4786 = vmatprep.subr.bf16.mxu1 %v7332_v15 }
 0x606   : > { %4787 = vmatpush3.bf16.msra.mxu1 %v7333_v17 }
 0x607   : > { %4788 = vmatprep.subr.bf16.mxu1 %v7334_v32 }
 0x60a   : > { %4789 = vmatpush3.bf16.msra.mxu1 %v7335_v38 }
 0x60b   : > { %4790 = vmatprep.subr.bf16.mxu1 %v7336_v22 }
 0x60e   : > { %4791 = vmatpush3.bf16.msra.mxu1 %v7337_v23 }
 0x60f   : > { %4792 = vmatprep.subr.bf16.mxu1 %v7338_v40  ;;  %v6645_v40 = vld [vmem:[%s7116_s1 + $0x38] sm:$0xff]  }
 0x610   : > { %7363 = vst [vmem:[#allocation20_spill] sm:$0xff] %v6645_v40 }
 0x612   : > { %4793 = vmatpush3.bf16.msra.mxu1 %v7339_v36  ;;  %v7364_v36 = vld [vmem:[#allocation54_spill] sm:$0xff] }
 0x613   : > { %4794 = vmatprep.subr.bf16.mxu1 %v7340_v19  ;;  %v7366_v19 = vld [vmem:[#allocation56_spill] sm:$0xff] }
 0x616   : > { %4795 = vmatpush3.bf16.msra.mxu1 %v7341_v43  ;;  %v7367_v43 = vld [vmem:[#allocation57_spill] sm:$0xff] }
 0x617   : > { %4796 = vmatprep.subr.bf16.mxu1 %v7342_v42  ;;  %v7368_v42 = vld [vmem:[#allocation58_spill] sm:$0xff] }
 0x61a   : > { %4797 = vmatpush3.bf16.msra.mxu1 %v7343_v44  ;;  %v7369_v44 = vld [vmem:[#allocation59_spill] sm:$0xff] }
 0x61b   : > { %4798 = vmatprep.subr.bf16.mxu1 %v7344_v45  ;;  %v7370_v45 = vld [vmem:[#allocation60_spill] sm:$0xff] }
 0x61e   : > { %4799 = vmatpush3.bf16.msra.mxu1 %v7345_v48  ;;  %v7371_v48 = vld [vmem:[#allocation61_spill] sm:$0xff] }
 0x61f   : > { %4830 = vmatprep.subr.bf16.mxu1 %v7364_v36 }
 0x621   : > { %3161 = vmatmul.mubr.bf16.vlgmr.msra.gmra.mrb[48].mxu1 %v6620_v52 }
 0x68a   : > { %v4616_v12 = vpop.f32.mrb[28].mxu0 }
 0x68b   : > { %v4617_v24 = vpop.f32.mrb[29].mxu0 }
 0x68c   : > { %v4618_v15 = vadd.f32 %v4617_v24, %v4616_v12  ;;  %v4619_v17 = vpop.f32.mrb[30].mxu0  ;;  %v6720_v12 = vld [vmem:[#allocation5 + $0x170] sm:$0xff]  }
 0x68d   : > { %v4620_v32 = vpop.f32.mrb[31].mxu0  ;;  %v6723_v24 = vld [vmem:[#allocation5 + $0x130] sm:$0xff]   ;;  %v6729_v17 = vld [vmem:[#allocation5 + $0x138] sm:$0xff]  }
 0x68e   : > { %v2559_v38 = vadd.f32 %v6461_v1, %v4618_v15  ;;  %v7365_v1 = vld [vmem:[#allocation55_spill] sm:$0xff]  ;;  %v6726_v15 = vld [vmem:[#allocation5 + $0x178] sm:$0xff]  }
 0x68f   : > { %4831 = vmatpush3.bf16.msra.mxu1 %v7365_v1 }
 0x690   : > { %v2564_v22 = vpack.c.bf16 %v2559_v38, %v2559_v38  ;;  %4832 = vmatprep.subr.bf16.mxu1 %v7366_v19 }
 0x692   : > { %v2577_v23 = vand.u32 %v2564_v22, %v6054_v34 }
 0x693   : > { %4833 = vmatpush3.bf16.msra.mxu1 %v7367_v43 }
 0x694   : > { %5057 = vmatpush3.bf16.msra.mxu0 %v2577_v23  ;;  %4834 = vmatprep.subr.bf16.mxu1 %v7368_v42  ;;  %v4684_v32 = vpop.f32.mrb[36].mxu1 }
 0x695   : > { %4646 = vmatprep.subr.bf16.mxu0 %v7364_v36  ;;  %v4685_v38 = vpop.f32.mrb[37].mxu1 }
 0x696   : > { %v4686_v22 = vadd.f32 %v4685_v38, %v4684_v32  ;;  %v4687_v23 = vpop.f32.mrb[38].mxu1 }
 0x697   : > { %5059 = vmatmul.mubr.msk.bf16.vlgmr.msra.gmra.mrb[8].mxu0 %vm1047_vm5, %v6645_v40  ;;  %4835 = vmatpush3.bf16.msra.mxu1 %v7369_v44  ;;  %v4688_v36 = vpop.f32.mrb[39].mxu1 }
 0x698   : > { %4647 = vmatpush3.bf16.msra.mxu0 %v7365_v1  ;;  %2783 = vmatprep.mubr.bf16.mxu0 %v6569_v63 }
 0x699   : > { %4648 = vmatprep.subr.bf16.mxu0 %v7366_v19  ;;  %4836 = vmatprep.subr.bf16.mxu1 %v7370_v45 }
 0x69b   : > { %4837 = vmatpush3.bf16.msra.mxu1 %v6216_v26 }
 0x69c   : > { %4649 = vmatpush3.bf16.msra.mxu0 %v7367_v43  ;;  %4838 = vmatprep.subr.bf16.mxu1 %v6220_v41 }
 0x69d   : > { %4650 = vmatprep.subr.bf16.mxu0 %v7368_v42 }
 0x69f   : > { %4839 = vmatpush3.bf16.msra.mxu1 %v6226_v5 }
 0x6a0   : > { %4651 = vmatpush3.bf16.msra.mxu0 %v7369_v44  ;;  %4840 = vmatprep.subr.bf16.mxu1 %v7371_v48 }
 0x6a1   : > { %4652 = vmatprep.subr.bf16.mxu0 %v7370_v45 }
 0x6a3   : > { %4841 = vmatpush3.bf16.msra.mxu1 %v6232_v11 }
 0x6a4   : > { %4653 = vmatpush3.bf16.msra.mxu0 %v6216_v26  ;;  %4842 = vmatprep.subr.bf16.mxu1 %v6235_v29  ;;  %v6690_v26 = vld [vmem:[#allocation5 + $0x148] sm:$0xff]  }
 0x6a5   : > { %4654 = vmatprep.subr.bf16.mxu0 %v6220_v41  ;;  %v6686_v41 = vld [vmem:[#allocation5 + $0x100] sm:$0xff]  }
 0x6a7   : > { %4843 = vmatpush3.bf16.msra.mxu1 %v6239_v30 }
 0x6a8   : > { %4655 = vmatpush3.bf16.msra.mxu0 %v6226_v5  ;;  %4844 = vmatprep.subr.bf16.mxu1 %v6243_v10  ;;  %v6693_v5 = vld [vmem:[#allocation5 + $0x108] sm:$0xff]  }
 0x6a9   : > { %4656 = vmatprep.subr.bf16.mxu0 %v7371_v48 }
 0x6ab   : > { %4845 = vmatpush3.bf16.msra.mxu1 %v6248_v25 }
 0x6ac   : > { %4657 = vmatpush3.bf16.msra.mxu0 %v6232_v11  ;;  %4876 = vmatprep.subr.bf16.mxu1 %v6251_v27  ;;  %v6699_v11 = vld [vmem:[#allocation5 + $0x110] sm:$0xff]  }
 0x6ad   : > { %4658 = vmatprep.subr.bf16.mxu0 %v6235_v29  ;;  %v6702_v29 = vld [vmem:[#allocation5 + $0x158] sm:$0xff]  }
 0x6b0   : > { %4659 = vmatpush3.bf16.msra.mxu0 %v6239_v30  ;;  %v6705_v30 = vld [vmem:[#allocation5 + $0x118] sm:$0xff]  }
 0x6b1   : > { %4660 = vmatprep.subr.bf16.mxu0 %v6243_v10  ;;  %v6696_v10 = vld [vmem:[#allocation5 + $0x150] sm:$0xff]  }
 0x6b4   : > { %4661 = vmatpush3.bf16.msra.mxu0 %v6248_v25  ;;  %v6708_v25 = vld [vmem:[#allocation5 + $0x160] sm:$0xff]   ;;  %v4728_v1 = vpop.f32.mrb[40].mxu1 }
 0x6b5   : > { %4690 = vmatprep.subr.bf16.mxu0 %v6251_v27  ;;  %v6711_v27 = vld [vmem:[#allocation5 + $0x120] sm:$0xff]   ;;  %v4729_v19 = vpop.f32.mrb[41].mxu1 }
 0x6b6   : > { %v4730_v43 = vadd.f32 %v4729_v19, %v4728_v1  ;;  %v4731_v42 = vpop.f32.mrb[42].mxu1 }
 0x6b7   : > { %2784 = vmatmul.mubr.bf16.vlgmr.msra.gmra.mrb[32].mxu0 %v6620_v52  ;;  %v4732_v44 = vpop.f32.mrb[43].mxu1 }
 0x6b8   : > { %4691 = vmatpush3.bf16.msra.mxu0 %v6686_v41  ;;  %2864 = vmatprep.mubr.bf16.mxu0 %v6569_v63  ;;  %v6717_v63 = vld [vmem:[#allocation5 + $0x128] sm:$0xff]  }
 0x6b9   : > { %4692 = vmatprep.subr.bf16.mxu0 %v6690_v26 }
 0x6bc   : > { %4693 = vmatpush3.bf16.msra.mxu0 %v6693_v5 }
 0x6bd   : > { %4694 = vmatprep.subr.bf16.mxu0 %v6696_v10 }
 0x6c0   : > { %4695 = vmatpush3.bf16.msra.mxu0 %v6699_v11 }
 0x6c1   : > { %4696 = vmatprep.subr.bf16.mxu0 %v6702_v29 }
 0x6c4   : > { %4697 = vmatpush3.bf16.msra.mxu0 %v6705_v30 }
 0x6c5   : > { %4698 = vmatprep.subr.bf16.mxu0 %v6708_v25 }
 0x6c8   : > { %4699 = vmatpush3.bf16.msra.mxu0 %v6711_v27 }
 0x6c9   : > { %4700 = vmatprep.subr.bf16.mxu0 %v6714_v60 }
 0x6cc   : > { %4701 = vmatpush3.bf16.msra.mxu0 %v6717_v63 }
 0x6cd   : > { %4702 = vmatprep.subr.bf16.mxu0 %v6720_v12 }
 0x6d0   : > { %4703 = vmatpush3.bf16.msra.mxu0 %v6723_v24 }
 0x6d1   : > { %4704 = vmatprep.subr.bf16.mxu0 %v6726_v15 }
 0x6d4   : > { %4705 = vmatpush3.bf16.msra.mxu0 %v6729_v17  ;;  %v4754_v45 = vpop.f32.mrb[44].mxu1 }
 0x6d5   : > { %5062 = vmatprep.subr.bf16.mxu0 %v7271_v18  ;;  %v4755_v48 = vpop.f32.mrb[45].mxu1 }
 0x6d6   : > { %v6736_v40 = vadd.f32 %v4755_v48, %v4754_v45  ;;  %v4757_v21 = vpop.f32.mrb[46].mxu1 }
 0x6d7   : > { %2865 = vmatmul.mubr.bf16.vlgmr.msra.gmra.mrb[36].mxu0 %v6620_v52  ;;  %v4758_v47 = vpop.f32.mrb[47].mxu1 }
 0x6d8   : > { %5064 = vmatprep.mubr.msk.bf16.mxu0 %vm5678_vm2, %v7271_v18 }
 0x6f4   : > { %v4800_v3 = vpop.f32.mrb[48].mxu1 }
 0x76a   : > { %v6738_v52 = vpop.f32.mrb[8].mxu0 }
 0x76b   : > { %7372 = vst [vmem:[#allocation21_spill] sm:$0xff] %v6738_v52  ;;  %v5060_v6 = vpop.f32.mrb[9].mxu0 }
 0x76c   : > { %v6740_v57 = vpop.f32.mrb[10].mxu0 }
 0x76d   : > { %7373 = vst [vmem:[#allocation22_spill] sm:$0xff] %v6740_v57  ;;  %v5061_v54 = vpop.f32.mrb[11].mxu0 }
 0x76e   : > { %v5471_v54 = vld [vmem:[%s7116_s1] sm:$0xff]  }
 0x78a   : > { %v4662_v32 = vpop.f32.mrb[32].mxu0 }
 0x78b   : > { %v4663_v38 = vpop.f32.mrb[33].mxu0 }
 0x78c   : > { %v4664_v23 = vadd.f32 %v4663_v38, %v4662_v32  ;;  %v4665_v36 = vpop.f32.mrb[34].mxu0  ;;  %v6768_v32 = vld [vmem:[#allocation5 + $0x2d0] sm:$0xff]  }
 0x78d   : > { %v4666_v28 = vpop.f32.mrb[35].mxu0  ;;  %7377 = vst [vmem:[#allocation26_spill] sm:$0xff] %v6768_v32  ;;  %v6771_v38 = vld [vmem:[#allocation5 + $0x290] sm:$0xff]   ;;  %v6777_v36 = vld [vmem:[#allocation5 + $0x298] sm:$0xff]  }
 0x78e   : > { %v2826_v1 = vadd.f32 %v4686_v22, %v4664_v23  ;;  %v5469_v28 = vld [vmem:[%s7116_s1 + $0x8] sm:$0xff]   ;;  %v6758_v22 = vld [vmem:[#allocation5 + $0x280] sm:$0xff]   ;;  %7378 = vst [vmem:[#allocation27_spill] sm:$0xff] %v6771_v38  ;;  %v6774_v23 = vld [vmem:[#allocation5 + $0x2d8] sm:$0xff]  }
 0x78f   : > { %7374 = vst [vmem:[#allocation23_spill] sm:$0xff] %v6758_v22  ;;  %7379 = vst [vmem:[#allocation28_spill] sm:$0xff] %v6774_v23 }
 0x790   : > { %v2831_v47 = vpack.c.bf16 %v2826_v1, %v2826_v1  ;;  %7380 = vst [vmem:[#allocation38_spill] sm:$0xff] %v6777_v36  ;;  %v6780_v1 = vld [vmem:[#allocation5 + $0x2e0] sm:$0xff]  }
 0x791   : > { %7381 = vst [vmem:[#allocation39_spill] sm:$0xff] %v6780_v1 }
 0x792   : > { %v2958_v6 = vand.u32 %v2831_v47, %v6054_v34  ;;  %v6801_v47 = vld [vmem:[#allocation5 + $0x2b8] sm:$0xff]  }
 0x793   : > { %7388 = vst [vmem:[#allocation46_spill] sm:$0xff] %v6801_v47 }
 0x7aa   : > { %v4706_v19 = vpop.f32.mrb[36].mxu0 }
 0x7ab   : > { %v4707_v42 = vpop.f32.mrb[37].mxu0 }
 0x7ac   : > { %v4708_v44 = vadd.f32 %v4707_v42, %v4706_v19  ;;  %v4709_v31 = vpop.f32.mrb[38].mxu0  ;;  %v6783_v19 = vld [vmem:[#allocation5 + $0x2a0] sm:$0xff]   ;;  %v6786_v42 = vld [vmem:[#allocation5 + $0x2e8] sm:$0xff]  }
 0x7ad   : > { %v4710_v45 = vpop.f32.mrb[39].mxu0  ;;  %v6751_v31 = vld [vmem:[#allocation5 + $0x2c0] sm:$0xff]   ;;  %7382 = vst [vmem:[#allocation40_spill] sm:$0xff] %v6783_v19  ;;  %7383 = vst [vmem:[#allocation41_spill] sm:$0xff] %v6786_v42 }
 0x7ae   : > { %v2907_v48 = vadd.f32 %v4730_v43, %v4708_v44  ;;  %v6762_v43 = vld [vmem:[#allocation5 + $0x2c8] sm:$0xff]   ;;  %v6792_v45 = vld [vmem:[#allocation5 + $0x2f0] sm:$0xff]  }
 0x7af   : > { %7375 = vst [vmem:[#allocation24_spill] sm:$0xff] %v6762_v43  ;;  %v6789_v44 = vld [vmem:[#allocation5 + $0x2a8] sm:$0xff]   ;;  %7385 = vst [vmem:[#allocation43_spill] sm:$0xff] %v6792_v45 }
 0x7b0   : > { %v2912_v21 = vpack.c.bf16 %v2907_v48, %v2907_v48  ;;  %7384 = vst [vmem:[#allocation42_spill] sm:$0xff] %v6789_v44  ;;  %v6795_v48 = vld [vmem:[#allocation5 + $0x2b0] sm:$0xff]  }
 0x7b1   : > { %7386 = vst [vmem:[#allocation44_spill] sm:$0xff] %v6795_v48 }
 0x7b2   : > { %v2914_v52 = vand.u32 %v2912_v21, %v6054_v34  ;;  %v6798_v21 = vld [vmem:[#allocation5 + $0x2f8] sm:$0xff]  }
 0x7b3   : > { %7387 = vst [vmem:[#allocation45_spill] sm:$0xff] %v6798_v21 }
 0x7b4   : > { %5063 = vmatpush3.bf16.msra.mxu0 %v2914_v52  ;;  %v6765_v52 = vld [vmem:[#allocation5 + $0x288] sm:$0xff]  }
 0x7b5   : > { %5068 = vmatprep.subr.bf16.mxu0 %v7271_v18  ;;  %7376 = vst [vmem:[#allocation25_spill] sm:$0xff] %v6765_v52 }
 0x7b7   : > { %5065 = vmatmul.mubr.msk.bf16.vlgmr.msra.gmra.mrb[40].mxu0 %vm1047_vm5, %v5469_v28  ;;  %v6812_v28 = vld [vmem:[%s5853_s20 + $0x13] ss:$4 sm:$0xf] }
 0x7b8   : > { %5069 = vmatpush3.bf16.msra.mxu0 %v2958_v6  ;;  %5070 = vmatprep.mubr.msk.bf16.mxu0 %vm5678_vm2, %v7271_v18  ;;  %v6809_v6 = vld [vmem:[%s5853_s20 + $0x3] ss:$4 sm:$0xf]  ;;  %7390 = vst [vmem:[#allocation48_spill] sm:$0xff] %v6812_v28  ;;  %v3287_v46 = vrot.slane %v6812_v28, %v7346_v62  ;;  %v3283_v4 = vrot.slane %v6812_v28, %v5867_v35 }
 0x7b9   : > { %4760 = vmatprep.subr.bf16.mxu0 %v6751_v31  ;;  %7389 = vst [vmem:[#allocation47_spill] sm:$0xff] %v6809_v6  ;;  %v3271_v57 = vrot.slane %v6809_v6, %v7346_v62  ;;  %v3267_v7 = vrot.slane %v6809_v6, %v5867_v35 }
 0x7c3   : > { %5071 = vmatmul.mubr.msk.bf16.vlgmr.msra.gmra.mrb[40].mxu0 %vm1047_vm5, %v5471_v54  ;;  %v6815_v54 = vld [vmem:[%s5853_s20 + $0x23] ss:$4 sm:$0xf]  ;;  %s4000_s20 = sshll.u32 %s230_s29, 4  ;;  %s7071_s20 = int_to_ptr.vmem [resolvable:$true] %s4000_s20 }
 0x7c4   : > { %4761 = vmatpush3.bf16.msra.mxu0 %v6758_v22  ;;  %3073 = vmatprep.mubr.bf16.mxu0 %v6502_v2  ;;  %7391 = vst [vmem:[#allocation49_spill] sm:$0xff] %v6815_v54  ;;  %v3303_v58 = vrot.slane %v6815_v54, %v7346_v62  ;;  %s5599_s8 = scalar_lea.vmem %s7071_s20, 256  ;;  %p5606_p10 = scmp.lt.s32.totalorder %s7071_s20, %s5604_s28 }
 0x7c5   : > { %4762 = vmatprep.subr.bf16.mxu0 %v6762_v43  ;;  %p5600_p4 = scmp.ne.s32.totalorder %s7071_s20, %s5599_s8  ;;  %p5607_p13 = scmp.lt.s32.totalorder %s5605_s11, %s5599_s8 }
 0x7c7   : > { %p5601_p6 = pnand %p5600_p4, %p5801_p12  ;;  %p5608_p3 = por %p5607_p13, %p5606_p10 }
 0x7c8   : > { %4763 = vmatpush3.bf16.msra.mxu0 %v6765_v52 }
 0x7c9   : > { %4764 = vmatprep.subr.bf16.mxu0 %v6768_v32  ;;  %p5602_p8 = pneg %p5601_p6 }
 0x7cb   : > { %p5609_p7 = pnand %p5608_p3, %p5602_p8 }
 0x7cc   : > { %4765 = vmatpush3.bf16.msra.mxu0 %v6771_v38 }
 0x7cd   : > { %4766 = vmatprep.subr.bf16.mxu0 %v6774_v23 }
 0x7d0   : > { %4767 = vmatpush3.bf16.msra.mxu0 %v6777_v36 }
 0x7d1   : > { %4768 = vmatprep.subr.bf16.mxu0 %v6780_v1  ;;  %v3333_v1 = vpack.c.bf16 %v3303_v58, %v3303_v58 }
 0x7d3   : > { %v3357_v6 = vunpack.c.l.b16 %v3333_v1 }
 0x7d4   : > { %4769 = vmatpush3.bf16.msra.mxu0 %v6783_v19 }
 0x7d5   : > { %4770 = vmatprep.subr.bf16.mxu0 %v6786_v42  ;;  %v3328_v42 = vpack.c.bf16 %v3283_v4, %v3283_v4 }
 0x7d7   : > { %v3352_v22 = vunpack.c.l.b16 %v3328_v42 }
 0x7d8   : > { %4771 = vmatpush3.bf16.msra.mxu0 %v6789_v44  ;;  %v3324_v44 = vpack.c.bf16 %v3267_v7, %v3267_v7 }
 0x7d9   : > { %4772 = vmatprep.subr.bf16.mxu0 %v6792_v45  ;;  %v3329_v45 = vpack.c.bf16 %v3287_v46, %v3287_v46  ;;  %v3360_v28 = vrot.slane %v3352_v22, 7 }
 0x7da   : > { %v3348_v43 = vunpack.c.l.b16 %v3324_v44 }
 0x7db   : > { %v3353_v52 = vunpack.c.l.b16 %v3329_v45 }
 0x7dc   : > { %4773 = vmatpush3.bf16.msra.mxu0 %v6795_v48  ;;  %v3325_v48 = vpack.c.bf16 %v3271_v57, %v3271_v57  ;;  %v3361_v4 = vsel %vm401_vm0, %v3360_v28, %v3348_v43 }
 0x7dd   : > { %4774 = vmatprep.subr.bf16.mxu0 %v6798_v21  ;;  %v4801_v21 = vpop.f32.mrb[49].mxu1  ;;  %v3364_v37 = vrot.slane %v3353_v52, 7 }
 0x7de   : > { %v4803_v19 = vpop.f32.mrb[50].mxu1  ;;  %v6829_v23 = vadd.f32 %v4801_v21, %v4800_v3  ;;  %v3349_v32 = vunpack.c.l.b16 %v3325_v48 }
 0x7df   : > { %v4804_v38 = vpop.f32.mrb[51].mxu1 }
 0x7e0   : > { %4775 = vmatpush3.bf16.msra.mxu0 %v6801_v47  ;;  %v3299_v47 = vrot.slane %v6815_v54, %v5867_v35  ;;  %v3366_v35 = vrot.slane %v3357_v6, 6  ;;  %v3365_v46 = vsel %vm401_vm0, %v3364_v37, %v3349_v32  ;;  %v5487_v37 = vld [vmem:[#allocation5 + $0x1c0] sm:$0xff]  }
 0x7e1   : > { %5074 = vmatprep.subr.bf16.mxu0 %v7271_v18 }
 0x7e2   : > { %v3332_v36 = vpack.c.bf16 %v3299_v47, %v3299_v47  ;;  %v3367_v58 = vsel %vm404_vm1, %v3366_v35, %v3365_v46 }
 0x7e3   : > { %3074 = vmatmul.mubr.bf16.vlgmr.msra.gmra.mrb[44].mxu0 %v6506_v9  ;;  %v6835_v7 = vpack.c.b16 %v3367_v58, %v3367_v58 }
 0x7e4   : > { %5076 = vmatprep.mubr.msk.bf16.mxu0 %vm5678_vm2, %v7271_v18  ;;  %v3356_v62 = vunpack.c.l.b16 %v3332_v36 }
 0x7e5   : > { %3416 = vmatprep.mubr.bf16.mxu1 %v6835_v7 }
 0x7e6   : > { %v3362_v54 = vrot.slane %v3356_v62, 6 }
 0x7e8   : > { %v3363_v3 = vsel %vm404_vm1, %v3362_v54, %v3361_v4 }
 0x7e9   : > { %v6837_v57 = vpack.c.b16 %v3363_v3, %v3363_v3  ;;  %v7396_v3 = vld [vmem:[#allocation23_spill] sm:$0xff] }
 0x7eb   : > { %3417 = vmatmul.mubr.bf16.vlgmr.msra.gmra.mrb[52].mxu1 %v6837_v57 }
 0x7ec   : > { %4877 = vmatpush3.bf16.msra.mxu1 %v6686_v41  ;;  %3543 = vmatprep.mubr.bf16.mxu1 %v6835_v7  ;;  %v6905_v41 = vld [vmem:[#allocation5 + $0x3e0] sm:$0xff]  }
 0x7ed   : > { %4878 = vmatprep.subr.bf16.mxu1 %v6690_v26  ;;  %v6908_v26 = vld [vmem:[#allocation5 + $0x3a0] sm:$0xff]  }
 0x7f0   : > { %4879 = vmatpush3.bf16.msra.mxu1 %v6693_v5  ;;  %v6911_v5 = vld [vmem:[#allocation5 + $0x3e8] sm:$0xff]  }
 0x7f1   : > { %4880 = vmatprep.subr.bf16.mxu1 %v6696_v10  ;;  %v6914_v10 = vld [vmem:[#allocation5 + $0x3a8] sm:$0xff]  }
 0x7f4   : > { %4881 = vmatpush3.bf16.msra.mxu1 %v6699_v11  ;;  %v6917_v11 = vld [vmem:[#allocation5 + $0x3f0] sm:$0xff]  }
 0x7f5   : > { %4882 = vmatprep.subr.bf16.mxu1 %v6702_v29  ;;  %v6920_v29 = vld [vmem:[#allocation5 + $0x3b0] sm:$0xff]  }
 0x7f8   : > { %4883 = vmatpush3.bf16.msra.mxu1 %v6705_v30  ;;  %v6923_v30 = vld [vmem:[#allocation5 + $0x3f8] sm:$0xff]  }
 0x7f9   : > { %4884 = vmatprep.subr.bf16.mxu1 %v6708_v25  ;;  %v6926_v25 = vld [vmem:[#allocation5 + $0x3b8] sm:$0xff]  }
 0x7fc   : > { %4885 = vmatpush3.bf16.msra.mxu1 %v6711_v27  ;;  %v7392_v27 = vld [vmem:[#allocation48_spill] sm:$0xff] }
 0x7fd   : > { %4886 = vmatprep.subr.bf16.mxu1 %v6714_v60  ;;  %v3295_v60 = vrot.slane %v7392_v27, %v5865_v33 }
 0x7ff   : > { %v3331_v22 = vpack.c.bf16 %v3295_v60, %v3295_v60 }
 0x800   : > { %4887 = vmatpush3.bf16.msra.mxu1 %v6717_v63  ;;  %v7393_v63 = vld [vmem:[#allocation49_spill] sm:$0xff] }
 0x801   : > { %4888 = vmatprep.subr.bf16.mxu1 %v6720_v12  ;;  %v3311_v12 = vrot.slane %v7393_v63, %v5865_v33  ;;  %v3355_v36 = vunpack.c.l.b16 %v3331_v22 }
 0x803   : > { %v3372_v48 = vrot.slane %v3355_v36, 7  ;;  %v5514_v36 = vld [vmem:[#allocation5 + $0xe0] sm:$0xff]  }
 0x804   : > { %4889 = vmatpush3.bf16.msra.mxu1 %v6723_v24  ;;  %v7394_v24 = vld [vmem:[#allocation12_spill] sm:$0xff] }
 0x805   : > { %4890 = vmatprep.subr.bf16.mxu1 %v6726_v15  ;;  %v3291_v15 = vrot.slane %v7392_v27, %v7394_v24  ;;  %v3307_v43 = vrot.slane %v7393_v63, %v7394_v24  ;;  %v7406_v27 = vld [vmem:[#allocation42_spill] sm:$0xff]  ;;  %v7407_v63 = vld [vmem:[#allocation43_spill] sm:$0xff] }
 0x807   : > { %v3330_v32 = vpack.c.bf16 %v3291_v15, %v3291_v15  ;;  %v3334_v1 = vpack.c.bf16 %v3307_v43, %v3307_v43  ;;  %v7409_v43 = vld [vmem:[#allocation45_spill] sm:$0xff] }
 0x808   : > { %4891 = vmatpush3.bf16.msra.mxu1 %v6729_v17  ;;  %v7395_v17 = vld [vmem:[#allocation47_spill] sm:$0xff] }
 0x809   : > { %4898 = vmatprep.subr.bf16.mxu1 %v5487_v37  ;;  %v3275_v52 = vrot.slane %v7395_v17, %v7394_v24  ;;  %v3354_v44 = vunpack.c.l.b16 %v3330_v32  ;;  %v3358_v21 = vunpack.c.l.b16 %v3334_v1  ;;  %v7397_v37 = vld [vmem:[#allocation24_spill] sm:$0xff]  ;;  %v5515_v1 = vld [vmem:[#allocation5 + $0xa0] sm:$0xff]  }
 0x80b   : > { %3544 = vmatmul.mubr.bf16.vlgmr.msra.gmra.mrb[56].mxu1 %v6837_v57  ;;  %v3326_v42 = vpack.c.bf16 %v3275_v52, %v3275_v52  ;;  %v3368_v6 = vrot.slane %v3354_v44, 7  ;;  %v3370_v54 = vrot.slane %v3358_v21, 6  ;;  %v5518_v44 = vld [vmem:[#allocation5 + $0xf0] sm:$0xff]   ;;  %v5521_v21 = vld [vmem:[#allocation5 + $0xb8] sm:$0xff]  }
 0x80c   : > { %4899 = vmatpush3.bf16.msra.mxu1 %v6511_v53 }
 0x80d   : > { %4900 = vmatprep.subr.bf16.mxu1 %v6515_v56 }
 0x810   : > { %4901 = vmatpush3.bf16.msra.mxu1 %v6519_v59 }
 0x811   : > { %4902 = vmatprep.subr.bf16.mxu1 %v6525_v61 }
 0x814   : > { %4903 = vmatpush3.bf16.msra.mxu1 %v6529_v49 }
 0x815   : > { %4904 = vmatprep.subr.bf16.mxu1 %v6532_v0 }
 0x818   : > { %4905 = vmatpush3.bf16.msra.mxu1 %v6537_v13 }
 0x819   : > { %4906 = vmatprep.subr.bf16.mxu1 %v6540_v8 }
 0x81c   : > { %4907 = vmatpush3.bf16.msra.mxu1 %v6543_v14  ;;  %v6876_v14 = vld [vmem:[#allocation5 + $0x3c0] sm:$0xff]  }
 0x81d   : > { %4908 = vmatprep.subr.bf16.mxu1 %v6546_v16  ;;  %v5489_v16 = vld [vmem:[%s7116_s1 + $0x10] sm:$0xff]  }
 0x820   : > { %4909 = vmatpush3.bf16.msra.mxu1 %v6549_v50  ;;  %v6883_v50 = vld [vmem:[#allocation5 + $0x380] sm:$0xff]  }
 0x821   : > { %4910 = vmatprep.subr.bf16.mxu1 %v6552_v51  ;;  %v6887_v51 = vld [vmem:[#allocation5 + $0x3c8] sm:$0xff]  }
 0x824   : > { %4911 = vmatpush3.bf16.msra.mxu1 %v6556_v55  ;;  %v6890_v55 = vld [vmem:[#allocation5 + $0x388] sm:$0xff]  }
 0x825   : > { %4912 = vmatprep.subr.bf16.mxu1 %v6559_v39  ;;  %v6893_v39 = vld [vmem:[#allocation5 + $0x3d0] sm:$0xff]  }
 0x828   : > { %4913 = vmatpush3.bf16.msra.mxu1 %v6563_v20  ;;  %v6896_v20 = vld [vmem:[#allocation5 + $0x390] sm:$0xff]  }
 0x829   : > { %4944 = vmatprep.subr.bf16.mxu1 %v6751_v31  ;;  %v3279_v31 = vrot.slane %v7395_v17, %v5865_v33  ;;  %v3350_v33 = vunpack.c.l.b16 %v3326_v42  ;;  %v5517_v42 = vld [vmem:[#allocation5 + $0xa8] sm:$0xff]  }
 0x82b   : > { %v3327_v38 = vpack.c.bf16 %v3279_v31, %v3279_v31  ;;  %v3369_v35 = vsel %vm401_vm0, %v3368_v6, %v3350_v33  ;;  %v7408_v31 = vld [vmem:[#allocation44_spill] sm:$0xff] }
 0x82c   : > { %v3371_v4 = vsel %vm404_vm1, %v3370_v54, %v3369_v35 }
 0x82d   : > { %v3351_v45 = vunpack.c.l.b16 %v3327_v38  ;;  %v6951_v58 = vpack.c.b16 %v3371_v4, %v3371_v4  ;;  %v7410_v38 = vld [vmem:[#allocation46_spill] sm:$0xff] }
 0x82f   : > { %v3373_v28 = vsel %vm401_vm0, %v3372_v48, %v3351_v45  ;;  %v5519_v45 = vld [vmem:[#allocation5 + $0xb0] sm:$0xff]   ;;  %v5520_v48 = vld [vmem:[#allocation5 + $0xf8] sm:$0xff]  }
 0x8b6   : > { %v4776_v53 = vpop.f32.mrb[44].mxu0 }
 0x8b7   : > { %v4777_v56 = vpop.f32.mrb[45].mxu0 }
 0x8b8   : > { %v4778_v59 = vadd.f32 %v4777_v56, %v4776_v53  ;;  %v4779_v61 = vpop.f32.mrb[46].mxu0  ;;  %v7398_v53 = vld [vmem:[#allocation25_spill] sm:$0xff]  ;;  %v7399_v56 = vld [vmem:[#allocation26_spill] sm:$0xff] }
 0x8b9   : > { %v4780_v49 = vpop.f32.mrb[47].mxu0  ;;  %v7401_v61 = vld [vmem:[#allocation28_spill] sm:$0xff] }
 0x8ba   : > { %v3076_v0 = vadd.f32 %v4778_v59, %v6736_v40  ;;  %v6899_v40 = vld [vmem:[#allocation5 + $0x3d8] sm:$0xff]   ;;  %v7400_v59 = vld [vmem:[#allocation27_spill] sm:$0xff] }
 0x8bb   : > { %v7402_v49 = vld [vmem:[#allocation38_spill] sm:$0xff] }
 0x8bc   : > { %v3081_v13 = vpack.c.bf16 %v3076_v0, %v3076_v0  ;;  %v7403_v0 = vld [vmem:[#allocation39_spill] sm:$0xff] }
 0x8be   : > { %v3083_v8 = vand.u32 %v3081_v13, %v6054_v34  ;;  %v7404_v13 = vld [vmem:[#allocation40_spill] sm:$0xff] }
 0x8c0   : > { %5075 = vmatpush3.bf16.msra.mxu0 %v3083_v8  ;;  %v7405_v8 = vld [vmem:[#allocation41_spill] sm:$0xff] }
 0x8c1   : > { %4806 = vmatprep.subr.bf16.mxu0 %v6876_v14 }
 0x8c3   : > { %5077 = vmatmul.mubr.msk.bf16.vlgmr.msra.gmra.mrb[40].mxu0 %vm1047_vm5, %v5489_v16  ;;  %v4846_v16 = vpop.f32.mrb[52].mxu1 }
 0x8c4   : > { %4807 = vmatpush3.bf16.msra.mxu0 %v6883_v50  ;;  %3200 = vmatprep.mubr.bf16.mxu0 %v6502_v2  ;;  %v6902_v2 = vld [vmem:[#allocation5 + $0x398] sm:$0xff]   ;;  %v4847_v60 = vpop.f32.mrb[53].mxu1 }
 0x8c5   : > { %4808 = vmatprep.subr.bf16.mxu0 %v6887_v51  ;;  %v4849_v24 = vpop.f32.mrb[54].mxu1 }
 0x8c6   : > { %v4850_v15 = vpop.f32.mrb[55].mxu1  ;;  %v7413_v24 = vld [vmem:[#allocation31_spill] sm:$0xff] }
 0x8c7   : > { %v7414_v15 = vld [vmem:[#allocation32_spill] sm:$0xff] }
 0x8c8   : > { %4809 = vmatpush3.bf16.msra.mxu0 %v6890_v55 }
 0x8c9   : > { %4810 = vmatprep.subr.bf16.mxu0 %v6893_v39 }
 0x8cc   : > { %4811 = vmatpush3.bf16.msra.mxu0 %v6896_v20 }
 0x8cd   : > { %4812 = vmatprep.subr.bf16.mxu0 %v6899_v40 }
 0x8d0   : > { %4813 = vmatpush3.bf16.msra.mxu0 %v6902_v2 }
 0x8d1   : > { %4814 = vmatprep.subr.bf16.mxu0 %v6905_v41 }
 0x8d4   : > { %4815 = vmatpush3.bf16.msra.mxu0 %v6908_v26 }
 0x8d5   : > { %4816 = vmatprep.subr.bf16.mxu0 %v6911_v5 }
 0x8d8   : > { %4817 = vmatpush3.bf16.msra.mxu0 %v6914_v10 }
 0x8d9   : > { %4818 = vmatprep.subr.bf16.mxu0 %v6917_v11 }
 0x8dc   : > { %4819 = vmatpush3.bf16.msra.mxu0 %v6920_v29 }
 0x8dd   : > { %4820 = vmatprep.subr.bf16.mxu0 %v6923_v30 }
 0x8de   : > { %v4892_v17 = vpop.f32.mrb[56].mxu1 }
 0x8df   : > { %v4893_v22 = vpop.f32.mrb[57].mxu1 }
 0x8e0   : > { %4821 = vmatpush3.bf16.msra.mxu0 %v6926_v25  ;;  %v4895_v52 = vpop.f32.mrb[58].mxu1 }
 0x8e1   : > { %5080 = vmatprep.subr.bf16.mxu0 %v7271_v18  ;;  %v4896_v32 = vpop.f32.mrb[59].mxu1  ;;  %v7420_v52 = vld [vmem:[#allocation13_spill] sm:$0xff] }
 0x8e2   : > { %v7421_v32 = vld [vmem:[#allocation14_spill] sm:$0xff] }
 0x8e3   : > { %3201 = vmatmul.mubr.bf16.vlgmr.msra.gmra.mrb[48].mxu0 %v6506_v9  ;;  %v3335_v9 = vpack.c.bf16 %v3311_v12, %v3311_v12  ;;  %v6968_v12 = vadd.f32 %v4847_v60, %v4846_v16  ;;  %v7411_v60 = vld [vmem:[#allocation29_spill] sm:$0xff] }
 0x8e4   : > { %5082 = vmatprep.mubr.msk.bf16.mxu0 %vm5678_vm2, %v7271_v18 }
 0x8e5   : > { %v3359_v19 = vunpack.c.l.b16 %v3335_v9  ;;  %v6972_v9 = vadd.f32 %v4893_v22, %v4892_v17  ;;  %v7415_v17 = vld [vmem:[#allocation33_spill] sm:$0xff]  ;;  %v7417_v22 = vld [vmem:[#allocation35_spill] sm:$0xff] }
 0x8e7   : > { %v3374_v47 = vrot.slane %v3359_v19, 6  ;;  %v5516_v19 = vld [vmem:[#allocation5 + $0xe8] sm:$0xff]  }
 0x8e9   : > { %v3375_v62 = vsel %vm404_vm1, %v3374_v47, %v3373_v28 }
 0x8ea   : > { %v6948_v46 = vpack.c.b16 %v3375_v62, %v3375_v62 }
 0x8ec   : > { %3583 = vmatprep.mubr.bf16.mxu1 %v6948_v46 }
 0x8ed   : > { %3584 = vmatmul.mubr.bf16.vlgmr.msra.gmra.mrb[60].mxu1 %v6951_v58 }
 0x8ee   : > { %4945 = vmatpush3.bf16.msra.mxu1 %v7396_v3  ;;  %3710 = vmatprep.mubr.bf16.mxu1 %v6948_v46 }
 0x8ef   : > { %4946 = vmatprep.subr.bf16.mxu1 %v7397_v37 }
 0x8f2   : > { %4947 = vmatpush3.bf16.msra.mxu1 %v7398_v53 }
 0x8f3   : > { %4948 = vmatprep.subr.bf16.mxu1 %v7399_v56 }
 0x8f6   : > { %4949 = vmatpush3.bf16.msra.mxu1 %v7400_v59 }
 0x8f7   : > { %4950 = vmatprep.subr.bf16.mxu1 %v7401_v61 }
 0x8fa   : > { %4951 = vmatpush3.bf16.msra.mxu1 %v7402_v49 }
 0x8fb   : > { %4952 = vmatprep.subr.bf16.mxu1 %v7403_v0 }
 0x8fe   : > { %4953 = vmatpush3.bf16.msra.mxu1 %v7404_v13 }
 0x8ff   : > { %4954 = vmatprep.subr.bf16.mxu1 %v7405_v8 }
 0x902   : > { %4955 = vmatpush3.bf16.msra.mxu1 %v7406_v27  ;;  %v5522_v27 = vld [vmem:[%s7116_s1 + $0x20] sm:$0xff]  }
 0x903   : > { %4956 = vmatprep.subr.bf16.mxu1 %v7407_v63  ;;  %v5523_v63 = vld [vmem:[%s7116_s1 + $0x28] sm:$0xff]  }
 0x906   : > { %4957 = vmatpush3.bf16.msra.mxu1 %v7408_v31  ;;  %v7416_v31 = vld [vmem:[#allocation34_spill] sm:$0xff] }
 0x907   : > { %4958 = vmatprep.subr.bf16.mxu1 %v7409_v43  ;;  %v7418_v43 = vld [vmem:[#allocation36_spill] sm:$0xff] }
 0x90a   : > { %4959 = vmatpush3.bf16.msra.mxu1 %v7410_v38  ;;  %v7422_v38 = vld [vmem:[#allocation15_spill] sm:$0xff] }
 0x90b   : > { %4990 = vmatprep.subr.bf16.mxu1 %v6876_v14 }
 0x90d   : > { %3711 = vmatmul.mubr.bf16.vlgmr.msra.gmra.mrb[64].mxu1 %v6951_v58 }
 0x90e   : > { %4991 = vmatpush3.bf16.msra.mxu1 %v6883_v50  ;;  %3837 = vmatprep.mubr.bf16.mxu1 %v6948_v46 }
 0x90f   : > { %4992 = vmatprep.subr.bf16.mxu1 %v6887_v51 }
 0x912   : > { %4993 = vmatpush3.bf16.msra.mxu1 %v6890_v55 }
 0x913   : > { %4994 = vmatprep.subr.bf16.mxu1 %v6893_v39 }
 0x916   : > { %4995 = vmatpush3.bf16.msra.mxu1 %v6896_v20 }
 0x917   : > { %4996 = vmatprep.subr.bf16.mxu1 %v6899_v40 }
 0x91a   : > { %4997 = vmatpush3.bf16.msra.mxu1 %v6902_v2 }
 0x91b   : > { %4998 = vmatprep.subr.bf16.mxu1 %v6905_v41  ;;  %v5505_v41 = vld [vmem:[#allocation5 + $0xc0] sm:$0xff]  }
 0x91e   : > { %4999 = vmatpush3.bf16.msra.mxu1 %v6908_v26  ;;  %v5506_v26 = vld [vmem:[%s7116_s1 + $0x18] sm:$0xff]  }
 0x91f   : > { %5000 = vmatprep.subr.bf16.mxu1 %v6911_v5  ;;  %v5507_v5 = vld [vmem:[#allocation5 + $0x80] sm:$0xff]  }
 0x922   : > { %5001 = vmatpush3.bf16.msra.mxu1 %v6914_v10  ;;  %v5508_v10 = vld [vmem:[#allocation5 + $0xc8] sm:$0xff]  }
 0x923   : > { %5002 = vmatprep.subr.bf16.mxu1 %v6917_v11  ;;  %v5509_v11 = vld [vmem:[#allocation5 + $0x88] sm:$0xff]  }
 0x926   : > { %5003 = vmatpush3.bf16.msra.mxu1 %v6920_v29  ;;  %v5511_v29 = vld [vmem:[#allocation5 + $0x90] sm:$0xff]  }
 0x927   : > { %5004 = vmatprep.subr.bf16.mxu1 %v6923_v30  ;;  %v5512_v30 = vld [vmem:[#allocation5 + $0xd8] sm:$0xff]  }
 0x92a   : > { %5005 = vmatpush3.bf16.msra.mxu1 %v6926_v25  ;;  %v5513_v25 = vld [vmem:[#allocation5 + $0x98] sm:$0xff]  }
 0x92d   : > { %3838 = vmatmul.mubr.bf16.vlgmr.msra.gmra.mrb[68].mxu1 %v6951_v58 }
 0x9b6   : > { %v4822_v14 = vpop.f32.mrb[48].mxu0 }
 0x9b7   : > { %v4823_v50 = vpop.f32.mrb[49].mxu0 }
 0x9b8   : > { %v4824_v51 = vadd.f32 %v4823_v50, %v4822_v14  ;;  %v4825_v55 = vpop.f32.mrb[50].mxu0  ;;  %v7423_v14 = vld [vmem:[#allocation16_spill] sm:$0xff]  ;;  %v7424_v50 = vld [vmem:[#allocation17_spill] sm:$0xff] }
 0x9b9   : > { %v4826_v39 = vpop.f32.mrb[51].mxu0  ;;  %v7426_v55 = vld [vmem:[#allocation19_spill] sm:$0xff] }
 0x9ba   : > { %v3203_v20 = vadd.f32 %v4824_v51, %v6829_v23  ;;  %v5510_v23 = vld [vmem:[#allocation5 + $0xd0] sm:$0xff]   ;;  %v7425_v51 = vld [vmem:[#allocation18_spill] sm:$0xff] }
 0x9bc   : > { %v3208_v40 = vpack.c.bf16 %v3203_v20, %v3203_v20 }
 0x9be   : > { %v3210_v2 = vand.u32 %v3208_v40, %v6054_v34 }
 0x9c0   : > { %5081 = vmatpush3.bf16.msra.mxu0 %v3210_v2  ;;  %v4914_v47 = vpop.f32.mrb[60].mxu1 }
 0x9c1   : > { %4852 = vmatprep.subr.bf16.mxu0 %v5505_v41  ;;  %v4915_v33 = vpop.f32.mrb[61].mxu1 }
 0x9c2   : > { %v4916_v6 = vadd.f32 %v4915_v33, %v4914_v47  ;;  %v4917_v28 = vpop.f32.mrb[62].mxu1  ;;  %v5532_v47 = vld [vmem:[#allocation5 + $0x318] sm:$0xff]   ;;  %v5533_v33 = vld [vmem:[#allocation5 + $0x360] sm:$0xff]  }
 0x9c3   : > { %5083 = vmatmul.mubr.msk.bf16.vlgmr.msra.gmra.mrb[40].mxu0 %vm1047_vm5, %v5506_v26  ;;  %v4918_v54 = vpop.f32.mrb[63].mxu1  ;;  %v5535_v28 = vld [vmem:[#allocation5 + $0x368] sm:$0xff]  }
 0x9c4   : > { %4853 = vmatpush3.bf16.msra.mxu0 %v5507_v5  ;;  %3456 = vmatprep.mubr.bf16.mxu0 %v6948_v46  ;;  %v3586_v62 = vadd.f32 %v4916_v6, %v6972_v9  ;;  %v7419_v9 = vld [vmem:[#allocation37_spill] sm:$0xff]  ;;  %v5534_v6 = vld [vmem:[#allocation5 + $0x320] sm:$0xff]   ;;  %v5536_v54 = vld [vmem:[#allocation5 + $0x328] sm:$0xff]  }
 0x9c5   : > { %4854 = vmatprep.subr.bf16.mxu0 %v5508_v10 }
 0x9c6   : > { %v3591_v13 = vpack.c.bf16 %v3586_v62, %v3586_v62  ;;  %v5538_v62 = vld [vmem:[#allocation5 + $0x330] sm:$0xff]  }
 0x9c8   : > { %4855 = vmatpush3.bf16.msra.mxu0 %v5509_v11  ;;  %v3593_v16 = vand.u32 %v3591_v13, %v6054_v34  ;;  %v5681_v13 = vmov 1  }
 0x9c9   : > { %4856 = vmatprep.subr.bf16.mxu0 %v5510_v23 }
 0x9cc   : > { %4857 = vmatpush3.bf16.msra.mxu0 %v5511_v29 }
 0x9cd   : > { %4858 = vmatprep.subr.bf16.mxu0 %v5512_v30 }
 0x9d0   : > { %4859 = vmatpush3.bf16.msra.mxu0 %v5513_v25 }
 0x9d1   : > { %4860 = vmatprep.subr.bf16.mxu0 %v5514_v36  ;;  %v5524_v36 = vld [vmem:[#allocation5 + $0x340] sm:$0xff]  }
 0x9d4   : > { %4861 = vmatpush3.bf16.msra.mxu0 %v5515_v1  ;;  %v5525_v1 = vld [vmem:[%s7116_s1 + $0x30] sm:$0xff]  }
 0x9d5   : > { %4862 = vmatprep.subr.bf16.mxu0 %v5516_v19  ;;  %v5526_v19 = vld [vmem:[#allocation5 + $0x300] sm:$0xff]  }
 0x9d8   : > { %4863 = vmatpush3.bf16.msra.mxu0 %v5517_v42  ;;  %v5527_v42 = vld [vmem:[#allocation5 + $0x348] sm:$0xff]  }
 0x9d9   : > { %4864 = vmatprep.subr.bf16.mxu0 %v5518_v44  ;;  %v5528_v44 = vld [vmem:[#allocation5 + $0x308] sm:$0xff]  }
 0x9dc   : > { %4865 = vmatpush3.bf16.msra.mxu0 %v5519_v45  ;;  %v5529_v45 = vld [vmem:[#allocation5 + $0x350] sm:$0xff]  }
 0x9dd   : > { %4866 = vmatprep.subr.bf16.mxu0 %v5520_v48  ;;  %v5530_v48 = vld [vmem:[#allocation5 + $0x310] sm:$0xff]  }
 0x9e0   : > { %4867 = vmatpush3.bf16.msra.mxu0 %v5521_v21  ;;  %v4960_v35 = vpop.f32.mrb[64].mxu1  ;;  %v5531_v21 = vld [vmem:[#allocation5 + $0x358] sm:$0xff]  }
 0x9e1   : > { %5086 = vmatprep.subr.bf16.mxu0 %v7271_v18  ;;  %v4961_v46 = vpop.f32.mrb[65].mxu1 }
 0x9e2   : > { %v4962_v4 = vadd.f32 %v4961_v46, %v4960_v35  ;;  %v4963_v3 = vpop.f32.mrb[66].mxu1  ;;  %v5539_v35 = vld [vmem:[#allocation5 + $0x378] sm:$0xff]  }
 0x9e3   : > { %3457 = vmatmul.mubr.bf16.vlgmr.msra.gmra.mrb[52].mxu0 %v6951_v58  ;;  %v4964_v37 = vpop.f32.mrb[67].mxu1  ;;  %v5540_v46 = vld [vmem:[#allocation5 + $0x338] sm:$0xff]  }
 0x9e4   : > { %5088 = vmatprep.mubr.msk.bf16.mxu0 %vm5678_vm2, %v7271_v18 }
 0xa00   : > { %v5006_v39 = vpop.f32.mrb[68].mxu1 }
 0xa01   : > { %v5007_v20 = vpop.f32.mrb[69].mxu1 }
 0xa02   : > { %v5008_v40 = vadd.f32 %v5007_v20, %v5006_v39  ;;  %v5009_v2 = vpop.f32.mrb[70].mxu1 }
 0xa03   : > { %v5010_v41 = vpop.f32.mrb[71].mxu1 }
 0xab6   : > { %v4868_v53 = vpop.f32.mrb[52].mxu0 }
 0xab7   : > { %v4869_v56 = vpop.f32.mrb[53].mxu0 }
 0xab8   : > { %v4870_v59 = vadd.f32 %v4869_v56, %v4868_v53  ;;  %v4871_v61 = vpop.f32.mrb[54].mxu0 }
 0xab9   : > { %v4872_v58 = vpop.f32.mrb[55].mxu0 }
 0xaba   : > { %v3459_v49 = vadd.f32 %v4870_v59, %v6968_v12  ;;  %v7412_v12 = vld [vmem:[#allocation30_spill] sm:$0xff] }
 0xabc   : > { %v3464_v0 = vpack.c.bf16 %v3459_v49, %v3459_v49  ;;  %v7427_v49 = vld [vmem:[#allocation20_spill] sm:$0xff] }
 0xabe   : > { %v3466_v8 = vand.u32 %v3464_v0, %v6054_v34  ;;  %v5680_v0 = vmov 0  }
 0xabf   : > { %5238 = vset.pattern.permute.xlu1 %v5680_v0  ;;  %5237 = vset.pattern.permute.xlu0 %v5680_v0 }
 0xac0   : > { %5087 = vmatpush3.bf16.msra.mxu0 %v3466_v8 }
 0xac1   : > { %5092 = vmatprep.subr.bf16.mxu0 %v7271_v18 }
 0xac3   : > { %5089 = vmatmul.mubr.msk.bf16.vlgmr.msra.gmra.mrb[40].mxu0 %vm1047_vm5, %v5522_v27 }
 0xac4   : > { %5093 = vmatpush3.bf16.msra.mxu0 %v3593_v16  ;;  %5094 = vmatprep.mubr.msk.bf16.mxu0 %vm5678_vm2, %v7271_v18  ;;  %v7428_v16 = vld [vmem:[#allocation21_spill] sm:$0xff] }
 0xac5   : > { %4922 = vmatprep.subr.bf16.mxu0 %v7411_v60 }
 0xacf   : > { %5095 = vmatmul.mubr.msk.bf16.vlgmr.msra.gmra.mrb[40].mxu0 %vm1047_vm5, %v5523_v63 }
 0xad0   : > { %4923 = vmatpush3.bf16.msra.mxu0 %v7412_v12  ;;  %3670 = vmatprep.mubr.bf16.mxu0 %v6835_v7  ;;  %v7429_v12 = vld [vmem:[#allocation22_spill] sm:$0xff] }
 0xad1   : > { %4924 = vmatprep.subr.bf16.mxu0 %v7413_v24 }
 0xad4   : > { %4925 = vmatpush3.bf16.msra.mxu0 %v7414_v15 }
 0xad5   : > { %4926 = vmatprep.subr.bf16.mxu0 %v7415_v17 }
 0xad8   : > { %4927 = vmatpush3.bf16.msra.mxu0 %v7416_v31 }
 0xad9   : > { %4928 = vmatprep.subr.bf16.mxu0 %v7417_v22 }
 0xadc   : > { %4929 = vmatpush3.bf16.msra.mxu0 %v7418_v43 }
 0xadd   : > { %4930 = vmatprep.subr.bf16.mxu0 %v7419_v9 }
 0xae0   : > { %4931 = vmatpush3.bf16.msra.mxu0 %v7420_v52 }
 0xae1   : > { %4932 = vmatprep.subr.bf16.mxu0 %v7421_v32 }
 0xae4   : > { %4933 = vmatpush3.bf16.msra.mxu0 %v7422_v38 }
 0xae5   : > { %4934 = vmatprep.subr.bf16.mxu0 %v7423_v14 }
 0xae8   : > { %4935 = vmatpush3.bf16.msra.mxu0 %v7424_v50 }
 0xae9   : > { %4936 = vmatprep.subr.bf16.mxu0 %v7425_v51 }
 0xaec   : > { %4937 = vmatpush3.bf16.msra.mxu0 %v7426_v55 }
 0xaed   : > { %5098 = vmatprep.subr.bf16.mxu0 %v7271_v18 }
 0xaef   : > { %3671 = vmatmul.mubr.bf16.vlgmr.msra.gmra.mrb[56].mxu0 %v6837_v57 }
 0xaf0   : > { %5100 = vmatprep.mubr.msk.bf16.mxu0 %vm5678_vm2, %v7271_v18 }
 0xbc2   : > { %v4938_v26 = vpop.f32.mrb[56].mxu0 }
 0xbc3   : > { %v4939_v5 = vpop.f32.mrb[57].mxu0 }
 0xbc4   : > { %v4940_v10 = vadd.f32 %v4939_v5, %v4938_v26  ;;  %v4941_v11 = vpop.f32.mrb[58].mxu0 }
 0xbc5   : > { %v4942_v23 = vpop.f32.mrb[59].mxu0 }
 0xbc6   : > { %v3713_v29 = vadd.f32 %v4962_v4, %v4940_v10 }
 0xbc8   : > { %v3718_v30 = vpack.c.bf16 %v3713_v29, %v3713_v29 }
 0xbca   : > { %v3720_v25 = vand.u32 %v3718_v30, %v6054_v34 }
 0xbcc   : > { %5099 = vmatpush3.bf16.msra.mxu0 %v3720_v25 }
 0xbcd   : > { %4968 = vmatprep.subr.bf16.mxu0 %v5524_v36 }
 0xbcf   : > { %5101 = vmatmul.mubr.msk.bf16.vlgmr.msra.gmra.mrb[40].mxu0 %vm1047_vm5, %v5525_v1 }
 0xbd0   : > { %4969 = vmatpush3.bf16.msra.mxu0 %v5526_v19  ;;  %3797 = vmatprep.mubr.bf16.mxu0 %v6835_v7  ;;  %v5537_v7 = vld [vmem:[#allocation5 + $0x370] sm:$0xff]  }
 0xbd1   : > { %4970 = vmatprep.subr.bf16.mxu0 %v5527_v42 }
 0xbd4   : > { %4971 = vmatpush3.bf16.msra.mxu0 %v5528_v44 }
 0xbd5   : > { %4972 = vmatprep.subr.bf16.mxu0 %v5529_v45 }
 0xbd8   : > { %4973 = vmatpush3.bf16.msra.mxu0 %v5530_v48 }
 0xbd9   : > { %4974 = vmatprep.subr.bf16.mxu0 %v5531_v21 }
 0xbdc   : > { %4975 = vmatpush3.bf16.msra.mxu0 %v5532_v47 }
 0xbdd   : > { %4976 = vmatprep.subr.bf16.mxu0 %v5533_v33 }
 0xbe0   : > { %4977 = vmatpush3.bf16.msra.mxu0 %v5534_v6 }
 0xbe1   : > { %4978 = vmatprep.subr.bf16.mxu0 %v5535_v28 }
 0xbe4   : > { %4979 = vmatpush3.bf16.msra.mxu0 %v5536_v54 }
 0xbe5   : > { %4980 = vmatprep.subr.bf16.mxu0 %v5537_v7 }
 0xbe8   : > { %4981 = vmatpush3.bf16.msra.mxu0 %v5538_v62 }
 0xbe9   : > { %4982 = vmatprep.subr.bf16.mxu0 %v5539_v35 }
 0xbec   : > { %4983 = vmatpush3.bf16.msra.mxu0 %v5540_v46 }
 0xbed   : > { %5104 = vmatprep.subr.bf16.mxu0 %v7271_v18 }
 0xbef   : > { %3798 = vmatmul.mubr.bf16.vlgmr.msra.gmra.mrb[60].mxu0 %v6837_v57  ;;  %v3925_v57 = vld [vmem:[%s7118_s3 + $0x8] sm:$0xff] }
 0xbf0   : > { %5106 = vmatprep.mubr.msk.bf16.mxu0 %vm5678_vm2, %v7271_v18  ;;  %3933 = vperm.xlu1 %5238, %v3925_v57   ;;  %v3924_v18 = vld [vmem:[%s7118_s3] sm:$0xff] }
 0xbf4   : > { %5239 = vset.pattern.permute.xlu1 %v5681_v13 }
 0xbf5   : > { %3941 = vperm.xlu1 %5239, %v3924_v18  }
 0xc6f   : > { %v3934_v20 = vpop.permute.xlu1 %3933 }
 0xcc2   : > { %v4984_v4 = vpop.f32.mrb[60].mxu0 }
 0xcc3   : > { %v4985_v3 = vpop.f32.mrb[61].mxu0 }
 0xcc4   : > { %v4986_v37 = vadd.f32 %v4985_v3, %v4984_v4  ;;  %v4987_v53 = vpop.f32.mrb[62].mxu0 }
 0xcc5   : > { %v4988_v56 = vpop.f32.mrb[63].mxu0 }
 0xcc6   : > { %v3840_v59 = vadd.f32 %v5008_v40, %v4986_v37  ;;  %v3942_v40 = vpop.permute.xlu1 %3941 }
 0xcc8   : > { %v3845_v61 = vpack.c.bf16 %v3840_v59, %v3840_v59 }
 0xcca   : > { %v3847_v58 = vand.u32 %v3845_v61, %v6054_v34 }
 0xccc   : > { %5105 = vmatpush3.bf16.msra.mxu0 %v3847_v58 }
 0xccf   : > { %5107 = vmatmul.mubr.msk.bf16.vlgmr.msra.gmra.mrb[40].mxu0 %vm1047_vm5, %v7427_v49 }
 0xda2   : > { %v3883_v34 = vpop.f32.mrb[40].mxu0 }
 0xda3   : > { %v5108_v8 = vpop.f32.mrb[41].mxu0  ;;  %v3892_v27 = vadd.f32 %v3883_v34, %v7428_v16 }
 0xda4   : > { %v3886_v60 = vpop.f32.mrb[42].mxu0 }
 0xda5   : > { %3893 = vadd.xlane.f32.xlu0 %v3892_v27  ;;  %v5109_v63 = vpop.f32.mrb[43].mxu0  ;;  %v3895_v24 = vadd.f32 %v3886_v60, %v7429_v12 }
 0xda9   : > { %3896 = vadd.xlane.f32.xlu0 %v3895_v24 }
 0xdbf   : > { %3928 = vperm.xlu0 %5237, %v3924_v18  }
 0xdc3   : > { %5240 = vset.pattern.permute.xlu0 %v5681_v13 }
 0xe32   : > { %v3894_v15 = vpop.xlane.xlu0 %3893 }
 0xe33   : > { %v3898_v17 = vmul.f32 0.00390625, %v3894_v15 }
 0xe35   : > { %v3900_v31 = vsub.f32 %v7428_v16, %v3898_v17  ;;  %v3901_v22 = vsub.f32 %v3883_v34, %v3898_v17 }
 0xe36   : > { %v3897_v43 = vpop.xlane.xlu0 %3896 }
 0xe37   : > { %v3899_v9 = vmul.f32 0.00390625, %v3897_v43  ;;  %v3904_v52 = vmul.f32 %v3900_v31, %v3900_v31  ;;  %v3905_v32 = vmul.f32 %v3901_v22, %v3901_v22 }
 0xe39   : > { %v3902_v38 = vsub.f32 %v7429_v12, %v3899_v9  ;;  %v3903_v14 = vsub.f32 %v3886_v60, %v3899_v9  ;;  %v3908_v50 = vadd.f32 %v3905_v32, %v3904_v52 }
 0xe3b   : > { %3909 = vadd.xlane.f32.xlu1 %v3908_v50  ;;  %v3906_v51 = vmul.f32 %v3902_v38, %v3902_v38  ;;  %v3907_v55 = vmul.f32 %v3903_v14, %v3903_v14 }
 0xe3d   : > { %v3911_v39 = vadd.f32 %v3907_v55, %v3906_v51 }
 0xe3e   : > { %v3929_v29 = vpop.permute.xlu0 %3928 }
 0xe3f   : > { %3912 = vadd.xlane.f32.xlu1 %v3911_v39 }
 0xe50   : > { %3945 = vperm.xlu1 %5239, %v3925_v57  }
 0xec8   : > { %v3910_v2 = vpop.xlane.xlu1 %3909 }
 0xec9   : > { %v3914_v41 = vmul.f32 0.00390625, %v3910_v2 }
 0xecb   : > { %v3916_v26 = vadd.f32 1e-05, %v3914_v41 }
 0xecc   : > { %v3913_v5 = vpop.xlane.xlu1 %3912 }
 0xecd   : > { %5377 = vrsqrt.f32 %v3916_v26  ;;  %v3915_v10 = vmul.f32 0.00390625, %v3913_v5 }
 0xecf   : > { %v3917_v11 = vadd.f32 1e-05, %v3915_v10 }
 0xed0   : > { %v3946_v33 = vpop.permute.xlu1 %3945 }
 0xed1   : > { %5379 = vrsqrt.f32 %v3917_v11 }
 0xed7   : > { %v5378_v23 = vpop.eup %5377 }
 0xed8   : > { %v3920_v30 = vmul.f32 %v5378_v23, %v3900_v31  ;;  %v3921_v25 = vmul.f32 %v5378_v23, %v3901_v22 }
 0xeda   : > { %v3936_v36 = vmul.f32 %v3929_v29, %v3920_v30  ;;  %v3937_v1 = vmul.f32 %v3929_v29, %v3921_v25 }
 0xedb   : > { %v5380_v19 = vpop.eup %5379 }
 0xedc   : > { %v3922_v42 = vmul.f32 %v5380_v19, %v3902_v38  ;;  %v3923_v44 = vmul.f32 %v5380_v19, %v3903_v14  ;;  %v3948_v45 = vadd.f32 %v3942_v40, %v3936_v36  ;;  %v3949_v48 = vadd.f32 %v3942_v40, %v3937_v1 }
 0xede   : > { %v3938_v21 = vmul.f32 %v3934_v20, %v3922_v42  ;;  %v3939_v47 = vmul.f32 %v3934_v20, %v3923_v44  ;;  %v3956_v6 = vmul.f32 0.70710677, %v3948_v45  ;;  %v3957_v28 = vmul.f32 0.70710677, %v3949_v48 }
 0xedf   : > { %v3952_v4 = vmul.f32 0.5, %v3948_v45  ;;  %v3953_v56 = vmul.f32 0.5, %v3949_v48 }
 0xee0   : > { %v3950_v54 = vadd.f32 %v3946_v33, %v3938_v21  ;;  %v3951_v7 = vadd.f32 %v3946_v33, %v3939_v47  ;;  %5381 = verf.f32 %v3956_v6 }
 0xee1   : > { %5383 = verf.f32 %v3957_v28 }
 0xee2   : > { %v3958_v62 = vmul.f32 0.70710677, %v3950_v54  ;;  %v3959_v35 = vmul.f32 0.70710677, %v3951_v7  ;;  %v3954_v49 = vmul.f32 0.5, %v3950_v54  ;;  %v3955_v0 = vmul.f32 0.5, %v3951_v7 }
 0xee4   : > { %5385 = verf.f32 %v3958_v62 }
 0xee5   : > { %5387 = verf.f32 %v3959_v35 }
 0xeea   : > { %v5382_v46 = vpop.eup %5381 }
 0xeeb   : > { %v3964_v3 = vadd.f32 1.0, %v5382_v46  ;;  %v5384_v37 = vpop.eup %5383 }
 0xeec   : > { %v3965_v59 = vadd.f32 1.0, %v5384_v37 }
 0xeed   : > { %v3968_v61 = vmul.f32 %v3964_v3, %v3952_v4 }
 0xeee   : > { %v5386_v53 = vpop.eup %5385  ;;  %v3969_v13 = vmul.f32 %v3965_v59, %v3953_v56 }
 0xeef   : > { %v5388_v58 = vpop.eup %5387  ;;  %v3966_v57 = vadd.f32 1.0, %v5386_v53 }
 0xef0   : > { %v3967_v18 = vadd.f32 1.0, %v5388_v58  ;;  %v4275_v16 = vpack.c.bf16 %v3969_v13, %v3968_v61 }
 0xef1   : > { %v3970_v34 = vmul.f32 %v3966_v57, %v3954_v49 }
 0xef2   : > { %v3971_v8 = vmul.f32 %v3967_v18, %v3955_v0  ;;  %3984 = vst [vmem:[%s230_s29] sm:$0xff] %v4275_v16 }
 0xef4   : > { %v4276_v27 = vpack.c.bf16 %v3971_v8, %v3970_v34 }
 0xef6   : > { %3985 = vst [vmem:[%s230_s29 + $0x8] sm:$0xff] %v4276_v27 }
 0xef7   : > { %5612 = shalt.err (!%p5609_p7)
}
 0xef8   : > { %s5613_s13 = scalar_lea.hbm %s7069_s7, 256  ;;  %s5617_s23 = scalar_lea.hbm %s7119_s4, 512 }
 0xef9   : > { %p5614_p9 = scmp.ne.s32.totalorder %s7069_s7, %s5613_s13  ;;  %p5618_p5 = scmp.lt.u32.totalorder %s7069_s7, %s7119_s4 }
 0xefa   : > { %p5619_p11 = scmp.lt.u32.totalorder %s5617_s23, %s5613_s13  ;;  %p5621_p4 = scmp.lt.u32.totalorder %s5613_s13, %s7069_s7 }
 0xefb   : > { %p5615_p2 = pnand %p5614_p9, %p5801_p12 }
 0xefc   : > { %p5620_p1 = por %p5619_p11, %p5618_p5 }
 0xefd   : > { %p5616_p0 = pneg %p5615_p2 }
 0xefe   : > { %p5622_p6 = por %p5621_p4, %p5620_p1 }
 0xf00   : > { %p5623_p8 = pnand %p5622_p6, %p5616_p0 }
 0xf02   : > { %5626 = shalt.err (!%p5623_p8)
}
 0xf03   : > { %s5683_s29 = smov 128   ;;  %s5684_s10 = smov 8  }
 0xf04   : > { %5175 = dma.vmem_to_hbm [thread:$0]  (%p5801_p12), %s7071_s20, 256, %s7069_s7, %s3987_s26, %s5683_s29, %s5683_s29, %s5684_s10  }
 0xf05 PF: > { %s4015_s6 = sand.u32 1, %s5657_s15   ;;  %p7430_p10 = scmp.ne.s32.totalorder %s7243_s22, 0 }
 0xf06   : > { %p7431_p13 = scmp.ge.s32.totalorder %s5669_s18, 2  ;;  %s4016_s5 = scalar_lea.sflag [#allocation4], %s4015_s6 }
 0xf08   : > { %p5186_p3 = pnand %p7431_p13, %p7430_p10 }
 0xf0a   : > { %5652 = dma.done.wait (!%p5186_p3), %s4016_s5, 256  }
 0xf0b   : > { %5654 = vsyncadd (!%p5186_p3), %s4016_s5, 4294967040  ;;  %p18_p7 = scmp.ge.s32.totalorder %s5766_s27, 4   ;;  %s7432_s15 = smov %s5661_s16 }
 0xf0c   : > { %s7433_s16 = smov %s5665_s17  ;;  %s7434_s17 = smov %s5797_s24 }
 0xf0d   : > { %s7435_s18 = smov %s5766_s27  ;;  %20 = sbr.rel (!%p18_p7) target bundleno = 6 (0x6), region = 106 }
 0xf14   :  { %4021 = vsyncpa [#allocation3], 1 }
 0xf15   :  { %4023 = vsyncpa [#allocation3 + $0x1], 1 }
 0xf16   :  { %4024 = vsyncpa [#allocation6], 1 }
 0xf17   :  { %4025 = vsyncpa [#allocation4], 1 }
 0xf18   :  { %4027 = vsyncpa [#allocation4 + $0x1], 1 }

</bundles_post_ra>
